<compile_context>
chip_gen: v7x
topology: tpu7x:2x2x1
jax: 0.10.0
libtpu: 0.0.40
codegen_flags: <defaults>
</compile_context>

<pallas_src>
import functools

import jax
import jax.numpy as jnp
from jax.experimental import pallas as pl
from jax.experimental.pallas import tpu as pltpu


# ---------------------------------------------------------------------------
# Depthwise conv on a (C, HW) tile: per-tap lane roll + pre-masked weight plane.
# Two accumulators break the serial add chain of the unrolled tap loop.
# ---------------------------------------------------------------------------
def _dw_conv(x, planes_ref, bias_ref, shifts):
    C, HW = x.shape
    acc0 = jnp.zeros((C, HW), jnp.float32)
    acc1 = jnp.zeros((C, HW), jnp.float32)
    for t, sh in enumerate(shifts):
        src = pltpu.roll(x, sh, 1) if sh else x       # src[c,l] = x[c,(l-sh)%HW]
        contrib = src * planes_ref[t]                 # zero-pad mask folded into plane
        if t % 2 == 0:
            acc0 = acc0 + contrib
        else:
            acc1 = acc1 + contrib
    return acc0 + acc1 + bias_ref[...]


# ---------------------------------------------------------------------------
# Fused kernel.  Refs:
#   x_ref   : (1, C, HW)   one image, NCHW flattened (lane axis = H*W)
#   w0m_ref : (T0, C, HW)  conv0 per-tap weight planes (zero-pad mask folded in)
#   b0_ref  : (C, 1)       conv0 bias
#   wsm_ref : (T1, C, HW)  conv_spatial per-tap weight planes
#   bs_ref  : (C, 1)       conv_spatial bias
#   w1_ref  : (2C, C)      conv1 1x1 weight (PyTorch (out, in) layout)
#   b1_ref  : (2C, 1)      conv1 bias
#   o_ref   : (1, C, HW)
# shifts0 / shifts1 are static per-tap lane-roll amounts (already reduced mod HW).
# ---------------------------------------------------------------------------
def _lka_fused_kernel(x_ref, w0m_ref, b0_ref, wsm_ref, bs_ref, w1_ref, b1_ref,
                      o_ref, *, shifts0, shifts1):
    C = x_ref.shape[1]
    x = x_ref[0].astype(jnp.float32)                               # (C, HW)

    # depthwise conv0 (d_k x d_k, dilation 1), then conv_spatial (dd_k x dd_k, dilated)
    attn = _dw_conv(x, w0m_ref, b0_ref, shifts0)
    attn = _dw_conv(attn, wsm_ref, bs_ref, shifts1)

    # 1x1 conv (C -> 2C) on the MXU (fp32 contract precision), then sigmoid gate (EUP).
    fg = jnp.dot(w1_ref[...], attn,
                 preferred_element_type=jnp.float32,
                 precision=jax.lax.Precision.HIGHEST) + b1_ref[...]  # (2C, HW)
    f, g = fg[:C, :], fg[C:, :]
    o_ref[0] = (jax.nn.sigmoid(g) * f).astype(o_ref.dtype)


# ---------------------------------------------------------------------------
# Wrapper-side tap tables: lane shifts + zero-pad-masked per-tap weight planes.
# w_dw : (C, 1, K, K) PyTorch depthwise weight.
# planes[t, c, h*W + w] = w_dw[c,0,ki,kj] if the tap stays inside the image at output
# pixel (h, w), else 0 (this implements the conv's zero padding without padded buffers
# and makes the circular lane roll safe at image edges).
# ---------------------------------------------------------------------------
def _dw_tap_tables(w_dw, dil, H, W):
    C, _, K, _ = w_dw.shape
    pad = dil * (K - 1) // 2
    HW = H * W
    hh = jnp.arange(H)[:, None]
    ww = jnp.arange(W)[None, :]
    shifts, planes = [], []
    for ki in range(K):
        for kj in range(K):
            dy, dx = ki * dil - pad, kj * dil - pad
            shifts.append((-(dy * W + dx)) % HW)                    # static roll amount
            valid = ((hh + dy >= 0) & (hh + dy < H) &
                     (ww + dx >= 0) & (ww + dx < W))
            mask = valid.astype(jnp.float32).reshape(1, HW)
            wt = w_dw[:, 0, ki, kj].astype(jnp.float32)[:, None]    # (C, 1)
            planes.append(wt * mask)                                # (C, HW)
    return tuple(shifts), jnp.stack(planes, axis=0)                 # (T, C, HW)


# ---------------------------------------------------------------------------
# Full module forward: NCHW in / NCHW out, PyTorch parameter layouts.
# ---------------------------------------------------------------------------
def attention_module_forward(x_nchw, w0_t, b0, ws_t, bs, w1_t, b1, dilation):
    B, C, H, W = x_nchw.shape
    HW = H * W

    shifts0, w0m = _dw_tap_tables(w0_t, 1, H, W)
    shifts1, wsm = _dw_tap_tables(ws_t, dilation, H, W)
    T0, T1 = len(shifts0), len(shifts1)

    w1 = w1_t[:, :, 0, 0].astype(jnp.float32)                       # (2C, C)
    b0c = b0.astype(jnp.float32).reshape(C, 1)
    bsc = bs.astype(jnp.float32).reshape(C, 1)
    b1c = b1.astype(jnp.float32).reshape(2 * C, 1)

    kernel = functools.partial(_lka_fused_kernel, shifts0=shifts0, shifts1=shifts1)

    out = pl.pallas_call(
        kernel,
        out_shape=jax.ShapeDtypeStruct((B, C, HW), x_nchw.dtype),
        grid=(B,),
        in_specs=[
            pl.BlockSpec((1, C, HW), lambda b: (b, 0, 0)),      # x (one image)
            pl.BlockSpec((T0, C, HW), lambda b: (0, 0, 0)),     # conv0 tap planes
            pl.BlockSpec((C, 1), lambda b: (0, 0)),             # conv0 bias
            pl.BlockSpec((T1, C, HW), lambda b: (0, 0, 0)),     # conv_spatial tap planes
            pl.BlockSpec((C, 1), lambda b: (0, 0)),             # conv_spatial bias
            pl.BlockSpec((2 * C, C), lambda b: (0, 0)),         # conv1 weight
            pl.BlockSpec((2 * C, 1), lambda b: (0, 0)),         # conv1 bias
        ],
        out_specs=pl.BlockSpec((1, C, HW), lambda b: (b, 0, 0)),
        compiler_params=pltpu.CompilerParams(
            dimension_semantics=("parallel",),                  # megacore split over images
            vmem_limit_bytes=32 * 1024 * 1024,
        ),
    )(x_nchw.reshape(B, C, HW), w0m, b0c, wsm, bsc, w1, b1c)
    return out.reshape(B, C, H, W)


# ---------------------------------------------------------------------------
# Pure-JAX reference (lax convolutions, HIGHEST precision) for validation.
# ---------------------------------------------------------------------------
def reference_forward(x, w0_t, b0, ws_t, bs, w1_t, b1, dilation):
    dn = ("NCHW", "OIHW", "NCHW")
    C = x.shape[1]
    d_k = w0_t.shape[-1]
    d_p = (d_k - 1) // 2
    dd_k = ws_t.shape[-1]
    dd_p = dilation * (dd_k - 1) // 2
    hp = jax.lax.Precision.HIGHEST

    attn = jax.lax.conv_general_dilated(
        x, w0_t, (1, 1), [(d_p, d_p), (d_p, d_p)],
        dimension_numbers=dn, feature_group_count=C, precision=hp
    ) + b0[None, :, None, None]
    attn = jax.lax.conv_general_dilated(
        attn, ws_t, (1, 1), [(dd_p, dd_p), (dd_p, dd_p)],
        rhs_dilation=(dilation, dilation),
        dimension_numbers=dn, feature_group_count=C, precision=hp
    ) + bs[None, :, None, None]
    fg = jax.lax.conv_general_dilated(
        attn, w1_t, (1, 1), [(0, 0), (0, 0)],
        dimension_numbers=dn, precision=hp
    ) + b1[None, :, None, None]
    f, g = fg[:, :C], fg[:, C:]
    return jax.nn.sigmoid(g) * f


if __name__ == "__main__":
    # SimVP-style LKA: dim=16, kernel_size=21, dilation=3
    #   -> conv0 5x5 pad 2, conv_spatial 7x7 dil 3 pad 9, conv1 1x1 (16 -> 32).
    B, dim, H, W = 2, 16, 16, 16
    kernel_size, dilation = 21, 3
    d_k = 2 * dilation - 1
    dd_k = kernel_size // dilation + (kernel_size // dilation % 2 - 1)

    key = jax.random.PRNGKey(0)
    ks = jax.random.split(key, 7)
    x = jax.random.normal(ks[0], (B, dim, H, W), jnp.float32)
    w0 = jax.random.normal(ks[1], (dim, 1, d_k, d_k), jnp.float32) * 0.1
    b0 = jax.random.normal(ks[2], (dim,), jnp.float32) * 0.1
    ws = jax.random.normal(ks[3], (dim, 1, dd_k, dd_k), jnp.float32) * 0.1
    bs = jax.random.normal(ks[4], (dim,), jnp.float32) * 0.1
    w1 = jax.random.normal(ks[5], (2 * dim, dim, 1, 1), jnp.float32) * 0.1
    b1 = jax.random.normal(ks[6], (2 * dim,), jnp.float32) * 0.1

    fwd = jax.jit(attention_module_forward, static_argnums=7)
    out = fwd(x, w0, b0, ws, bs, w1, b1, dilation)
    out = jax.block_until_ready(out)

    ref = reference_forward(x, w0, b0, ws, bs, w1, b1, dilation)
    assert out.shape == (B, dim, H, W)
    # Depthwise stages are exact f32 on the VPU; the 1x1 conv is an fp32-precision MXU
    # matmul, so the remaining difference vs. the lax reference is summation-order /
    # contraction-algorithm noise only.
    assert jnp.allclose(out, ref, rtol=1e-3, atol=1e-3), "mismatch vs JAX reference"

    print("KERNEL_OK")
</pallas_src>

<mosaic_0001>
module attributes {stable_mosaic.version = 11 : i64} {
  func.func @_lka_fused_kernel(%arg0: i32, %arg1: memref<1x16x256xf32, #tpu.memory_space<vmem>>, %arg2: memref<25x16x256xf32, #tpu.memory_space<vmem>>, %arg3: memref<16x1xf32, #tpu.memory_space<vmem>>, %arg4: memref<49x16x256xf32, #tpu.memory_space<vmem>>, %arg5: memref<16x1xf32, #tpu.memory_space<vmem>>, %arg6: memref<32x16xf32, #tpu.memory_space<vmem>>, %arg7: memref<32x1xf32, #tpu.memory_space<vmem>>, %arg8: memref<1x16x256xf32, #tpu.memory_space<vmem>>) attributes {dimension_semantics = [#tpu.dimension_semantics<parallel>], iteration_bounds = array<i64: 2>, scalar_prefetch = 0 : i64, scratch_operands = 0 : i64, tpu.core_type = #tpu.core_type<tc>, window_params = [{transform_indices = @transform_0, window_bounds = array<i64: 1, 16, 256>}, {pipeline_mode = #tpu.pipeline_mode<synchronous>, transform_indices = @transform_1, window_bounds = array<i64: 25, 16, 256>}, {pipeline_mode = #tpu.pipeline_mode<synchronous>, transform_indices = @transform_2, window_bounds = array<i64: 16, 1>}, {pipeline_mode = #tpu.pipeline_mode<synchronous>, transform_indices = @transform_3, window_bounds = array<i64: 49, 16, 256>}, {pipeline_mode = #tpu.pipeline_mode<synchronous>, transform_indices = @transform_4, window_bounds = array<i64: 16, 1>}, {pipeline_mode = #tpu.pipeline_mode<synchronous>, transform_indices = @transform_5, window_bounds = array<i64: 32, 16>}, {pipeline_mode = #tpu.pipeline_mode<synchronous>, transform_indices = @transform_6, window_bounds = array<i64: 32, 1>}, {transform_indices = @transform_7, window_bounds = array<i64: 1, 16, 256>}]} {
    %c0 = arith.constant 0 : index
    %c0_0 = arith.constant 0 : index
    %c0_1 = arith.constant 0 : index
    %0 = vector.load %arg1[%c0, %c0_0, %c0_1] : memref<1x16x256xf32, #tpu.memory_space<vmem>>, vector<1x16x256xf32>
    %1 = vector.shape_cast %0 : vector<1x16x256xf32> to vector<16x256xf32>
    %cst = arith.constant 0.000000e+00 : f32
    %2 = vector.broadcast %cst : f32 to vector<16x256xf32>
    %cst_2 = arith.constant 0.000000e+00 : f32
    %3 = vector.broadcast %cst_2 : f32 to vector<16x256xf32>
    %c34_i32 = arith.constant 34 : i32
    %4 = tpu.dynamic_rotate %1 by %c34_i32 dim 1 : vector<16x256xf32>, i32 -> vector<16x256xf32>
    %c0_3 = arith.constant 0 : index
    %c0_4 = arith.constant 0 : index
    %c0_5 = arith.constant 0 : index
    %5 = vector.load %arg2[%c0_3, %c0_4, %c0_5] : memref<25x16x256xf32, #tpu.memory_space<vmem>>, vector<1x16x256xf32>
    %6 = vector.shape_cast %5 : vector<1x16x256xf32> to vector<16x256xf32>
    %7 = arith.mulf %4, %6 : vector<16x256xf32>
    %8 = arith.addf %2, %7 : vector<16x256xf32>
    %c33_i32 = arith.constant 33 : i32
    %9 = tpu.dynamic_rotate %1 by %c33_i32 dim 1 : vector<16x256xf32>, i32 -> vector<16x256xf32>
    %c1 = arith.constant 1 : index
    %c0_6 = arith.constant 0 : index
    %c0_7 = arith.constant 0 : index
    %10 = vector.load %arg2[%c1, %c0_6, %c0_7] : memref<25x16x256xf32, #tpu.memory_space<vmem>>, vector<1x16x256xf32>
    %11 = vector.shape_cast %10 : vector<1x16x256xf32> to vector<16x256xf32>
    %12 = arith.mulf %9, %11 : vector<16x256xf32>
    %13 = arith.addf %3, %12 : vector<16x256xf32>
    %c32_i32 = arith.constant 32 : i32
    %14 = tpu.dynamic_rotate %1 by %c32_i32 dim 1 : vector<16x256xf32>, i32 -> vector<16x256xf32>
    %c2 = arith.constant 2 : index
    %c0_8 = arith.constant 0 : index
    %c0_9 = arith.constant 0 : index
    %15 = vector.load %arg2[%c2, %c0_8, %c0_9] : memref<25x16x256xf32, #tpu.memory_space<vmem>>, vector<1x16x256xf32>
    %16 = vector.shape_cast %15 : vector<1x16x256xf32> to vector<16x256xf32>
    %17 = arith.mulf %14, %16 : vector<16x256xf32>
    %18 = arith.addf %8, %17 : vector<16x256xf32>
    %c31_i32 = arith.constant 31 : i32
    %19 = tpu.dynamic_rotate %1 by %c31_i32 dim 1 : vector<16x256xf32>, i32 -> vector<16x256xf32>
    %c3 = arith.constant 3 : index
    %c0_10 = arith.constant 0 : index
    %c0_11 = arith.constant 0 : index
    %20 = vector.load %arg2[%c3, %c0_10, %c0_11] : memref<25x16x256xf32, #tpu.memory_space<vmem>>, vector<1x16x256xf32>
    %21 = vector.shape_cast %20 : vector<1x16x256xf32> to vector<16x256xf32>
    %22 = arith.mulf %19, %21 : vector<16x256xf32>
    %23 = arith.addf %13, %22 : vector<16x256xf32>
    %c30_i32 = arith.constant 30 : i32
    %24 = tpu.dynamic_rotate %1 by %c30_i32 dim 1 : vector<16x256xf32>, i32 -> vector<16x256xf32>
    %c4 = arith.constant 4 : index
    %c0_12 = arith.constant 0 : index
    %c0_13 = arith.constant 0 : index
    %25 = vector.load %arg2[%c4, %c0_12, %c0_13] : memref<25x16x256xf32, #tpu.memory_space<vmem>>, vector<1x16x256xf32>
    %26 = vector.shape_cast %25 : vector<1x16x256xf32> to vector<16x256xf32>
    %27 = arith.mulf %24, %26 : vector<16x256xf32>
    %28 = arith.addf %18, %27 : vector<16x256xf32>
    %c18_i32 = arith.constant 18 : i32
    %29 = tpu.dynamic_rotate %1 by %c18_i32 dim 1 : vector<16x256xf32>, i32 -> vector<16x256xf32>
    %c5 = arith.constant 5 : index
    %c0_14 = arith.constant 0 : index
    %c0_15 = arith.constant 0 : index
    %30 = vector.load %arg2[%c5, %c0_14, %c0_15] : memref<25x16x256xf32, #tpu.memory_space<vmem>>, vector<1x16x256xf32>
    %31 = vector.shape_cast %30 : vector<1x16x256xf32> to vector<16x256xf32>
    %32 = arith.mulf %29, %31 : vector<16x256xf32>
    %33 = arith.addf %23, %32 : vector<16x256xf32>
    %c17_i32 = arith.constant 17 : i32
    %34 = tpu.dynamic_rotate %1 by %c17_i32 dim 1 : vector<16x256xf32>, i32 -> vector<16x256xf32>
    %c6 = arith.constant 6 : index
    %c0_16 = arith.constant 0 : index
    %c0_17 = arith.constant 0 : index
    %35 = vector.load %arg2[%c6, %c0_16, %c0_17] : memref<25x16x256xf32, #tpu.memory_space<vmem>>, vector<1x16x256xf32>
    %36 = vector.shape_cast %35 : vector<1x16x256xf32> to vector<16x256xf32>
    %37 = arith.mulf %34, %36 : vector<16x256xf32>
    %38 = arith.addf %28, %37 : vector<16x256xf32>
    %c16_i32 = arith.constant 16 : i32
    %39 = tpu.dynamic_rotate %1 by %c16_i32 dim 1 : vector<16x256xf32>, i32 -> vector<16x256xf32>
    %c7 = arith.constant 7 : index
    %c0_18 = arith.constant 0 : index
    %c0_19 = arith.constant 0 : index
    %40 = vector.load %arg2[%c7, %c0_18, %c0_19] : memref<25x16x256xf32, #tpu.memory_space<vmem>>, vector<1x16x256xf32>
    %41 = vector.shape_cast %40 : vector<1x16x256xf32> to vector<16x256xf32>
    %42 = arith.mulf %39, %41 : vector<16x256xf32>
    %43 = arith.addf %33, %42 : vector<16x256xf32>
    %c15_i32 = arith.constant 15 : i32
    %44 = tpu.dynamic_rotate %1 by %c15_i32 dim 1 : vector<16x256xf32>, i32 -> vector<16x256xf32>
    %c8 = arith.constant 8 : index
    %c0_20 = arith.constant 0 : index
    %c0_21 = arith.constant 0 : index
    %45 = vector.load %arg2[%c8, %c0_20, %c0_21] : memref<25x16x256xf32, #tpu.memory_space<vmem>>, vector<1x16x256xf32>
    %46 = vector.shape_cast %45 : vector<1x16x256xf32> to vector<16x256xf32>
    %47 = arith.mulf %44, %46 : vector<16x256xf32>
    %48 = arith.addf %38, %47 : vector<16x256xf32>
    %c14_i32 = arith.constant 14 : i32
    %49 = tpu.dynamic_rotate %1 by %c14_i32 dim 1 : vector<16x256xf32>, i32 -> vector<16x256xf32>
    %c9 = arith.constant 9 : index
    %c0_22 = arith.constant 0 : index
    %c0_23 = arith.constant 0 : index
    %50 = vector.load %arg2[%c9, %c0_22, %c0_23] : memref<25x16x256xf32, #tpu.memory_space<vmem>>, vector<1x16x256xf32>
    %51 = vector.shape_cast %50 : vector<1x16x256xf32> to vector<16x256xf32>
    %52 = arith.mulf %49, %51 : vector<16x256xf32>
    %53 = arith.addf %43, %52 : vector<16x256xf32>
    %c2_i32 = arith.constant 2 : i32
    %54 = tpu.dynamic_rotate %1 by %c2_i32 dim 1 : vector<16x256xf32>, i32 -> vector<16x256xf32>
    %c10 = arith.constant 10 : index
    %c0_24 = arith.constant 0 : index
    %c0_25 = arith.constant 0 : index
    %55 = vector.load %arg2[%c10, %c0_24, %c0_25] : memref<25x16x256xf32, #tpu.memory_space<vmem>>, vector<1x16x256xf32>
    %56 = vector.shape_cast %55 : vector<1x16x256xf32> to vector<16x256xf32>
    %57 = arith.mulf %54, %56 : vector<16x256xf32>
    %58 = arith.addf %48, %57 : vector<16x256xf32>
    %c1_i32 = arith.constant 1 : i32
    %59 = tpu.dynamic_rotate %1 by %c1_i32 dim 1 : vector<16x256xf32>, i32 -> vector<16x256xf32>
    %c11 = arith.constant 11 : index
    %c0_26 = arith.constant 0 : index
    %c0_27 = arith.constant 0 : index
    %60 = vector.load %arg2[%c11, %c0_26, %c0_27] : memref<25x16x256xf32, #tpu.memory_space<vmem>>, vector<1x16x256xf32>
    %61 = vector.shape_cast %60 : vector<1x16x256xf32> to vector<16x256xf32>
    %62 = arith.mulf %59, %61 : vector<16x256xf32>
    %63 = arith.addf %53, %62 : vector<16x256xf32>
    %c12 = arith.constant 12 : index
    %c0_28 = arith.constant 0 : index
    %c0_29 = arith.constant 0 : index
    %64 = vector.load %arg2[%c12, %c0_28, %c0_29] : memref<25x16x256xf32, #tpu.memory_space<vmem>>, vector<1x16x256xf32>
    %65 = vector.shape_cast %64 : vector<1x16x256xf32> to vector<16x256xf32>
    %66 = arith.mulf %1, %65 : vector<16x256xf32>
    %67 = arith.addf %58, %66 : vector<16x256xf32>
    %c255_i32 = arith.constant 255 : i32
    %68 = tpu.dynamic_rotate %1 by %c255_i32 dim 1 : vector<16x256xf32>, i32 -> vector<16x256xf32>
    %c13 = arith.constant 13 : index
    %c0_30 = arith.constant 0 : index
    %c0_31 = arith.constant 0 : index
    %69 = vector.load %arg2[%c13, %c0_30, %c0_31] : memref<25x16x256xf32, #tpu.memory_space<vmem>>, vector<1x16x256xf32>
    %70 = vector.shape_cast %69 : vector<1x16x256xf32> to vector<16x256xf32>
    %71 = arith.mulf %68, %70 : vector<16x256xf32>
    %72 = arith.addf %63, %71 : vector<16x256xf32>
    %c254_i32 = arith.constant 254 : i32
    %73 = tpu.dynamic_rotate %1 by %c254_i32 dim 1 : vector<16x256xf32>, i32 -> vector<16x256xf32>
    %c14 = arith.constant 14 : index
    %c0_32 = arith.constant 0 : index
    %c0_33 = arith.constant 0 : index
    %74 = vector.load %arg2[%c14, %c0_32, %c0_33] : memref<25x16x256xf32, #tpu.memory_space<vmem>>, vector<1x16x256xf32>
    %75 = vector.shape_cast %74 : vector<1x16x256xf32> to vector<16x256xf32>
    %76 = arith.mulf %73, %75 : vector<16x256xf32>
    %77 = arith.addf %67, %76 : vector<16x256xf32>
    %c242_i32 = arith.constant 242 : i32
    %78 = tpu.dynamic_rotate %1 by %c242_i32 dim 1 : vector<16x256xf32>, i32 -> vector<16x256xf32>
    %c15 = arith.constant 15 : index
    %c0_34 = arith.constant 0 : index
    %c0_35 = arith.constant 0 : index
    %79 = vector.load %arg2[%c15, %c0_34, %c0_35] : memref<25x16x256xf32, #tpu.memory_space<vmem>>, vector<1x16x256xf32>
    %80 = vector.shape_cast %79 : vector<1x16x256xf32> to vector<16x256xf32>
    %81 = arith.mulf %78, %80 : vector<16x256xf32>
    %82 = arith.addf %72, %81 : vector<16x256xf32>
    %c241_i32 = arith.constant 241 : i32
    %83 = tpu.dynamic_rotate %1 by %c241_i32 dim 1 : vector<16x256xf32>, i32 -> vector<16x256xf32>
    %c16 = arith.constant 16 : index
    %c0_36 = arith.constant 0 : index
    %c0_37 = arith.constant 0 : index
    %84 = vector.load %arg2[%c16, %c0_36, %c0_37] : memref<25x16x256xf32, #tpu.memory_space<vmem>>, vector<1x16x256xf32>
    %85 = vector.shape_cast %84 : vector<1x16x256xf32> to vector<16x256xf32>
    %86 = arith.mulf %83, %85 : vector<16x256xf32>
    %87 = arith.addf %77, %86 : vector<16x256xf32>
    %c240_i32 = arith.constant 240 : i32
    %88 = tpu.dynamic_rotate %1 by %c240_i32 dim 1 : vector<16x256xf32>, i32 -> vector<16x256xf32>
    %c17 = arith.constant 17 : index
    %c0_38 = arith.constant 0 : index
    %c0_39 = arith.constant 0 : index
    %89 = vector.load %arg2[%c17, %c0_38, %c0_39] : memref<25x16x256xf32, #tpu.memory_space<vmem>>, vector<1x16x256xf32>
    %90 = vector.shape_cast %89 : vector<1x16x256xf32> to vector<16x256xf32>
    %91 = arith.mulf %88, %90 : vector<16x256xf32>
    %92 = arith.addf %82, %91 : vector<16x256xf32>
    %c239_i32 = arith.constant 239 : i32
    %93 = tpu.dynamic_rotate %1 by %c239_i32 dim 1 : vector<16x256xf32>, i32 -> vector<16x256xf32>
    %c18 = arith.constant 18 : index
    %c0_40 = arith.constant 0 : index
    %c0_41 = arith.constant 0 : index
    %94 = vector.load %arg2[%c18, %c0_40, %c0_41] : memref<25x16x256xf32, #tpu.memory_space<vmem>>, vector<1x16x256xf32>
    %95 = vector.shape_cast %94 : vector<1x16x256xf32> to vector<16x256xf32>
    %96 = arith.mulf %93, %95 : vector<16x256xf32>
    %97 = arith.addf %87, %96 : vector<16x256xf32>
    %c238_i32 = arith.constant 238 : i32
    %98 = tpu.dynamic_rotate %1 by %c238_i32 dim 1 : vector<16x256xf32>, i32 -> vector<16x256xf32>
    %c19 = arith.constant 19 : index
    %c0_42 = arith.constant 0 : index
    %c0_43 = arith.constant 0 : index
    %99 = vector.load %arg2[%c19, %c0_42, %c0_43] : memref<25x16x256xf32, #tpu.memory_space<vmem>>, vector<1x16x256xf32>
    %100 = vector.shape_cast %99 : vector<1x16x256xf32> to vector<16x256xf32>
    %101 = arith.mulf %98, %100 : vector<16x256xf32>
    %102 = arith.addf %92, %101 : vector<16x256xf32>
    %c226_i32 = arith.constant 226 : i32
    %103 = tpu.dynamic_rotate %1 by %c226_i32 dim 1 : vector<16x256xf32>, i32 -> vector<16x256xf32>
    %c20 = arith.constant 20 : index
    %c0_44 = arith.constant 0 : index
    %c0_45 = arith.constant 0 : index
    %104 = vector.load %arg2[%c20, %c0_44, %c0_45] : memref<25x16x256xf32, #tpu.memory_space<vmem>>, vector<1x16x256xf32>
    %105 = vector.shape_cast %104 : vector<1x16x256xf32> to vector<16x256xf32>
    %106 = arith.mulf %103, %105 : vector<16x256xf32>
    %107 = arith.addf %97, %106 : vector<16x256xf32>
    %c225_i32 = arith.constant 225 : i32
    %108 = tpu.dynamic_rotate %1 by %c225_i32 dim 1 : vector<16x256xf32>, i32 -> vector<16x256xf32>
    %c21 = arith.constant 21 : index
    %c0_46 = arith.constant 0 : index
    %c0_47 = arith.constant 0 : index
    %109 = vector.load %arg2[%c21, %c0_46, %c0_47] : memref<25x16x256xf32, #tpu.memory_space<vmem>>, vector<1x16x256xf32>
    %110 = vector.shape_cast %109 : vector<1x16x256xf32> to vector<16x256xf32>
    %111 = arith.mulf %108, %110 : vector<16x256xf32>
    %112 = arith.addf %102, %111 : vector<16x256xf32>
    %c224_i32 = arith.constant 224 : i32
    %113 = tpu.dynamic_rotate %1 by %c224_i32 dim 1 : vector<16x256xf32>, i32 -> vector<16x256xf32>
    %c22 = arith.constant 22 : index
    %c0_48 = arith.constant 0 : index
    %c0_49 = arith.constant 0 : index
    %114 = vector.load %arg2[%c22, %c0_48, %c0_49] : memref<25x16x256xf32, #tpu.memory_space<vmem>>, vector<1x16x256xf32>
    %115 = vector.shape_cast %114 : vector<1x16x256xf32> to vector<16x256xf32>
    %116 = arith.mulf %113, %115 : vector<16x256xf32>
    %117 = arith.addf %107, %116 : vector<16x256xf32>
    %c223_i32 = arith.constant 223 : i32
    %118 = tpu.dynamic_rotate %1 by %c223_i32 dim 1 : vector<16x256xf32>, i32 -> vector<16x256xf32>
    %c23 = arith.constant 23 : index
    %c0_50 = arith.constant 0 : index
    %c0_51 = arith.constant 0 : index
    %119 = vector.load %arg2[%c23, %c0_50, %c0_51] : memref<25x16x256xf32, #tpu.memory_space<vmem>>, vector<1x16x256xf32>
    %120 = vector.shape_cast %119 : vector<1x16x256xf32> to vector<16x256xf32>
    %121 = arith.mulf %118, %120 : vector<16x256xf32>
    %122 = arith.addf %112, %121 : vector<16x256xf32>
    %c222_i32 = arith.constant 222 : i32
    %123 = tpu.dynamic_rotate %1 by %c222_i32 dim 1 : vector<16x256xf32>, i32 -> vector<16x256xf32>
    %c24 = arith.constant 24 : index
    %c0_52 = arith.constant 0 : index
    %c0_53 = arith.constant 0 : index
    %124 = vector.load %arg2[%c24, %c0_52, %c0_53] : memref<25x16x256xf32, #tpu.memory_space<vmem>>, vector<1x16x256xf32>
    %125 = vector.shape_cast %124 : vector<1x16x256xf32> to vector<16x256xf32>
    %126 = arith.mulf %123, %125 : vector<16x256xf32>
    %127 = arith.addf %117, %126 : vector<16x256xf32>
    %128 = arith.addf %127, %122 : vector<16x256xf32>
    %c0_54 = arith.constant 0 : index
    %c0_55 = arith.constant 0 : index
    %129 = vector.load %arg3[%c0_54, %c0_55] : memref<16x1xf32, #tpu.memory_space<vmem>>, vector<16x1xf32>
    %130 = vector.broadcast %129 : vector<16x1xf32> to vector<16x256xf32>
    %131 = arith.addf %128, %130 : vector<16x256xf32>
    %cst_56 = arith.constant 0.000000e+00 : f32
    %132 = vector.broadcast %cst_56 : f32 to vector<16x256xf32>
    %cst_57 = arith.constant 0.000000e+00 : f32
    %133 = vector.broadcast %cst_57 : f32 to vector<16x256xf32>
    %c153_i32 = arith.constant 153 : i32
    %134 = tpu.dynamic_rotate %131 by %c153_i32 dim 1 : vector<16x256xf32>, i32 -> vector<16x256xf32>
    %c0_58 = arith.constant 0 : index
    %c0_59 = arith.constant 0 : index
    %c0_60 = arith.constant 0 : index
    %135 = vector.load %arg4[%c0_58, %c0_59, %c0_60] : memref<49x16x256xf32, #tpu.memory_space<vmem>>, vector<1x16x256xf32>
    %136 = vector.shape_cast %135 : vector<1x16x256xf32> to vector<16x256xf32>
    %137 = arith.mulf %134, %136 : vector<16x256xf32>
    %138 = arith.addf %132, %137 : vector<16x256xf32>
    %c150_i32 = arith.constant 150 : i32
    %139 = tpu.dynamic_rotate %131 by %c150_i32 dim 1 : vector<16x256xf32>, i32 -> vector<16x256xf32>
    %c1_61 = arith.constant 1 : index
    %c0_62 = arith.constant 0 : index
    %c0_63 = arith.constant 0 : index
    %140 = vector.load %arg4[%c1_61, %c0_62, %c0_63] : memref<49x16x256xf32, #tpu.memory_space<vmem>>, vector<1x16x256xf32>
    %141 = vector.shape_cast %140 : vector<1x16x256xf32> to vector<16x256xf32>
    %142 = arith.mulf %139, %141 : vector<16x256xf32>
    %143 = arith.addf %133, %142 : vector<16x256xf32>
    %c147_i32 = arith.constant 147 : i32
    %144 = tpu.dynamic_rotate %131 by %c147_i32 dim 1 : vector<16x256xf32>, i32 -> vector<16x256xf32>
    %c2_64 = arith.constant 2 : index
    %c0_65 = arith.constant 0 : index
    %c0_66 = arith.constant 0 : index
    %145 = vector.load %arg4[%c2_64, %c0_65, %c0_66] : memref<49x16x256xf32, #tpu.memory_space<vmem>>, vector<1x16x256xf32>
    %146 = vector.shape_cast %145 : vector<1x16x256xf32> to vector<16x256xf32>
    %147 = arith.mulf %144, %146 : vector<16x256xf32>
    %148 = arith.addf %138, %147 : vector<16x256xf32>
    %c144_i32 = arith.constant 144 : i32
    %149 = tpu.dynamic_rotate %131 by %c144_i32 dim 1 : vector<16x256xf32>, i32 -> vector<16x256xf32>
    %c3_67 = arith.constant 3 : index
    %c0_68 = arith.constant 0 : index
    %c0_69 = arith.constant 0 : index
    %150 = vector.load %arg4[%c3_67, %c0_68, %c0_69] : memref<49x16x256xf32, #tpu.memory_space<vmem>>, vector<1x16x256xf32>
    %151 = vector.shape_cast %150 : vector<1x16x256xf32> to vector<16x256xf32>
    %152 = arith.mulf %149, %151 : vector<16x256xf32>
    %153 = arith.addf %143, %152 : vector<16x256xf32>
    %c141_i32 = arith.constant 141 : i32
    %154 = tpu.dynamic_rotate %131 by %c141_i32 dim 1 : vector<16x256xf32>, i32 -> vector<16x256xf32>
    %c4_70 = arith.constant 4 : index
    %c0_71 = arith.constant 0 : index
    %c0_72 = arith.constant 0 : index
    %155 = vector.load %arg4[%c4_70, %c0_71, %c0_72] : memref<49x16x256xf32, #tpu.memory_space<vmem>>, vector<1x16x256xf32>
    %156 = vector.shape_cast %155 : vector<1x16x256xf32> to vector<16x256xf32>
    %157 = arith.mulf %154, %156 : vector<16x256xf32>
    %158 = arith.addf %148, %157 : vector<16x256xf32>
    %c138_i32 = arith.constant 138 : i32
    %159 = tpu.dynamic_rotate %131 by %c138_i32 dim 1 : vector<16x256xf32>, i32 -> vector<16x256xf32>
    %c5_73 = arith.constant 5 : index
    %c0_74 = arith.constant 0 : index
    %c0_75 = arith.constant 0 : index
    %160 = vector.load %arg4[%c5_73, %c0_74, %c0_75] : memref<49x16x256xf32, #tpu.memory_space<vmem>>, vector<1x16x256xf32>
    %161 = vector.shape_cast %160 : vector<1x16x256xf32> to vector<16x256xf32>
    %162 = arith.mulf %159, %161 : vector<16x256xf32>
    %163 = arith.addf %153, %162 : vector<16x256xf32>
    %c135_i32 = arith.constant 135 : i32
    %164 = tpu.dynamic_rotate %131 by %c135_i32 dim 1 : vector<16x256xf32>, i32 -> vector<16x256xf32>
    %c6_76 = arith.constant 6 : index
    %c0_77 = arith.constant 0 : index
    %c0_78 = arith.constant 0 : index
    %165 = vector.load %arg4[%c6_76, %c0_77, %c0_78] : memref<49x16x256xf32, #tpu.memory_space<vmem>>, vector<1x16x256xf32>
    %166 = vector.shape_cast %165 : vector<1x16x256xf32> to vector<16x256xf32>
    %167 = arith.mulf %164, %166 : vector<16x256xf32>
    %168 = arith.addf %158, %167 : vector<16x256xf32>
    %c105_i32 = arith.constant 105 : i32
    %169 = tpu.dynamic_rotate %131 by %c105_i32 dim 1 : vector<16x256xf32>, i32 -> vector<16x256xf32>
    %c7_79 = arith.constant 7 : index
    %c0_80 = arith.constant 0 : index
    %c0_81 = arith.constant 0 : index
    %170 = vector.load %arg4[%c7_79, %c0_80, %c0_81] : memref<49x16x256xf32, #tpu.memory_space<vmem>>, vector<1x16x256xf32>
    %171 = vector.shape_cast %170 : vector<1x16x256xf32> to vector<16x256xf32>
    %172 = arith.mulf %169, %171 : vector<16x256xf32>
    %173 = arith.addf %163, %172 : vector<16x256xf32>
    %c102_i32 = arith.constant 102 : i32
    %174 = tpu.dynamic_rotate %131 by %c102_i32 dim 1 : vector<16x256xf32>, i32 -> vector<16x256xf32>
    %c8_82 = arith.constant 8 : index
    %c0_83 = arith.constant 0 : index
    %c0_84 = arith.constant 0 : index
    %175 = vector.load %arg4[%c8_82, %c0_83, %c0_84] : memref<49x16x256xf32, #tpu.memory_space<vmem>>, vector<1x16x256xf32>
    %176 = vector.shape_cast %175 : vector<1x16x256xf32> to vector<16x256xf32>
    %177 = arith.mulf %174, %176 : vector<16x256xf32>
    %178 = arith.addf %168, %177 : vector<16x256xf32>
    %c99_i32 = arith.constant 99 : i32
    %179 = tpu.dynamic_rotate %131 by %c99_i32 dim 1 : vector<16x256xf32>, i32 -> vector<16x256xf32>
    %c9_85 = arith.constant 9 : index
    %c0_86 = arith.constant 0 : index
    %c0_87 = arith.constant 0 : index
    %180 = vector.load %arg4[%c9_85, %c0_86, %c0_87] : memref<49x16x256xf32, #tpu.memory_space<vmem>>, vector<1x16x256xf32>
    %181 = vector.shape_cast %180 : vector<1x16x256xf32> to vector<16x256xf32>
    %182 = arith.mulf %179, %181 : vector<16x256xf32>
    %183 = arith.addf %173, %182 : vector<16x256xf32>
    %c96_i32 = arith.constant 96 : i32
    %184 = tpu.dynamic_rotate %131 by %c96_i32 dim 1 : vector<16x256xf32>, i32 -> vector<16x256xf32>
    %c10_88 = arith.constant 10 : index
    %c0_89 = arith.constant 0 : index
    %c0_90 = arith.constant 0 : index
    %185 = vector.load %arg4[%c10_88, %c0_89, %c0_90] : memref<49x16x256xf32, #tpu.memory_space<vmem>>, vector<1x16x256xf32>
    %186 = vector.shape_cast %185 : vector<1x16x256xf32> to vector<16x256xf32>
    %187 = arith.mulf %184, %186 : vector<16x256xf32>
    %188 = arith.addf %178, %187 : vector<16x256xf32>
    %c93_i32 = arith.constant 93 : i32
    %189 = tpu.dynamic_rotate %131 by %c93_i32 dim 1 : vector<16x256xf32>, i32 -> vector<16x256xf32>
    %c11_91 = arith.constant 11 : index
    %c0_92 = arith.constant 0 : index
    %c0_93 = arith.constant 0 : index
    %190 = vector.load %arg4[%c11_91, %c0_92, %c0_93] : memref<49x16x256xf32, #tpu.memory_space<vmem>>, vector<1x16x256xf32>
    %191 = vector.shape_cast %190 : vector<1x16x256xf32> to vector<16x256xf32>
    %192 = arith.mulf %189, %191 : vector<16x256xf32>
    %193 = arith.addf %183, %192 : vector<16x256xf32>
    %c90_i32 = arith.constant 90 : i32
    %194 = tpu.dynamic_rotate %131 by %c90_i32 dim 1 : vector<16x256xf32>, i32 -> vector<16x256xf32>
    %c12_94 = arith.constant 12 : index
    %c0_95 = arith.constant 0 : index
    %c0_96 = arith.constant 0 : index
    %195 = vector.load %arg4[%c12_94, %c0_95, %c0_96] : memref<49x16x256xf32, #tpu.memory_space<vmem>>, vector<1x16x256xf32>
    %196 = vector.shape_cast %195 : vector<1x16x256xf32> to vector<16x256xf32>
    %197 = arith.mulf %194, %196 : vector<16x256xf32>
    %198 = arith.addf %188, %197 : vector<16x256xf32>
    %c87_i32 = arith.constant 87 : i32
    %199 = tpu.dynamic_rotate %131 by %c87_i32 dim 1 : vector<16x256xf32>, i32 -> vector<16x256xf32>
    %c13_97 = arith.constant 13 : index
    %c0_98 = arith.constant 0 : index
    %c0_99 = arith.constant 0 : index
    %200 = vector.load %arg4[%c13_97, %c0_98, %c0_99] : memref<49x16x256xf32, #tpu.memory_space<vmem>>, vector<1x16x256xf32>
    %201 = vector.shape_cast %200 : vector<1x16x256xf32> to vector<16x256xf32>
    %202 = arith.mulf %199, %201 : vector<16x256xf32>
    %203 = arith.addf %193, %202 : vector<16x256xf32>
    %c57_i32 = arith.constant 57 : i32
    %204 = tpu.dynamic_rotate %131 by %c57_i32 dim 1 : vector<16x256xf32>, i32 -> vector<16x256xf32>
    %c14_100 = arith.constant 14 : index
    %c0_101 = arith.constant 0 : index
    %c0_102 = arith.constant 0 : index
    %205 = vector.load %arg4[%c14_100, %c0_101, %c0_102] : memref<49x16x256xf32, #tpu.memory_space<vmem>>, vector<1x16x256xf32>
    %206 = vector.shape_cast %205 : vector<1x16x256xf32> to vector<16x256xf32>
    %207 = arith.mulf %204, %206 : vector<16x256xf32>
    %208 = arith.addf %198, %207 : vector<16x256xf32>
    %c54_i32 = arith.constant 54 : i32
    %209 = tpu.dynamic_rotate %131 by %c54_i32 dim 1 : vector<16x256xf32>, i32 -> vector<16x256xf32>
    %c15_103 = arith.constant 15 : index
    %c0_104 = arith.constant 0 : index
    %c0_105 = arith.constant 0 : index
    %210 = vector.load %arg4[%c15_103, %c0_104, %c0_105] : memref<49x16x256xf32, #tpu.memory_space<vmem>>, vector<1x16x256xf32>
    %211 = vector.shape_cast %210 : vector<1x16x256xf32> to vector<16x256xf32>
    %212 = arith.mulf %209, %211 : vector<16x256xf32>
    %213 = arith.addf %203, %212 : vector<16x256xf32>
    %c51_i32 = arith.constant 51 : i32
    %214 = tpu.dynamic_rotate %131 by %c51_i32 dim 1 : vector<16x256xf32>, i32 -> vector<16x256xf32>
    %c16_106 = arith.constant 16 : index
    %c0_107 = arith.constant 0 : index
    %c0_108 = arith.constant 0 : index
    %215 = vector.load %arg4[%c16_106, %c0_107, %c0_108] : memref<49x16x256xf32, #tpu.memory_space<vmem>>, vector<1x16x256xf32>
    %216 = vector.shape_cast %215 : vector<1x16x256xf32> to vector<16x256xf32>
    %217 = arith.mulf %214, %216 : vector<16x256xf32>
    %218 = arith.addf %208, %217 : vector<16x256xf32>
    %c48_i32 = arith.constant 48 : i32
    %219 = tpu.dynamic_rotate %131 by %c48_i32 dim 1 : vector<16x256xf32>, i32 -> vector<16x256xf32>
    %c17_109 = arith.constant 17 : index
    %c0_110 = arith.constant 0 : index
    %c0_111 = arith.constant 0 : index
    %220 = vector.load %arg4[%c17_109, %c0_110, %c0_111] : memref<49x16x256xf32, #tpu.memory_space<vmem>>, vector<1x16x256xf32>
    %221 = vector.shape_cast %220 : vector<1x16x256xf32> to vector<16x256xf32>
    %222 = arith.mulf %219, %221 : vector<16x256xf32>
    %223 = arith.addf %213, %222 : vector<16x256xf32>
    %c45_i32 = arith.constant 45 : i32
    %224 = tpu.dynamic_rotate %131 by %c45_i32 dim 1 : vector<16x256xf32>, i32 -> vector<16x256xf32>
    %c18_112 = arith.constant 18 : index
    %c0_113 = arith.constant 0 : index
    %c0_114 = arith.constant 0 : index
    %225 = vector.load %arg4[%c18_112, %c0_113, %c0_114] : memref<49x16x256xf32, #tpu.memory_space<vmem>>, vector<1x16x256xf32>
    %226 = vector.shape_cast %225 : vector<1x16x256xf32> to vector<16x256xf32>
    %227 = arith.mulf %224, %226 : vector<16x256xf32>
    %228 = arith.addf %218, %227 : vector<16x256xf32>
    %c42_i32 = arith.constant 42 : i32
    %229 = tpu.dynamic_rotate %131 by %c42_i32 dim 1 : vector<16x256xf32>, i32 -> vector<16x256xf32>
    %c19_115 = arith.constant 19 : index
    %c0_116 = arith.constant 0 : index
    %c0_117 = arith.constant 0 : index
    %230 = vector.load %arg4[%c19_115, %c0_116, %c0_117] : memref<49x16x256xf32, #tpu.memory_space<vmem>>, vector<1x16x256xf32>
    %231 = vector.shape_cast %230 : vector<1x16x256xf32> to vector<16x256xf32>
    %232 = arith.mulf %229, %231 : vector<16x256xf32>
    %233 = arith.addf %223, %232 : vector<16x256xf32>
    %c39_i32 = arith.constant 39 : i32
    %234 = tpu.dynamic_rotate %131 by %c39_i32 dim 1 : vector<16x256xf32>, i32 -> vector<16x256xf32>
    %c20_118 = arith.constant 20 : index
    %c0_119 = arith.constant 0 : index
    %c0_120 = arith.constant 0 : index
    %235 = vector.load %arg4[%c20_118, %c0_119, %c0_120] : memref<49x16x256xf32, #tpu.memory_space<vmem>>, vector<1x16x256xf32>
    %236 = vector.shape_cast %235 : vector<1x16x256xf32> to vector<16x256xf32>
    %237 = arith.mulf %234, %236 : vector<16x256xf32>
    %238 = arith.addf %228, %237 : vector<16x256xf32>
    %c9_i32 = arith.constant 9 : i32
    %239 = tpu.dynamic_rotate %131 by %c9_i32 dim 1 : vector<16x256xf32>, i32 -> vector<16x256xf32>
    %c21_121 = arith.constant 21 : index
    %c0_122 = arith.constant 0 : index
    %c0_123 = arith.constant 0 : index
    %240 = vector.load %arg4[%c21_121, %c0_122, %c0_123] : memref<49x16x256xf32, #tpu.memory_space<vmem>>, vector<1x16x256xf32>
    %241 = vector.shape_cast %240 : vector<1x16x256xf32> to vector<16x256xf32>
    %242 = arith.mulf %239, %241 : vector<16x256xf32>
    %243 = arith.addf %233, %242 : vector<16x256xf32>
    %c6_i32 = arith.constant 6 : i32
    %244 = tpu.dynamic_rotate %131 by %c6_i32 dim 1 : vector<16x256xf32>, i32 -> vector<16x256xf32>
    %c22_124 = arith.constant 22 : index
    %c0_125 = arith.constant 0 : index
    %c0_126 = arith.constant 0 : index
    %245 = vector.load %arg4[%c22_124, %c0_125, %c0_126] : memref<49x16x256xf32, #tpu.memory_space<vmem>>, vector<1x16x256xf32>
    %246 = vector.shape_cast %245 : vector<1x16x256xf32> to vector<16x256xf32>
    %247 = arith.mulf %244, %246 : vector<16x256xf32>
    %248 = arith.addf %238, %247 : vector<16x256xf32>
    %c3_i32 = arith.constant 3 : i32
    %249 = tpu.dynamic_rotate %131 by %c3_i32 dim 1 : vector<16x256xf32>, i32 -> vector<16x256xf32>
    %c23_127 = arith.constant 23 : index
    %c0_128 = arith.constant 0 : index
    %c0_129 = arith.constant 0 : index
    %250 = vector.load %arg4[%c23_127, %c0_128, %c0_129] : memref<49x16x256xf32, #tpu.memory_space<vmem>>, vector<1x16x256xf32>
    %251 = vector.shape_cast %250 : vector<1x16x256xf32> to vector<16x256xf32>
    %252 = arith.mulf %249, %251 : vector<16x256xf32>
    %253 = arith.addf %243, %252 : vector<16x256xf32>
    %c24_130 = arith.constant 24 : index
    %c0_131 = arith.constant 0 : index
    %c0_132 = arith.constant 0 : index
    %254 = vector.load %arg4[%c24_130, %c0_131, %c0_132] : memref<49x16x256xf32, #tpu.memory_space<vmem>>, vector<1x16x256xf32>
    %255 = vector.shape_cast %254 : vector<1x16x256xf32> to vector<16x256xf32>
    %256 = arith.mulf %131, %255 : vector<16x256xf32>
    %257 = arith.addf %248, %256 : vector<16x256xf32>
    %c253_i32 = arith.constant 253 : i32
    %258 = tpu.dynamic_rotate %131 by %c253_i32 dim 1 : vector<16x256xf32>, i32 -> vector<16x256xf32>
    %c25 = arith.constant 25 : index
    %c0_133 = arith.constant 0 : index
    %c0_134 = arith.constant 0 : index
    %259 = vector.load %arg4[%c25, %c0_133, %c0_134] : memref<49x16x256xf32, #tpu.memory_space<vmem>>, vector<1x16x256xf32>
    %260 = vector.shape_cast %259 : vector<1x16x256xf32> to vector<16x256xf32>
    %261 = arith.mulf %258, %260 : vector<16x256xf32>
    %262 = arith.addf %253, %261 : vector<16x256xf32>
    %c250_i32 = arith.constant 250 : i32
    %263 = tpu.dynamic_rotate %131 by %c250_i32 dim 1 : vector<16x256xf32>, i32 -> vector<16x256xf32>
    %c26 = arith.constant 26 : index
    %c0_135 = arith.constant 0 : index
    %c0_136 = arith.constant 0 : index
    %264 = vector.load %arg4[%c26, %c0_135, %c0_136] : memref<49x16x256xf32, #tpu.memory_space<vmem>>, vector<1x16x256xf32>
    %265 = vector.shape_cast %264 : vector<1x16x256xf32> to vector<16x256xf32>
    %266 = arith.mulf %263, %265 : vector<16x256xf32>
    %267 = arith.addf %257, %266 : vector<16x256xf32>
    %c247_i32 = arith.constant 247 : i32
    %268 = tpu.dynamic_rotate %131 by %c247_i32 dim 1 : vector<16x256xf32>, i32 -> vector<16x256xf32>
    %c27 = arith.constant 27 : index
    %c0_137 = arith.constant 0 : index
    %c0_138 = arith.constant 0 : index
    %269 = vector.load %arg4[%c27, %c0_137, %c0_138] : memref<49x16x256xf32, #tpu.memory_space<vmem>>, vector<1x16x256xf32>
    %270 = vector.shape_cast %269 : vector<1x16x256xf32> to vector<16x256xf32>
    %271 = arith.mulf %268, %270 : vector<16x256xf32>
    %272 = arith.addf %262, %271 : vector<16x256xf32>
    %c217_i32 = arith.constant 217 : i32
    %273 = tpu.dynamic_rotate %131 by %c217_i32 dim 1 : vector<16x256xf32>, i32 -> vector<16x256xf32>
    %c28 = arith.constant 28 : index
    %c0_139 = arith.constant 0 : index
    %c0_140 = arith.constant 0 : index
    %274 = vector.load %arg4[%c28, %c0_139, %c0_140] : memref<49x16x256xf32, #tpu.memory_space<vmem>>, vector<1x16x256xf32>
    %275 = vector.shape_cast %274 : vector<1x16x256xf32> to vector<16x256xf32>
    %276 = arith.mulf %273, %275 : vector<16x256xf32>
    %277 = arith.addf %267, %276 : vector<16x256xf32>
    %c214_i32 = arith.constant 214 : i32
    %278 = tpu.dynamic_rotate %131 by %c214_i32 dim 1 : vector<16x256xf32>, i32 -> vector<16x256xf32>
    %c29 = arith.constant 29 : index
    %c0_141 = arith.constant 0 : index
    %c0_142 = arith.constant 0 : index
    %279 = vector.load %arg4[%c29, %c0_141, %c0_142] : memref<49x16x256xf32, #tpu.memory_space<vmem>>, vector<1x16x256xf32>
    %280 = vector.shape_cast %279 : vector<1x16x256xf32> to vector<16x256xf32>
    %281 = arith.mulf %278, %280 : vector<16x256xf32>
    %282 = arith.addf %272, %281 : vector<16x256xf32>
    %c211_i32 = arith.constant 211 : i32
    %283 = tpu.dynamic_rotate %131 by %c211_i32 dim 1 : vector<16x256xf32>, i32 -> vector<16x256xf32>
    %c30 = arith.constant 30 : index
    %c0_143 = arith.constant 0 : index
    %c0_144 = arith.constant 0 : index
    %284 = vector.load %arg4[%c30, %c0_143, %c0_144] : memref<49x16x256xf32, #tpu.memory_space<vmem>>, vector<1x16x256xf32>
    %285 = vector.shape_cast %284 : vector<1x16x256xf32> to vector<16x256xf32>
    %286 = arith.mulf %283, %285 : vector<16x256xf32>
    %287 = arith.addf %277, %286 : vector<16x256xf32>
    %c208_i32 = arith.constant 208 : i32
    %288 = tpu.dynamic_rotate %131 by %c208_i32 dim 1 : vector<16x256xf32>, i32 -> vector<16x256xf32>
    %c31 = arith.constant 31 : index
    %c0_145 = arith.constant 0 : index
    %c0_146 = arith.constant 0 : index
    %289 = vector.load %arg4[%c31, %c0_145, %c0_146] : memref<49x16x256xf32, #tpu.memory_space<vmem>>, vector<1x16x256xf32>
    %290 = vector.shape_cast %289 : vector<1x16x256xf32> to vector<16x256xf32>
    %291 = arith.mulf %288, %290 : vector<16x256xf32>
    %292 = arith.addf %282, %291 : vector<16x256xf32>
    %c205_i32 = arith.constant 205 : i32
    %293 = tpu.dynamic_rotate %131 by %c205_i32 dim 1 : vector<16x256xf32>, i32 -> vector<16x256xf32>
    %c32 = arith.constant 32 : index
    %c0_147 = arith.constant 0 : index
    %c0_148 = arith.constant 0 : index
    %294 = vector.load %arg4[%c32, %c0_147, %c0_148] : memref<49x16x256xf32, #tpu.memory_space<vmem>>, vector<1x16x256xf32>
    %295 = vector.shape_cast %294 : vector<1x16x256xf32> to vector<16x256xf32>
    %296 = arith.mulf %293, %295 : vector<16x256xf32>
    %297 = arith.addf %287, %296 : vector<16x256xf32>
    %c202_i32 = arith.constant 202 : i32
    %298 = tpu.dynamic_rotate %131 by %c202_i32 dim 1 : vector<16x256xf32>, i32 -> vector<16x256xf32>
    %c33 = arith.constant 33 : index
    %c0_149 = arith.constant 0 : index
    %c0_150 = arith.constant 0 : index
    %299 = vector.load %arg4[%c33, %c0_149, %c0_150] : memref<49x16x256xf32, #tpu.memory_space<vmem>>, vector<1x16x256xf32>
    %300 = vector.shape_cast %299 : vector<1x16x256xf32> to vector<16x256xf32>
    %301 = arith.mulf %298, %300 : vector<16x256xf32>
    %302 = arith.addf %292, %301 : vector<16x256xf32>
    %c199_i32 = arith.constant 199 : i32
    %303 = tpu.dynamic_rotate %131 by %c199_i32 dim 1 : vector<16x256xf32>, i32 -> vector<16x256xf32>
    %c34 = arith.constant 34 : index
    %c0_151 = arith.constant 0 : index
    %c0_152 = arith.constant 0 : index
    %304 = vector.load %arg4[%c34, %c0_151, %c0_152] : memref<49x16x256xf32, #tpu.memory_space<vmem>>, vector<1x16x256xf32>
    %305 = vector.shape_cast %304 : vector<1x16x256xf32> to vector<16x256xf32>
    %306 = arith.mulf %303, %305 : vector<16x256xf32>
    %307 = arith.addf %297, %306 : vector<16x256xf32>
    %c169_i32 = arith.constant 169 : i32
    %308 = tpu.dynamic_rotate %131 by %c169_i32 dim 1 : vector<16x256xf32>, i32 -> vector<16x256xf32>
    %c35 = arith.constant 35 : index
    %c0_153 = arith.constant 0 : index
    %c0_154 = arith.constant 0 : index
    %309 = vector.load %arg4[%c35, %c0_153, %c0_154] : memref<49x16x256xf32, #tpu.memory_space<vmem>>, vector<1x16x256xf32>
    %310 = vector.shape_cast %309 : vector<1x16x256xf32> to vector<16x256xf32>
    %311 = arith.mulf %308, %310 : vector<16x256xf32>
    %312 = arith.addf %302, %311 : vector<16x256xf32>
    %c166_i32 = arith.constant 166 : i32
    %313 = tpu.dynamic_rotate %131 by %c166_i32 dim 1 : vector<16x256xf32>, i32 -> vector<16x256xf32>
    %c36 = arith.constant 36 : index
    %c0_155 = arith.constant 0 : index
    %c0_156 = arith.constant 0 : index
    %314 = vector.load %arg4[%c36, %c0_155, %c0_156] : memref<49x16x256xf32, #tpu.memory_space<vmem>>, vector<1x16x256xf32>
    %315 = vector.shape_cast %314 : vector<1x16x256xf32> to vector<16x256xf32>
    %316 = arith.mulf %313, %315 : vector<16x256xf32>
    %317 = arith.addf %307, %316 : vector<16x256xf32>
    %c163_i32 = arith.constant 163 : i32
    %318 = tpu.dynamic_rotate %131 by %c163_i32 dim 1 : vector<16x256xf32>, i32 -> vector<16x256xf32>
    %c37 = arith.constant 37 : index
    %c0_157 = arith.constant 0 : index
    %c0_158 = arith.constant 0 : index
    %319 = vector.load %arg4[%c37, %c0_157, %c0_158] : memref<49x16x256xf32, #tpu.memory_space<vmem>>, vector<1x16x256xf32>
    %320 = vector.shape_cast %319 : vector<1x16x256xf32> to vector<16x256xf32>
    %321 = arith.mulf %318, %320 : vector<16x256xf32>
    %322 = arith.addf %312, %321 : vector<16x256xf32>
    %c160_i32 = arith.constant 160 : i32
    %323 = tpu.dynamic_rotate %131 by %c160_i32 dim 1 : vector<16x256xf32>, i32 -> vector<16x256xf32>
    %c38 = arith.constant 38 : index
    %c0_159 = arith.constant 0 : index
    %c0_160 = arith.constant 0 : index
    %324 = vector.load %arg4[%c38, %c0_159, %c0_160] : memref<49x16x256xf32, #tpu.memory_space<vmem>>, vector<1x16x256xf32>
    %325 = vector.shape_cast %324 : vector<1x16x256xf32> to vector<16x256xf32>
    %326 = arith.mulf %323, %325 : vector<16x256xf32>
    %327 = arith.addf %317, %326 : vector<16x256xf32>
    %c157_i32 = arith.constant 157 : i32
    %328 = tpu.dynamic_rotate %131 by %c157_i32 dim 1 : vector<16x256xf32>, i32 -> vector<16x256xf32>
    %c39 = arith.constant 39 : index
    %c0_161 = arith.constant 0 : index
    %c0_162 = arith.constant 0 : index
    %329 = vector.load %arg4[%c39, %c0_161, %c0_162] : memref<49x16x256xf32, #tpu.memory_space<vmem>>, vector<1x16x256xf32>
    %330 = vector.shape_cast %329 : vector<1x16x256xf32> to vector<16x256xf32>
    %331 = arith.mulf %328, %330 : vector<16x256xf32>
    %332 = arith.addf %322, %331 : vector<16x256xf32>
    %c154_i32 = arith.constant 154 : i32
    %333 = tpu.dynamic_rotate %131 by %c154_i32 dim 1 : vector<16x256xf32>, i32 -> vector<16x256xf32>
    %c40 = arith.constant 40 : index
    %c0_163 = arith.constant 0 : index
    %c0_164 = arith.constant 0 : index
    %334 = vector.load %arg4[%c40, %c0_163, %c0_164] : memref<49x16x256xf32, #tpu.memory_space<vmem>>, vector<1x16x256xf32>
    %335 = vector.shape_cast %334 : vector<1x16x256xf32> to vector<16x256xf32>
    %336 = arith.mulf %333, %335 : vector<16x256xf32>
    %337 = arith.addf %327, %336 : vector<16x256xf32>
    %c151_i32 = arith.constant 151 : i32
    %338 = tpu.dynamic_rotate %131 by %c151_i32 dim 1 : vector<16x256xf32>, i32 -> vector<16x256xf32>
    %c41 = arith.constant 41 : index
    %c0_165 = arith.constant 0 : index
    %c0_166 = arith.constant 0 : index
    %339 = vector.load %arg4[%c41, %c0_165, %c0_166] : memref<49x16x256xf32, #tpu.memory_space<vmem>>, vector<1x16x256xf32>
    %340 = vector.shape_cast %339 : vector<1x16x256xf32> to vector<16x256xf32>
    %341 = arith.mulf %338, %340 : vector<16x256xf32>
    %342 = arith.addf %332, %341 : vector<16x256xf32>
    %c121_i32 = arith.constant 121 : i32
    %343 = tpu.dynamic_rotate %131 by %c121_i32 dim 1 : vector<16x256xf32>, i32 -> vector<16x256xf32>
    %c42 = arith.constant 42 : index
    %c0_167 = arith.constant 0 : index
    %c0_168 = arith.constant 0 : index
    %344 = vector.load %arg4[%c42, %c0_167, %c0_168] : memref<49x16x256xf32, #tpu.memory_space<vmem>>, vector<1x16x256xf32>
    %345 = vector.shape_cast %344 : vector<1x16x256xf32> to vector<16x256xf32>
    %346 = arith.mulf %343, %345 : vector<16x256xf32>
    %347 = arith.addf %337, %346 : vector<16x256xf32>
    %c118_i32 = arith.constant 118 : i32
    %348 = tpu.dynamic_rotate %131 by %c118_i32 dim 1 : vector<16x256xf32>, i32 -> vector<16x256xf32>
    %c43 = arith.constant 43 : index
    %c0_169 = arith.constant 0 : index
    %c0_170 = arith.constant 0 : index
    %349 = vector.load %arg4[%c43, %c0_169, %c0_170] : memref<49x16x256xf32, #tpu.memory_space<vmem>>, vector<1x16x256xf32>
    %350 = vector.shape_cast %349 : vector<1x16x256xf32> to vector<16x256xf32>
    %351 = arith.mulf %348, %350 : vector<16x256xf32>
    %352 = arith.addf %342, %351 : vector<16x256xf32>
    %c115_i32 = arith.constant 115 : i32
    %353 = tpu.dynamic_rotate %131 by %c115_i32 dim 1 : vector<16x256xf32>, i32 -> vector<16x256xf32>
    %c44 = arith.constant 44 : index
    %c0_171 = arith.constant 0 : index
    %c0_172 = arith.constant 0 : index
    %354 = vector.load %arg4[%c44, %c0_171, %c0_172] : memref<49x16x256xf32, #tpu.memory_space<vmem>>, vector<1x16x256xf32>
    %355 = vector.shape_cast %354 : vector<1x16x256xf32> to vector<16x256xf32>
    %356 = arith.mulf %353, %355 : vector<16x256xf32>
    %357 = arith.addf %347, %356 : vector<16x256xf32>
    %c112_i32 = arith.constant 112 : i32
    %358 = tpu.dynamic_rotate %131 by %c112_i32 dim 1 : vector<16x256xf32>, i32 -> vector<16x256xf32>
    %c45 = arith.constant 45 : index
    %c0_173 = arith.constant 0 : index
    %c0_174 = arith.constant 0 : index
    %359 = vector.load %arg4[%c45, %c0_173, %c0_174] : memref<49x16x256xf32, #tpu.memory_space<vmem>>, vector<1x16x256xf32>
    %360 = vector.shape_cast %359 : vector<1x16x256xf32> to vector<16x256xf32>
    %361 = arith.mulf %358, %360 : vector<16x256xf32>
    %362 = arith.addf %352, %361 : vector<16x256xf32>
    %c109_i32 = arith.constant 109 : i32
    %363 = tpu.dynamic_rotate %131 by %c109_i32 dim 1 : vector<16x256xf32>, i32 -> vector<16x256xf32>
    %c46 = arith.constant 46 : index
    %c0_175 = arith.constant 0 : index
    %c0_176 = arith.constant 0 : index
    %364 = vector.load %arg4[%c46, %c0_175, %c0_176] : memref<49x16x256xf32, #tpu.memory_space<vmem>>, vector<1x16x256xf32>
    %365 = vector.shape_cast %364 : vector<1x16x256xf32> to vector<16x256xf32>
    %366 = arith.mulf %363, %365 : vector<16x256xf32>
    %367 = arith.addf %357, %366 : vector<16x256xf32>
    %c106_i32 = arith.constant 106 : i32
    %368 = tpu.dynamic_rotate %131 by %c106_i32 dim 1 : vector<16x256xf32>, i32 -> vector<16x256xf32>
    %c47 = arith.constant 47 : index
    %c0_177 = arith.constant 0 : index
    %c0_178 = arith.constant 0 : index
    %369 = vector.load %arg4[%c47, %c0_177, %c0_178] : memref<49x16x256xf32, #tpu.memory_space<vmem>>, vector<1x16x256xf32>
    %370 = vector.shape_cast %369 : vector<1x16x256xf32> to vector<16x256xf32>
    %371 = arith.mulf %368, %370 : vector<16x256xf32>
    %372 = arith.addf %362, %371 : vector<16x256xf32>
    %c103_i32 = arith.constant 103 : i32
    %373 = tpu.dynamic_rotate %131 by %c103_i32 dim 1 : vector<16x256xf32>, i32 -> vector<16x256xf32>
    %c48 = arith.constant 48 : index
    %c0_179 = arith.constant 0 : index
    %c0_180 = arith.constant 0 : index
    %374 = vector.load %arg4[%c48, %c0_179, %c0_180] : memref<49x16x256xf32, #tpu.memory_space<vmem>>, vector<1x16x256xf32>
    %375 = vector.shape_cast %374 : vector<1x16x256xf32> to vector<16x256xf32>
    %376 = arith.mulf %373, %375 : vector<16x256xf32>
    %377 = arith.addf %367, %376 : vector<16x256xf32>
    %378 = arith.addf %377, %372 : vector<16x256xf32>
    %c0_181 = arith.constant 0 : index
    %c0_182 = arith.constant 0 : index
    %379 = vector.load %arg5[%c0_181, %c0_182] : memref<16x1xf32, #tpu.memory_space<vmem>>, vector<16x1xf32>
    %380 = vector.broadcast %379 : vector<16x1xf32> to vector<16x256xf32>
    %381 = arith.addf %378, %380 : vector<16x256xf32>
    %c0_183 = arith.constant 0 : index
    %c0_184 = arith.constant 0 : index
    %382 = vector.load %arg6[%c0_183, %c0_184] : memref<32x16xf32, #tpu.memory_space<vmem>>, vector<32x16xf32>
    %cst_185 = arith.constant dense<0.000000e+00> : vector<32x256xf32>
    %383 = tpu.matmul %382, %381, %cst_185 {dimension_numbers = #tpu.dot_dimension_numbers<[1], [0], [0], [1], [0, 0, 1, 1], [], []>, precision = #tpu.contract_precision<fp32>} : vector<32x16xf32>, vector<16x256xf32>, vector<32x256xf32> -> vector<32x256xf32>
    %c0_186 = arith.constant 0 : index
    %c0_187 = arith.constant 0 : index
    %384 = vector.load %arg7[%c0_186, %c0_187] : memref<32x1xf32, #tpu.memory_space<vmem>>, vector<32x1xf32>
    %385 = vector.broadcast %384 : vector<32x1xf32> to vector<32x256xf32>
    %386 = arith.addf %383, %385 : vector<32x256xf32>
    %387 = vector.extract_strided_slice %386 {offsets = [0, 0], sizes = [16, 256], strides = [1, 1]} : vector<32x256xf32> to vector<16x256xf32>
    %388 = vector.extract_strided_slice %386 {offsets = [16, 0], sizes = [16, 256], strides = [1, 1]} : vector<32x256xf32> to vector<16x256xf32>
    %389 = arith.negf %388 : vector<16x256xf32>
    %390 = math.exp %389 : vector<16x256xf32>
    %cst_188 = arith.constant 1.000000e+00 : f32
    %391 = vector.broadcast %cst_188 : f32 to vector<16x256xf32>
    %392 = arith.addf %391, %390 : vector<16x256xf32>
    %393 = arith.divf %391, %392 : vector<16x256xf32>
    %394 = arith.mulf %393, %387 : vector<16x256xf32>
    %c0_189 = arith.constant 0 : index
    %c0_190 = arith.constant 0 : index
    %c0_191 = arith.constant 0 : index
    %395 = vector.load %arg8[%c0_189, %c0_190, %c0_191] : memref<1x16x256xf32, #tpu.memory_space<vmem>>, vector<1x16x256xf32>
    %396 = vector.shape_cast %395 : vector<1x16x256xf32> to vector<16x256xf32>
    %397 = vector.shape_cast %394 : vector<16x256xf32> to vector<1x16x256xf32>
    tpu.vector_store %arg8[%c0_189, %c0_190, %c0_191], %397 {strides = array<i32>} : memref<1x16x256xf32, #tpu.memory_space<vmem>>, vector<1x16x256xf32>,
    return
  }
  func.func @transform_0(%arg0: i32) -> (i32, i32, i32) {
    %c0_i32 = arith.constant 0 : i32
    %c0_i32_0 = arith.constant 0 : i32
    %c0_i32_1 = arith.constant 0 : i32
    return %arg0, %c0_i32, %c0_i32_0 : i32, i32, i32
  }
  func.func @transform_1(%arg0: i32) -> (i32, i32, i32) {
    %c0_i32 = arith.constant 0 : i32
    %c0_i32_0 = arith.constant 0 : i32
    %c0_i32_1 = arith.constant 0 : i32
    %c0_i32_2 = arith.constant 0 : i32
    return %c0_i32, %c0_i32_0, %c0_i32_1 : i32, i32, i32
  }
  func.func @transform_2(%arg0: i32) -> (i32, i32) {
    %c0_i32 = arith.constant 0 : i32
    %c0_i32_0 = arith.constant 0 : i32
    %c0_i32_1 = arith.constant 0 : i32
    return %c0_i32, %c0_i32_0 : i32, i32
  }
  func.func @transform_3(%arg0: i32) -> (i32, i32, i32) {
    %c0_i32 = arith.constant 0 : i32
    %c0_i32_0 = arith.constant 0 : i32
    %c0_i32_1 = arith.constant 0 : i32
    %c0_i32_2 = arith.constant 0 : i32
    return %c0_i32, %c0_i32_0, %c0_i32_1 : i32, i32, i32
  }
  func.func @transform_4(%arg0: i32) -> (i32, i32) {
    %c0_i32 = arith.constant 0 : i32
    %c0_i32_0 = arith.constant 0 : i32
    %c0_i32_1 = arith.constant 0 : i32
    return %c0_i32, %c0_i32_0 : i32, i32
  }
  func.func @transform_5(%arg0: i32) -> (i32, i32) {
    %c0_i32 = arith.constant 0 : i32
    %c0_i32_0 = arith.constant 0 : i32
    %c0_i32_1 = arith.constant 0 : i32
    return %c0_i32, %c0_i32_0 : i32, i32
  }
  func.func @transform_6(%arg0: i32) -> (i32, i32) {
    %c0_i32 = arith.constant 0 : i32
    %c0_i32_0 = arith.constant 0 : i32
    %c0_i32_1 = arith.constant 0 : i32
    return %c0_i32, %c0_i32_0 : i32, i32
  }
  func.func @transform_7(%arg0: i32) -> (i32, i32, i32) {
    %c0_i32 = arith.constant 0 : i32
    %c0_i32_0 = arith.constant 0 : i32
    %c0_i32_1 = arith.constant 0 : i32
    return %arg0, %c0_i32, %c0_i32_0 : i32, i32, i32
  }
}

</mosaic_0001>

<bundles_post_ra>
// kernel: attention_module_forward.1
= control target key start
LH: loop header
LB: loop body
LE: loop exit
PB: predicated region body
PF: predicated region fallthrough
CT: control target
= control target key end

     0   :  { %s3574_s24 = smov 0   ;;  %s6541_s0 = inlined_call_operand.vmem [shape: f32[2,16,256], index: 0, kind: input, shape index: {}]   ;;  %s6542_s1 = inlined_call_operand.vmem [shape: f32[25,16,256], index: 1, kind: input, shape index: {}]   ;;  %s6543_s2 = inlined_call_operand.vmem [shape: f32[16,1], index: 2, kind: input, shape index: {}]   ;;  %s6544_s3 = inlined_call_operand.vmem [shape: f32[49,16,256], index: 3, kind: input, shape index: {}]   ;;  %s6545_s4 = inlined_call_operand.vmem [shape: f32[16,1], index: 4, kind: input, shape index: {}]   ;;  %s6546_s5 = inlined_call_operand.vmem [shape: f32[32,16], index: 5, kind: input, shape index: {}]   ;;  %s6547_s6 = inlined_call_operand.vmem [shape: f32[32,1], index: 6, kind: input, shape index: {}]   ;;  %s6548_s7 = inlined_call_operand.vmem [shape: f32[2,16,256], index: 7, kind: output, shape index: {}]  }
   0x1 LB: > { %s2983_s25 = sadd.s32 4294967295, %s3462_s24   ;;  %p2987_p0 = scmp.ge.s32.totalorder %s3462_s24, 1  ;;  %s3462_s24 = sphi %s3574_s24, %s17_s24  }
   0x2   : > { %p237_p1 = scmp.lt.s32.totalorder %s3462_s24, 3 }
   0x4   : > { %p238_p2 = pnand %p2987_p0, %p237_p1 }
   0x6   : > { %241 = sbr.rel (%p238_p2) target bundleno = 1154 (0x482), region = 48 }
   0xd   : > { %p269_p3 = scmp.lt.s32.totalorder %s2983_s25, 1  ;;  %s3464_s30 = smov 34   ;;  %v3473_v4 = vmov 0   ;;  %v926_v43 = vld [vmem:[%s6543_s2 + $0x8] sm:$0xff]  ;;  %v925_v46 = vld [vmem:[%s6543_s2] sm:$0xff] }
   0xe   : > { %s3465_s8 = smov 33   ;;  %s3466_s9 = smov 32   ;;  %3439 = vset.pattern.permute.xlu1 %v3473_v4  ;;  %3438 = vset.pattern.permute.xlu0 %v3473_v4 }
   0xf   : > { %s6791_s25 = smov (!%p269_p3, %s2983_s25), 1  ;;  %s3467_s10 = smov 31  }
  0x10   : > { %s3286_s26 = sshll.u32 %s6791_s25, 5  ;;  %s3468_s11 = smov 30  }
  0x11   : > { %s273_s29 = scalar_lea.vmem %s6541_s0, %s3286_s26  ;;  %s3469_s12 = smov 18  }
  0x12   : > { %v3590_v0 = vld [vmem:[%s273_s29 + $0x8] sm:$0xff]  ;;  %v3592_v1 = vld [vmem:[%s273_s29] sm:$0xff]  ;;  %v3596_v2 = vld [vmem:[%s273_s29 + $0x18] sm:$0xff]  ;;  %s3470_s13 = smov 17   ;;  %s3471_s14 = smov 16  }
  0x13   : > { %287 = vrot.lane.b32.xlu1 %v3590_v0, %s3464_s30  ;;  %283 = vrot.lane.b32.xlu0 %v3592_v1, %s3464_s30  ;;  %v3598_v3 = vld [vmem:[%s273_s29 + $0x10] sm:$0xff]  ;;  %s3472_s15 = smov 15   ;;  %s3474_s16 = smov 14  }
  0x14   : > { %s3475_s17 = smov 2   ;;  %s3476_s18 = smov 1  }
  0x15   : > { %s3477_s19 = smov 127   ;;  %s3478_s20 = smov 126  }
  0x16   : > { %s3479_s21 = smov 114   ;;  %s3480_s22 = smov 113  }
  0x17   : > { %289 = vrot.lane.b32.xlu1 %v3596_v2, %s3464_s30  ;;  %285 = vrot.lane.b32.xlu0 %v3598_v3, %s3464_s30  ;;  %s3481_s23 = smov 112   ;;  %s3482_s27 = smov 111  }
  0x18   : > { %s3483_s28 = smov 110   ;;  %s3484_s29 = smov 98  }
  0x19   : > { %s3485_s30 = smov 97  }
  0x1b   : > { %312 = vrot.lane.b32.xlu1 %v3598_v3, %s3465_s8  ;;  %310 = vrot.lane.b32.xlu0 %v3592_v1, %s3465_s8 }
  0x1f   : > { %316 = vrot.lane.b32.xlu1 %v3596_v2, %s3465_s8  ;;  %314 = vrot.lane.b32.xlu0 %v3590_v0, %s3465_s8  ;;  %s3486_s8 = smov 96  }
  0x23   : > { %338 = vrot.lane.b32.xlu1 %v3598_v3, %s3466_s9  ;;  %336 = vrot.lane.b32.xlu0 %v3592_v1, %s3466_s9 }
  0x27   : > { %342 = vrot.lane.b32.xlu1 %v3596_v2, %s3466_s9  ;;  %340 = vrot.lane.b32.xlu0 %v3590_v0, %s3466_s9 }
  0x2b   : > { %364 = vrot.lane.b32.xlu1 %v3598_v3, %s3467_s10  ;;  %362 = vrot.lane.b32.xlu0 %v3592_v1, %s3467_s10 }
  0x2f   : > { %368 = vrot.lane.b32.xlu1 %v3596_v2, %s3467_s10  ;;  %366 = vrot.lane.b32.xlu0 %v3590_v0, %s3467_s10  ;;  %s3487_s10 = smov 95  }
  0x33   : > { %390 = vrot.lane.b32.xlu1 %v3598_v3, %s3468_s11  ;;  %388 = vrot.lane.b32.xlu0 %v3592_v1, %s3468_s11 }
  0x37   : > { %394 = vrot.lane.b32.xlu1 %v3596_v2, %s3468_s11  ;;  %392 = vrot.lane.b32.xlu0 %v3590_v0, %s3468_s11  ;;  %s3488_s11 = smov 94  }
  0x3b   : > { %416 = vrot.lane.b32.xlu1 %v3598_v3, %s3469_s12  ;;  %414 = vrot.lane.b32.xlu0 %v3592_v1, %s3469_s12 }
  0x3f   : > { %420 = vrot.lane.b32.xlu1 %v3596_v2, %s3469_s12  ;;  %418 = vrot.lane.b32.xlu0 %v3590_v0, %s3469_s12  ;;  %s3493_s12 = smov 10  }
  0x43   : > { %442 = vrot.lane.b32.xlu1 %v3598_v3, %s3470_s13  ;;  %440 = vrot.lane.b32.xlu0 %v3592_v1, %s3470_s13 }
  0x47   : > { %446 = vrot.lane.b32.xlu1 %v3596_v2, %s3470_s13  ;;  %444 = vrot.lane.b32.xlu0 %v3590_v0, %s3470_s13  ;;  %s3494_s13 = smov 7  }
  0x4b   : > { %468 = vrot.lane.b32.xlu1 %v3598_v3, %s3471_s14  ;;  %466 = vrot.lane.b32.xlu0 %v3592_v1, %s3471_s14 }
  0x4f   : > { %472 = vrot.lane.b32.xlu1 %v3596_v2, %s3471_s14  ;;  %470 = vrot.lane.b32.xlu0 %v3590_v0, %s3471_s14 }
  0x53   : > { %494 = vrot.lane.b32.xlu1 %v3598_v3, %s3472_s15  ;;  %492 = vrot.lane.b32.xlu0 %v3592_v1, %s3472_s15 }
  0x57   : > { %498 = vrot.lane.b32.xlu1 %v3596_v2, %s3472_s15  ;;  %496 = vrot.lane.b32.xlu0 %v3590_v0, %s3472_s15  ;;  %s3496_s15 = smov 102  }
  0x5b   : > { %520 = vrot.lane.b32.xlu1 %v3598_v3, %s3474_s16  ;;  %518 = vrot.lane.b32.xlu0 %v3592_v1, %s3474_s16 }
  0x5f   : > { %524 = vrot.lane.b32.xlu1 %v3596_v2, %s3474_s16  ;;  %522 = vrot.lane.b32.xlu0 %v3590_v0, %s3474_s16  ;;  %s3497_s16 = smov 99  }
  0x63   : > { %546 = vrot.lane.b32.xlu1 %v3598_v3, %s3475_s17  ;;  %544 = vrot.lane.b32.xlu0 %v3592_v1, %s3475_s17 }
  0x67   : > { %550 = vrot.lane.b32.xlu1 %v3596_v2, %s3475_s17  ;;  %548 = vrot.lane.b32.xlu0 %v3590_v0, %s3475_s17  ;;  %s3498_s17 = smov 93  }
  0x6b   : > { %572 = vrot.lane.b32.xlu1 %v3598_v3, %s3476_s18  ;;  %570 = vrot.lane.b32.xlu0 %v3592_v1, %s3476_s18 }
  0x6f   : > { %576 = vrot.lane.b32.xlu1 %v3596_v2, %s3476_s18  ;;  %574 = vrot.lane.b32.xlu0 %v3590_v0, %s3476_s18  ;;  %s3499_s18 = smov 90  }
  0x73   : > { %611 = vrot.lane.b32.xlu1 %v3598_v3, %s3477_s19  ;;  %609 = vrot.lane.b32.xlu0 %v3592_v1, %s3477_s19 }
  0x77   : > { %615 = vrot.lane.b32.xlu1 %v3596_v2, %s3477_s19  ;;  %613 = vrot.lane.b32.xlu0 %v3590_v0, %s3477_s19  ;;  %s3500_s19 = smov 87  }
  0x7b   : > { %637 = vrot.lane.b32.xlu1 %v3598_v3, %s3478_s20  ;;  %635 = vrot.lane.b32.xlu0 %v3592_v1, %s3478_s20 }
  0x7f   : > { %641 = vrot.lane.b32.xlu1 %v3596_v2, %s3478_s20  ;;  %639 = vrot.lane.b32.xlu0 %v3590_v0, %s3478_s20  ;;  %s3502_s20 = smov 54  }
  0x83   : > { %663 = vrot.lane.b32.xlu1 %v3598_v3, %s3479_s21  ;;  %661 = vrot.lane.b32.xlu0 %v3592_v1, %s3479_s21 }
  0x85   : > { %v3664_v5 = vpop.permute.xlu1 %287  ;;  %v3666_v6 = vpop.permute.xlu0 %283 }
  0x87   : > { %667 = vrot.lane.b32.xlu1 %v3596_v2, %s3479_s21  ;;  %665 = vrot.lane.b32.xlu0 %v3590_v0, %s3479_s21  ;;  %s3503_s21 = smov 51  }
  0x89   : > { %v3670_v7 = vpop.permute.xlu1 %289  ;;  %v3672_v8 = vpop.permute.xlu0 %285 }
  0x8b   : > { %689 = vrot.lane.b32.xlu1 %v3598_v3, %s3480_s22  ;;  %687 = vrot.lane.b32.xlu0 %v3592_v1, %s3480_s22 }
  0x8d   : > { %v3676_v9 = vpop.permute.xlu1 %312  ;;  %v3678_v10 = vpop.permute.xlu0 %310 }
  0x8f   : > { %693 = vrot.lane.b32.xlu1 %v3596_v2, %s3480_s22  ;;  %691 = vrot.lane.b32.xlu0 %v3590_v0, %s3480_s22  ;;  %s3504_s22 = smov 48  }
  0x91   : > { %v3682_v11 = vpop.permute.xlu1 %316  ;;  %v3684_v12 = vpop.permute.xlu0 %314 }
  0x93   : > { %715 = vrot.lane.b32.xlu1 %v3598_v3, %s3481_s23  ;;  %713 = vrot.lane.b32.xlu0 %v3592_v1, %s3481_s23 }
  0x95   : > { %v3690_v13 = vpop.permute.xlu1 %338  ;;  %v3692_v14 = vpop.permute.xlu0 %336 }
  0x97   : > { %719 = vrot.lane.b32.xlu1 %v3596_v2, %s3481_s23  ;;  %717 = vrot.lane.b32.xlu0 %v3590_v0, %s3481_s23 }
  0x99   : > { %v3698_v15 = vpop.permute.xlu1 %342  ;;  %v3700_v16 = vpop.permute.xlu0 %340 }
  0x9b   : > { %741 = vrot.lane.b32.xlu1 %v3598_v3, %s3482_s27  ;;  %739 = vrot.lane.b32.xlu0 %v3592_v1, %s3482_s27 }
  0x9d   : > { %v3704_v17 = vpop.permute.xlu1 %364  ;;  %v3706_v18 = vpop.permute.xlu0 %362 }
  0x9f   : > { %745 = vrot.lane.b32.xlu1 %v3596_v2, %s3482_s27  ;;  %743 = vrot.lane.b32.xlu0 %v3590_v0, %s3482_s27  ;;  %s3505_s27 = smov 45  }
  0xa1   : > { %v3710_v19 = vpop.permute.xlu1 %368  ;;  %v3712_v20 = vpop.permute.xlu0 %366 }
  0xa3   : > { %767 = vrot.lane.b32.xlu1 %v3598_v3, %s3483_s28  ;;  %765 = vrot.lane.b32.xlu0 %v3592_v1, %s3483_s28 }
  0xa5   : > { %v3716_v21 = vpop.permute.xlu1 %390  ;;  %v3718_v22 = vpop.permute.xlu0 %388 }
  0xa7   : > { %771 = vrot.lane.b32.xlu1 %v3596_v2, %s3483_s28  ;;  %769 = vrot.lane.b32.xlu0 %v3590_v0, %s3483_s28  ;;  %s3506_s28 = smov 42  }
  0xa9   : > { %v3722_v23 = vpop.permute.xlu1 %394  ;;  %v3724_v24 = vpop.permute.xlu0 %392 }
  0xab   : > { %793 = vrot.lane.b32.xlu1 %v3598_v3, %s3484_s29  ;;  %791 = vrot.lane.b32.xlu0 %v3592_v1, %s3484_s29 }
  0xad   : > { %v3728_v25 = vpop.permute.xlu1 %416  ;;  %v3730_v26 = vpop.permute.xlu0 %414 }
  0xaf   : > { %797 = vrot.lane.b32.xlu1 %v3596_v2, %s3484_s29  ;;  %795 = vrot.lane.b32.xlu0 %v3590_v0, %s3484_s29  ;;  %s3489_s29 = smov 25  }
  0xb1   : > { %v3734_v27 = vpop.permute.xlu1 %420  ;;  %v3736_v28 = vpop.permute.xlu0 %418 }
  0xb3   : > { %819 = vrot.lane.b32.xlu1 %v3598_v3, %s3485_s30  ;;  %817 = vrot.lane.b32.xlu0 %v3592_v1, %s3485_s30 }
  0xb5   : > { %v3740_v29 = vpop.permute.xlu1 %442  ;;  %v3742_v30 = vpop.permute.xlu0 %440 }
  0xb7   : > { %823 = vrot.lane.b32.xlu1 %v3596_v2, %s3485_s30  ;;  %821 = vrot.lane.b32.xlu0 %v3590_v0, %s3485_s30  ;;  %s3490_s30 = smov 19  }
  0xb9   : > { %v3746_v31 = vpop.permute.xlu1 %446  ;;  %v3748_v32 = vpop.permute.xlu0 %444 }
  0xbb   : > { %845 = vrot.lane.b32.xlu1 %v3598_v3, %s3486_s8  ;;  %843 = vrot.lane.b32.xlu0 %v3592_v1, %s3486_s8 }
  0xbd   : > { %v3754_v33 = vpop.permute.xlu1 %468  ;;  %v3756_v34 = vpop.permute.xlu0 %466 }
  0xbf   : > { %849 = vrot.lane.b32.xlu1 %v3596_v2, %s3486_s8  ;;  %847 = vrot.lane.b32.xlu0 %v3590_v0, %s3486_s8 }
  0xc1   : > { %v3762_v35 = vpop.permute.xlu1 %472  ;;  %v3764_v36 = vpop.permute.xlu0 %470 }
  0xc3   : > { %871 = vrot.lane.b32.xlu1 %v3598_v3, %s3487_s10  ;;  %869 = vrot.lane.b32.xlu0 %v3592_v1, %s3487_s10 }
  0xc5   : > { %v3768_v37 = vpop.permute.xlu1 %494  ;;  %v3770_v38 = vpop.permute.xlu0 %492 }
  0xc7   : > { %875 = vrot.lane.b32.xlu1 %v3596_v2, %s3487_s10  ;;  %873 = vrot.lane.b32.xlu0 %v3590_v0, %s3487_s10  ;;  %s3491_s10 = smov 22  }
  0xc9   : > { %v3774_v39 = vpop.permute.xlu1 %498  ;;  %v3776_v40 = vpop.permute.xlu0 %496 }
  0xcb   : > { %897 = vrot.lane.b32.xlu1 %v3598_v3, %s3488_s11  ;;  %895 = vrot.lane.b32.xlu0 %v3592_v1, %s3488_s11 }
  0xcd   : > { %v3780_v41 = vpop.permute.xlu1 %520  ;;  %v3782_v42 = vpop.permute.xlu0 %518 }
  0xce   : > { %6624 = vst [vmem:[#allocation2_spill] sm:$0xff] %v3780_v41  ;;  %6625 = vst [vmem:[#allocation3_spill] sm:$0xff] %v3782_v42 }
  0xcf   : > { %901 = vrot.lane.b32.xlu1 %v3596_v2, %s3488_s11  ;;  %899 = vrot.lane.b32.xlu0 %v3590_v0, %s3488_s11  ;;  %s3492_s11 = smov 13  }
  0xd1   : > { %v3789_v44 = vpop.permute.xlu1 %524  ;;  %v3791_v45 = vpop.permute.xlu0 %522 }
  0xd2   : > { %6626 = vst [vmem:[#allocation4_spill] sm:$0xff] %v3789_v44  ;;  %6627 = vst [vmem:[#allocation5_spill] sm:$0xff] %v3791_v45 }
  0xd3   : > { %934 = vperm.xlu1 %3439, %v926_v43   ;;  %929 = vperm.xlu0 %3438, %v925_v46  }
  0xd5   : > { %v3796_v47 = vpop.permute.xlu1 %546  ;;  %v3798_v48 = vpop.permute.xlu0 %544 }
  0xd9   : > { %v3800_v49 = vpop.permute.xlu1 %550  ;;  %v3802_v50 = vpop.permute.xlu0 %548 }
  0xdd   : > { %v3804_v51 = vpop.permute.xlu1 %572  ;;  %v3806_v52 = vpop.permute.xlu0 %570 }
  0xde   : > { %6628 = vst [vmem:[#allocation6_spill] sm:$0xff] %v3804_v51  ;;  %6629 = vst [vmem:[#allocation7_spill] sm:$0xff] %v3806_v52  ;;  %v3003_v51 = vld [vmem:[%s6542_s1 + $0x78] sm:$0xff] }
  0xe1   : > { %v3808_v53 = vpop.permute.xlu1 %576  ;;  %v3810_v54 = vpop.permute.xlu0 %574 }
  0xe2   : > { %6630 = vst [vmem:[#allocation8_spill] sm:$0xff] %v3808_v53  ;;  %6631 = vst [vmem:[#allocation9_spill] sm:$0xff] %v3810_v54 }
  0xe5   : > { %v3812_v55 = vpop.permute.xlu1 %611  ;;  %v3814_v56 = vpop.permute.xlu0 %609 }
  0xe6   : > { %6632 = vst [vmem:[#allocation10_spill] sm:$0xff] %v3812_v55  ;;  %6633 = vst [vmem:[#allocation11_spill] sm:$0xff] %v3814_v56 }
  0xe9   : > { %v3816_v57 = vpop.permute.xlu1 %615  ;;  %v3818_v58 = vpop.permute.xlu0 %613 }
  0xea   : > { %6634 = vst [vmem:[#allocation12_spill] sm:$0xff] %v3816_v57  ;;  %6635 = vst [vmem:[#allocation13_spill] sm:$0xff] %v3818_v58  ;;  %v291_v58 = vlaneseq }
  0xed   : > { %v3820_v59 = vpop.permute.xlu1 %637  ;;  %v3822_v60 = vpop.permute.xlu0 %635 }
  0xee   : > { %6636 = vst [vmem:[#allocation14_spill] sm:$0xff] %v3820_v59  ;;  %6637 = vst [vmem:[#allocation15_spill] sm:$0xff] %v3822_v60 }
  0xf1   : > { %v3824_v61 = vpop.permute.xlu1 %641  ;;  %v3826_v62 = vpop.permute.xlu0 %639 }
  0xf2   : > { %6638 = vst [vmem:[#allocation16_spill] sm:$0xff] %v3824_v61  ;;  %6639 = vst [vmem:[#allocation17_spill] sm:$0xff] %v3826_v62  ;;  %v3844_v61 = vand.u32 127, %v291_v58  ;;  %v3037_v58 = vld [vmem:[%s6542_s1 + $0x188] sm:$0xff] }
  0xf4   : > { %vm293_vm0 = vcmp.lt.s32.totalorder %v3844_v61, 34  ;;  %vm344_vm1 = vcmp.lt.s32.totalorder %v3844_v61, 32  ;;  %vm318_vm2 = vcmp.lt.s32.totalorder %v3844_v61, 33  ;;  %vm370_vm3 = vcmp.lt.s32.totalorder %v3844_v61, 31 }
  0xf5   : > { %v3828_v63 = vpop.permute.xlu1 %663  ;;  %v3830_v4 = vpop.permute.xlu0 %661  ;;  %vm396_vm4 = vcmp.lt.s32.totalorder %v3844_v61, 30  ;;  %vm422_vm5 = vcmp.lt.s32.totalorder %v3844_v61, 18  ;;  %v348_v57 = vsel %vm344_vm1, %v3698_v15, %v3690_v13  ;;  %v346_v53 = vsel %vm344_vm1, %v3690_v13, %v3698_v15  ;;  %v301_v13 = vld [vmem:[%s6542_s1 + $0x18] sm:$0xff] }
  0xf6   : > { %6640 = vst [vmem:[#allocation18_spill] sm:$0xff] %v3828_v63  ;;  %6641 = vst [vmem:[#allocation19_spill] sm:$0xff] %v3830_v4  ;;  %v294_v63 = vsel %vm293_vm0, %v3666_v6, %v3664_v5  ;;  %vm448_vm6 = vcmp.lt.s32.totalorder %v3844_v61, 17  ;;  %v295_v15 = vsel %vm293_vm0, %v3672_v8, %v3670_v7  ;;  %v372_v45 = vsel %vm370_vm3, %v3704_v17, %v3710_v19 }
  0xf7   : > { %vm474_vm7 = vcmp.lt.s32.totalorder %v3844_v61, 16  ;;  %vm500_vm8 = vcmp.lt.s32.totalorder %v3844_v61, 15  ;;  %vm552_vm9 = vcmp.lt.s32.totalorder %v3844_v61, 2  ;;  %vm526_vm10 = vcmp.lt.s32.totalorder %v3844_v61, 14 }
  0xf8   : > { %vm578_vm11 = vcmp.lt.s32.totalorder %v3844_v61, 1  ;;  %vm617_vm12 = vcmp.lt.s32.totalorder %v3844_v61, 127  ;;  %vm643_vm13 = vcmp.lt.s32.totalorder %v3844_v61, 126  ;;  %vm669_vm14 = vcmp.lt.s32.totalorder %v3844_v61, 114 }
  0xf9   : > { %v3832_v43 = vpop.permute.xlu1 %667  ;;  %v3834_v46 = vpop.permute.xlu0 %665  ;;  %vm695_vm15 = vcmp.lt.s32.totalorder %v3844_v61, 113 }
  0xfa   : > { %6642 = vst [vmem:[#allocation20_spill] sm:$0xff] %v3832_v43  ;;  %6643 = vst [vmem:[#allocation21_spill] sm:$0xff] %v3834_v46  ;;  %v299_v46 = vld [vmem:[%s6542_s1 + $0x8] sm:$0xff] }
  0xfd   : > { %v3836_v56 = vpop.permute.xlu1 %689  ;;  %v3838_v55 = vpop.permute.xlu0 %687 }
  0xfe   : > { %6644 = vst [vmem:[#allocation22_spill] sm:$0xff] %v3836_v56  ;;  %6645 = vst [vmem:[#allocation23_spill] sm:$0xff] %v3838_v55  ;;  %v3038_v56 = vld [vmem:[%s6542_s1 + $0x190] sm:$0xff]  ;;  %v3039_v55 = vld [vmem:[%s6542_s1 + $0x198] sm:$0xff] }
  0xff   : > { %v3894_v54 = vmul.f32 %v3038_v56, %v3598_v3  ;;  %v2996_v3 = vld [vmem:[%s6542_s1 + $0x40] sm:$0xff]  ;;  %v300_v56 = vld [vmem:[%s6542_s1 + $0x10] sm:$0xff] }
 0x101   : > { %v3840_v59 = vpop.permute.xlu1 %693  ;;  %v3842_v60 = vpop.permute.xlu0 %691  ;;  %6652 = vst [vmem:[#allocation30_spill] sm:$0xff] %v3894_v54 }
 0x102   : > { %6646 = vst [vmem:[#allocation24_spill] sm:$0xff] %v3840_v59  ;;  %6647 = vst [vmem:[#allocation25_spill] sm:$0xff] %v3842_v60  ;;  %v3036_v60 = vld [vmem:[%s6542_s1 + $0x180] sm:$0xff] }
 0x105   : > { %v3846_v62 = vpop.permute.xlu1 %715  ;;  %v3849_v4 = vpop.permute.xlu0 %713 }
 0x106   : > { %6648 = vst [vmem:[#allocation26_spill] sm:$0xff] %v3846_v62  ;;  %6649 = vst [vmem:[#allocation27_spill] sm:$0xff] %v3849_v4  ;;  %v298_v62 = vld [vmem:[%s6542_s1] sm:$0xff]  ;;  %v296_v4 = vsel %vm293_vm0, %v3664_v5, %v3666_v6  ;;  %v3897_v5 = vmul.f32 %v3039_v55, %v3596_v2  ;;  %v3900_v6 = vmul.f32 %v3037_v58, %v3590_v0 }
 0x107   : > { %v302_v52 = vmul.f32 %v298_v62, %v296_v4  ;;  %v347_v0 = vsel %vm344_vm1, %v3700_v16, %v3692_v14  ;;  %v3918_v2 = vmul.f32 %v3036_v60, %v3592_v1  ;;  %v303_v55 = vmul.f32 %v299_v46, %v294_v63  ;;  %v2997_v60 = vld [vmem:[%s6542_s1 + $0x48] sm:$0xff]  ;;  %v2994_v4 = vld [vmem:[%s6542_s1 + $0x30] sm:$0xff]  ;;  %v2995_v46 = vld [vmem:[%s6542_s1 + $0x38] sm:$0xff] }
 0x108   : > { %6653 = vst [vmem:[#allocation31_spill] sm:$0xff] %v3897_v5  ;;  %6654 = vst [vmem:[#allocation32_spill] sm:$0xff] %v3900_v6  ;;  %v297_v1 = vsel %vm293_vm0, %v3670_v7, %v3672_v8  ;;  %v345_v62 = vsel %vm344_vm1, %v3692_v14, %v3700_v16  ;;  %v320_v7 = vsel %vm318_vm2, %v3676_v9, %v3682_v11  ;;  %v3002_v16 = vld [vmem:[%s6542_s1 + $0x70] sm:$0xff]  ;;  %vm721_vm0 = vcmp.lt.s32.totalorder %v3844_v61, 112 }
 0x109   : > { %v3872_v59 = vpop.permute.xlu1 %719  ;;  %v3884_v43 = vpop.permute.xlu0 %717  ;;  %6655 = vst [vmem:[#allocation33_spill] sm:$0xff] %v3918_v2  ;;  %v322_v8 = vsel %vm318_vm2, %v3682_v11, %v3676_v9  ;;  %v374_v58 = vsel %vm370_vm3, %v3710_v19, %v3704_v17  ;;  %v2992_v2 = vld [vmem:[%s6542_s1 + $0x20] sm:$0xff]  ;;  %v2993_v9 = vld [vmem:[%s6542_s1 + $0x28] sm:$0xff]  ;;  %v319_v11 = vsel %vm318_vm2, %v3678_v10, %v3684_v12  ;;  %v304_v6 = vmul.f32 %v300_v56, %v297_v1 }
 0x10a   : > { %6650 = vst [vmem:[#allocation28_spill] sm:$0xff] %v3872_v59  ;;  %6651 = vst [vmem:[#allocation29_spill] sm:$0xff] %v3884_v43  ;;  %v2998_v59 = vld [vmem:[%s6542_s1 + $0x50] sm:$0xff]  ;;  %v2999_v43 = vld [vmem:[%s6542_s1 + $0x58] sm:$0xff]  ;;  %v305_v5 = vmul.f32 %v301_v13, %v295_v15  ;;  %v355_v54 = vmul.f32 %v2997_v60, %v345_v62  ;;  %v330_v42 = vmul.f32 %v2994_v4, %v322_v8 }
 0x10b   : > { %v356_v14 = vmul.f32 %v2998_v59, %v348_v57  ;;  %v321_v57 = vsel %vm318_vm2, %v3684_v12, %v3678_v10  ;;  %v357_v59 = vmul.f32 %v2999_v43, %v346_v53  ;;  %v331_v44 = vmul.f32 %v2995_v46, %v320_v7  ;;  %v3000_v10 = vld [vmem:[%s6542_s1 + $0x60] sm:$0xff]  ;;  %v3001_v17 = vld [vmem:[%s6542_s1 + $0x68] sm:$0xff] }
 0x10c   : > { %v382_v41 = vmul.f32 %v3002_v16, %v374_v58  ;;  %v373_v12 = vsel %vm370_vm3, %v3712_v20, %v3706_v18  ;;  %v328_v43 = vmul.f32 %v2992_v2, %v321_v57  ;;  %v371_v19 = vsel %vm370_vm3, %v3706_v18, %v3712_v20  ;;  %v3006_v2 = vld [vmem:[%s6542_s1 + $0x90] sm:$0xff]  ;;  %v3007_v18 = vld [vmem:[%s6542_s1 + $0x98] sm:$0xff]  ;;  %v3009_v4 = vld [vmem:[%s6542_s1 + $0xa8] sm:$0xff] }
 0x10d   : > { %v3941_v63 = vpop.permute.xlu1 %741  ;;  %v361_v13 = vadd.f32 %v357_v59, %v305_v5  ;;  %v383_v1 = vmul.f32 %v3003_v51, %v372_v45  ;;  %v359_v60 = vadd.f32 %v355_v54, %v303_v55  ;;  %v380_v62 = vmul.f32 %v3000_v10, %v373_v12  ;;  %v3004_v45 = vld [vmem:[%s6542_s1 + $0x80] sm:$0xff]  ;;  %v3005_v5 = vld [vmem:[%s6542_s1 + $0x88] sm:$0xff]  ;;  %v3014_v16 = vld [vmem:[%s6542_s1 + $0xd0] sm:$0xff] }
 0x10e   : > { %6656 = vst [vmem:[#allocation34_spill] sm:$0xff] %v3941_v63  ;;  %v3964_v63 = vpop.permute.xlu0 %739  ;;  %v398_v20 = vsel %vm396_vm4, %v3716_v21, %v3722_v23  ;;  %v399_v51 = vsel %vm396_vm4, %v3724_v24, %v3718_v22  ;;  %v381_v54 = vmul.f32 %v3001_v17, %v371_v19  ;;  %v426_v55 = vsel %vm422_vm5, %v3734_v27, %v3728_v25  ;;  %v3013_v17 = vld [vmem:[%s6542_s1 + $0xc8] sm:$0xff] }
 0x10f   : > { %6657 = vst [vmem:[#allocation35_spill] sm:$0xff] %v3964_v63  ;;  %v354_v63 = vmul.f32 %v2996_v3, %v347_v0  ;;  %v329_v3 = vmul.f32 %v2993_v9, %v319_v11  ;;  %v360_v0 = vadd.f32 %v356_v14, %v304_v6  ;;  %v400_v6 = vsel %vm396_vm4, %v3722_v23, %v3716_v21  ;;  %v3010_v23 = vld [vmem:[%s6542_s1 + $0xb0] sm:$0xff] }
 0x110   : > { %v397_v21 = vsel %vm396_vm4, %v3718_v22, %v3724_v24  ;;  %v424_v22 = vsel %vm422_vm5, %v3728_v25, %v3734_v27  ;;  %v3008_v24 = vld [vmem:[%s6542_s1 + $0xa0] sm:$0xff]  ;;  %v423_v46 = vsel %vm422_vm5, %v3730_v26, %v3736_v28  ;;  %v425_v7 = vsel %vm422_vm5, %v3736_v28, %v3730_v26  ;;  %v3015_v26 = vld [vmem:[%s6542_s1 + $0xd8] sm:$0xff] }
 0x111   : > { %v3995_v53 = vpop.permute.xlu1 %745  ;;  %v358_v15 = vadd.f32 %v354_v63, %v302_v52  ;;  %v386_v52 = vadd.f32 %v382_v41, %v330_v42  ;;  %v408_v42 = vmul.f32 %v3006_v2, %v400_v6  ;;  %v3011_v63 = vld [vmem:[%s6542_s1 + $0xb8] sm:$0xff]  ;;  %v387_v27 = vadd.f32 %v383_v1, %v331_v44  ;;  %v3012_v44 = vld [vmem:[%s6542_s1 + $0xc0] sm:$0xff] }
 0x112   : > { %v4004_v56 = vpop.permute.xlu0 %743  ;;  %v409_v8 = vmul.f32 %v3007_v18, %v398_v20  ;;  %v406_v14 = vmul.f32 %v3004_v45, %v399_v51  ;;  %v452_v58 = vsel %vm448_vm6, %v3746_v31, %v3740_v29  ;;  %v407_v9 = vmul.f32 %v3005_v5, %v397_v21 }
 0x113   : > { %v434_v11 = vmul.f32 %v3010_v23, %v426_v55  ;;  %v450_v28 = vsel %vm448_vm6, %v3740_v29, %v3746_v31  ;;  %v451_v57 = vsel %vm448_vm6, %v3748_v32, %v3742_v30  ;;  %v435_v59 = vmul.f32 %v3011_v63, %v424_v22  ;;  %v3018_v63 = vld [vmem:[%s6542_s1 + $0xf0] sm:$0xff] }
 0x114   : > { %v432_v10 = vmul.f32 %v3008_v24, %v425_v7  ;;  %v433_v12 = vmul.f32 %v3009_v4, %v423_v46  ;;  %v449_v29 = vsel %vm448_vm6, %v3742_v30, %v3748_v32  ;;  %v384_v19 = vadd.f32 %v380_v62, %v328_v43  ;;  %v3016_v62 = vld [vmem:[%s6542_s1 + $0xe0] sm:$0xff] }
 0x115   : > { %v4042_v41 = vpop.permute.xlu1 %767  ;;  %v385_v1 = vadd.f32 %v381_v54, %v329_v3  ;;  %v412_v2 = vadd.f32 %v408_v42, %v360_v0  ;;  %v460_v6 = vmul.f32 %v3014_v16, %v452_v58  ;;  %v413_v20 = vadd.f32 %v409_v8, %v361_v13  ;;  %v3019_v0 = vld [vmem:[%s6542_s1 + $0xf8] sm:$0xff]  ;;  %v3022_v54 = vld [vmem:[%s6542_s1 + $0x110] sm:$0xff]  ;;  %v3020_v7 = vld [vmem:[%s6542_s1 + $0x100] sm:$0xff] }
 0x116   : > { %v4066_v25 = vpop.permute.xlu0 %765  ;;  %v410_v45 = vadd.f32 %v406_v14, %v358_v15  ;;  %v461_v51 = vmul.f32 %v3015_v26, %v450_v28  ;;  %v458_v5 = vmul.f32 %v3012_v44, %v451_v57  ;;  %v411_v21 = vadd.f32 %v407_v9, %v359_v60  ;;  %v3021_v16 = vld [vmem:[%s6542_s1 + $0x108] sm:$0xff]  ;;  %v3030_v28 = vld [vmem:[%s6542_s1 + $0x150] sm:$0xff]  ;;  %v3028_v57 = vld [vmem:[%s6542_s1 + $0x140] sm:$0xff] }
 0x117   : > { %v438_v23 = vadd.f32 %v434_v11, %v386_v52  ;;  %v459_v55 = vmul.f32 %v3013_v17, %v449_v29  ;;  %v478_v30 = vsel %vm474_vm7, %v3762_v35, %v3754_v33  ;;  %v439_v32 = vadd.f32 %v435_v59, %v387_v27  ;;  %v3029_v59 = vld [vmem:[%s6542_s1 + $0x148] sm:$0xff] }
 0x118   : > { %v4109_v43 = vadd.f32 %v432_v10, %v384_v19  ;;  %v4111_v3 = vadd.f32 %v433_v12, %v385_v1  ;;  %v476_v13 = vsel %vm474_vm7, %v3754_v33, %v3762_v35  ;;  %v464_v60 = vadd.f32 %v460_v6, %v412_v2  ;;  %v3023_v33 = vld [vmem:[%s6542_s1 + $0x118] sm:$0xff]  ;;  %v3026_v19 = vld [vmem:[%s6542_s1 + $0x130] sm:$0xff]  ;;  %v6658_v1 = vld [vmem:[#allocation2_spill] sm:$0xff] }
 0x119   : > { %v4097_v31 = vpop.permute.xlu1 %771  ;;  %v477_v52 = vsel %vm474_vm7, %v3764_v36, %v3756_v34  ;;  %v502_v35 = vsel %vm500_vm8, %v3768_v37, %v3774_v39  ;;  %v504_v42 = vsel %vm500_vm8, %v3774_v39, %v3768_v37  ;;  %v465_v24 = vadd.f32 %v461_v51, %v413_v20  ;;  %v3017_v37 = vld [vmem:[%s6542_s1 + $0xe8] sm:$0xff]  ;;  %v6659_v2 = vld [vmem:[#allocation4_spill] sm:$0xff] }
 0x11a   : > { %v4099_v18 = vpop.permute.xlu0 %769  ;;  %v462_v4 = vadd.f32 %v458_v5, %v410_v45  ;;  %v486_v46 = vmul.f32 %v3018_v63, %v478_v30  ;;  %v503_v27 = vsel %vm500_vm8, %v3776_v40, %v3770_v38  ;;  %v463_v8 = vadd.f32 %v459_v55, %v411_v21  ;;  %v3027_v45 = vld [vmem:[%s6542_s1 + $0x138] sm:$0xff]  ;;  %v6660_v51 = vld [vmem:[#allocation3_spill] sm:$0xff] }
 0x11b   : > { %v487_v14 = vmul.f32 %v3019_v0, %v476_v13  ;;  %v475_v39 = vsel %vm474_vm7, %v3756_v34, %v3764_v36  ;;  %v501_v58 = vsel %vm500_vm8, %v3770_v38, %v3776_v40  ;;  %v484_v9 = vmul.f32 %v3016_v62, %v477_v52  ;;  %v3031_v38 = vld [vmem:[%s6542_s1 + $0x158] sm:$0xff]  ;;  %v3025_v55 = vld [vmem:[%s6542_s1 + $0x128] sm:$0xff] }
 0x11c   : > { %v512_v11 = vmul.f32 %v3022_v54, %v504_v42  ;;  %v513_v26 = vmul.f32 %v3023_v33, %v502_v35  ;;  %v556_v34 = vsel %vm552_vm9, %v3800_v49, %v3796_v47  ;;  %v510_v44 = vmul.f32 %v3020_v7, %v503_v27  ;;  %v6661_v5 = vld [vmem:[#allocation5_spill] sm:$0xff]  ;;  %v3034_v27 = vld [vmem:[%s6542_s1 + $0x170] sm:$0xff] }
 0x11d   : > { %v4120_v15 = vpop.permute.xlu1 %793  ;;  %v554_v40 = vsel %vm552_vm9, %v3796_v47, %v3800_v49  ;;  %v553_v10 = vsel %vm552_vm9, %v3798_v48, %v3802_v50  ;;  %v555_v12 = vsel %vm552_vm9, %v3802_v50, %v3798_v48  ;;  %v490_v47 = vadd.f32 %v486_v46, %v438_v23  ;;  %v3024_v50 = vld [vmem:[%s6542_s1 + $0x120] sm:$0xff] }
 0x11e   : > { %v4143_v22 = vpop.permute.xlu0 %791  ;;  %v485_v49 = vmul.f32 %v3017_v37, %v475_v39  ;;  %v511_v29 = vmul.f32 %v3021_v16, %v501_v58  ;;  %v530_v6 = vsel %vm526_vm10, %v6659_v2, %v6658_v1  ;;  %v491_v20 = vadd.f32 %v487_v14, %v439_v32  ;;  %v6662_v14 = vld [vmem:[#allocation6_spill] sm:$0xff]  ;;  %v6663_v37 = vld [vmem:[#allocation8_spill] sm:$0xff]  ;;  %v6664_v58 = vld [vmem:[#allocation7_spill] sm:$0xff] }
 0x11f   : > { %v528_v48 = vsel %vm526_vm10, %v6658_v1, %v6659_v2  ;;  %v529_v21 = vsel %vm526_vm10, %v6661_v5, %v6660_v51  ;;  %v564_v23 = vmul.f32 %v3030_v28, %v556_v34  ;;  %v527_v63 = vsel %vm526_vm10, %v6660_v51, %v6661_v5  ;;  %v3032_v16 = vld [vmem:[%s6542_s1 + $0x160] sm:$0xff] }
 0x120   : > { %v565_v30 = vmul.f32 %v3031_v38, %v554_v40  ;;  %v562_v32 = vmul.f32 %v3028_v57, %v555_v12  ;;  %v563_v0 = vmul.f32 %v3029_v59, %v553_v10  ;;  %v516_v62 = vadd.f32 %v512_v11, %v464_v60  ;;  %v6665_v11 = vld [vmem:[#allocation9_spill] sm:$0xff]  ;;  %v3033_v38 = vld [vmem:[%s6542_s1 + $0x168] sm:$0xff] }
 0x121   : > { %v4174_v36 = vpop.permute.xlu1 %797  ;;  %v517_v52 = vadd.f32 %v513_v26, %v465_v24  ;;  %v514_v54 = vadd.f32 %v510_v44, %v462_v4  ;;  %v538_v33 = vmul.f32 %v3026_v19, %v530_v6  ;;  %v515_v42 = vadd.f32 %v511_v29, %v463_v8  ;;  %v3035_v4 = vld [vmem:[%s6542_s1 + $0x178] sm:$0xff] }
 0x122   : > { %v4197_v17 = vpop.permute.xlu0 %795  ;;  %v539_v46 = vmul.f32 %v3027_v45, %v528_v48  ;;  %v536_v7 = vmul.f32 %v3024_v50, %v529_v21  ;;  %v582_v39 = vsel %vm578_vm11, %v6663_v37, %v6662_v14  ;;  %v537_v60 = vmul.f32 %v3025_v55, %v527_v63  ;;  %v3042_v45 = vld [vmem:[%s6542_s1 + $0x1b0] sm:$0xff]  ;;  %v6667_v50 = vld [vmem:[#allocation10_spill] sm:$0xff]  ;;  %v6669_v21 = vld [vmem:[#allocation31_spill] sm:$0xff] }
 0x123   : > { %v568_v24 = vadd.f32 %v564_v23, %v516_v62  ;;  %v580_v8 = vsel %vm578_vm11, %v6662_v14, %v6663_v37  ;;  %v581_v26 = vsel %vm578_vm11, %v6665_v11, %v6664_v58  ;;  %v569_v28 = vadd.f32 %v565_v30, %v517_v52  ;;  %v6666_v48 = vld [vmem:[#allocation12_spill] sm:$0xff]  ;;  %v6671_v30 = vld [vmem:[#allocation33_spill] sm:$0xff] }
 0x124   : > { %v566_v34 = vadd.f32 %v562_v32, %v514_v54  ;;  %v567_v44 = vadd.f32 %v563_v0, %v515_v42  ;;  %v579_v40 = vsel %vm578_vm11, %v6664_v58, %v6665_v11  ;;  %v488_v59 = vadd.f32 %v484_v9, %v4109_v43  ;;  %v6670_v55 = vld [vmem:[#allocation32_spill] sm:$0xff]  ;;  %v3040_v54 = vld [vmem:[%s6542_s1 + $0x1a0] sm:$0xff]  ;;  %v6672_v42 = vld [vmem:[#allocation13_spill] sm:$0xff] }
 0x125   : > { %v4228_v13 = vpop.permute.xlu1 %819  ;;  %v489_v10 = vadd.f32 %v485_v49, %v4111_v3  ;;  %v542_v12 = vadd.f32 %v538_v33, %v490_v47  ;;  %v590_v29 = vmul.f32 %v3034_v27, %v582_v39  ;;  %v543_v1 = vadd.f32 %v539_v46, %v491_v20  ;;  %v6668_v47 = vld [vmem:[#allocation30_spill] sm:$0xff]  ;;  %v3043_v20 = vld [vmem:[%s6542_s1 + $0x1b8] sm:$0xff]  ;;  %v3041_v33 = vld [vmem:[%s6542_s1 + $0x1a8] sm:$0xff] }
 0x126   : > { %v4231_v35 = vpop.permute.xlu0 %817  ;;  %v591_v2 = vmul.f32 %v3035_v4, %v580_v8  ;;  %v588_v6 = vmul.f32 %v3032_v16, %v581_v26  ;;  %v619_v51 = vsel %vm617_vm12, %v6667_v50, %v6666_v48  ;;  %v540_v43 = vadd.f32 %v536_v7, %v488_v59  ;;  %v6673_v46 = vld [vmem:[#allocation11_spill] sm:$0xff]  ;;  %v6674_v4 = vld [vmem:[#allocation16_spill] sm:$0xff]  ;;  %v6675_v8 = vld [vmem:[#allocation14_spill] sm:$0xff] }
 0x127   : > { %v541_v3 = vadd.f32 %v537_v60, %v489_v10  ;;  %v589_v9 = vmul.f32 %v3033_v38, %v579_v40  ;;  %v4277_v49 = vadd.f32 %v6668_v47, %v568_v24  ;;  %v621_v5 = vsel %vm617_vm12, %v6666_v48, %v6667_v50  ;;  %v3046_v60 = vld [vmem:[%s6542_s1 + $0x1d0] sm:$0xff]  ;;  %v3047_v24 = vld [vmem:[%s6542_s1 + $0x1d8] sm:$0xff]  ;;  %v6677_v38 = vld [vmem:[#allocation15_spill] sm:$0xff] }
 0x128   : > { %v4287_v23 = vadd.f32 %v6669_v21, %v569_v28  ;;  %v4290_v63 = vadd.f32 %v6670_v55, %v567_v44  ;;  %v4293_v32 = vadd.f32 %v6671_v30, %v566_v34  ;;  %v594_v62 = vadd.f32 %v590_v29, %v542_v12  ;;  %v3044_v28 = vld [vmem:[%s6542_s1 + $0x1c0] sm:$0xff]  ;;  %v3045_v34 = vld [vmem:[%s6542_s1 + $0x1c8] sm:$0xff]  ;;  %v6676_v44 = vld [vmem:[#allocation17_spill] sm:$0xff] }
 0x129   : > { %v4262_v57 = vpop.permute.xlu1 %823  ;;  %v629_v52 = vmul.f32 %v3042_v45, %v619_v51  ;;  %v618_v7 = vsel %vm617_vm12, %v6673_v46, %v6672_v42  ;;  %v620_v27 = vsel %vm617_vm12, %v6672_v42, %v6673_v46  ;;  %v595_v37 = vadd.f32 %v591_v2, %v543_v1  ;;  %v3050_v29 = vld [vmem:[%s6542_s1 + $0x1f0] sm:$0xff]  ;;  %v3051_v1 = vld [vmem:[%s6542_s1 + $0x1f8] sm:$0xff]  ;;  %v6683_v42 = vld [vmem:[#allocation22_spill] sm:$0xff] }
 0x12a   : > { %v4266_v19 = vpop.permute.xlu0 %821  ;;  %v592_v39 = vadd.f32 %v588_v6, %v540_v43  ;;  %v645_v16 = vsel %vm643_vm13, %v6675_v8, %v6674_v4  ;;  %v647_v58 = vsel %vm643_vm13, %v6674_v4, %v6675_v8  ;;  %v593_v11 = vadd.f32 %v589_v9, %v541_v3  ;;  %v6678_v2 = vld [vmem:[#allocation20_spill] sm:$0xff]  ;;  %v6679_v6 = vld [vmem:[#allocation18_spill] sm:$0xff]  ;;  %v6680_v47 = vld [vmem:[#allocation21_spill] sm:$0xff] }
 0x12b   : > { %v630_v26 = vmul.f32 %v3043_v20, %v621_v5  ;;  %v644_v40 = vsel %vm643_vm13, %v6677_v38, %v6676_v44  ;;  %v646_v59 = vsel %vm643_vm13, %v6676_v44, %v6677_v38  ;;  %vm747_vm2 = vcmp.lt.s32.totalorder %v3844_v61, 111  ;;  %v3048_v9 = vld [vmem:[%s6542_s1 + $0x1e0] sm:$0xff]  ;;  %v6681_v20 = vld [vmem:[#allocation19_spill] sm:$0xff]  ;;  %v6684_v8 = vld [vmem:[#allocation25_spill] sm:$0xff] }
 0x12c   : > { %v627_v10 = vmul.f32 %v3040_v54, %v618_v7  ;;  %v628_v12 = vmul.f32 %v3041_v33, %v620_v27  ;;  %v671_v45 = vsel %vm669_vm14, %v6679_v6, %v6678_v2  ;;  %v673_v48 = vsel %vm669_vm14, %v6678_v2, %v6679_v6  ;;  %v3054_v54 = vld [vmem:[%s6542_s1 + $0x210] sm:$0xff]  ;;  %v3052_v4 = vld [vmem:[%s6542_s1 + $0x200] sm:$0xff] }
 0x12d   : > { %v4295_v0 = vpop.permute.xlu1 %845  ;;  %v633_v51 = vadd.f32 %v629_v52, %v594_v62  ;;  %v655_v43 = vmul.f32 %v3046_v60, %v645_v16  ;;  %v656_v3 = vmul.f32 %v3047_v24, %v647_v58  ;;  %v670_v5 = vsel %vm669_vm14, %v6681_v20, %v6680_v47  ;;  %v3049_v62 = vld [vmem:[%s6542_s1 + $0x1e8] sm:$0xff]  ;;  %v6682_v33 = vld [vmem:[#allocation24_spill] sm:$0xff]  ;;  %v3055_v60 = vld [vmem:[%s6542_s1 + $0x218] sm:$0xff] }
 0x12e   : > { %v4311_v14 = vpop.permute.xlu0 %843  ;;  %vm773_vm3 = vcmp.lt.s32.totalorder %v3844_v61, 110  ;;  %v653_v55 = vmul.f32 %v3044_v28, %v644_v40  ;;  %v654_v30 = vmul.f32 %v3045_v34, %v646_v59  ;;  %v672_v52 = vsel %vm669_vm14, %v6680_v47, %v6681_v20  ;;  %v6685_v16 = vld [vmem:[#allocation23_spill] sm:$0xff] }
 0x12f   : > { %v697_v46 = vsel %vm695_vm15, %v6683_v42, %v6682_v33  ;;  %vm799_vm4 = vcmp.lt.s32.totalorder %v3844_v61, 98  ;;  %v681_v7 = vmul.f32 %v3050_v29, %v671_v45  ;;  %v682_v27 = vmul.f32 %v3051_v1, %v673_v48  ;;  %v3053_v1 = vld [vmem:[%s6542_s1 + $0x208] sm:$0xff] }
 0x130   : > { %v699_v24 = vsel %vm695_vm15, %v6682_v33, %v6683_v42  ;;  %v696_v58 = vsel %vm695_vm15, %v6685_v16, %v6684_v8  ;;  %v634_v28 = vadd.f32 %v630_v26, %v595_v37  ;;  %v631_v34 = vadd.f32 %v627_v10, %v592_v39  ;;  %v3058_v37 = vld [vmem:[%s6542_s1 + $0x230] sm:$0xff]  ;;  %v3057_v33 = vld [vmem:[%s6542_s1 + $0x228] sm:$0xff] }
 0x131   : > { %v4356_v50 = vpop.permute.xlu1 %849  ;;  %v632_v44 = vadd.f32 %v628_v12, %v593_v11  ;;  %v679_v38 = vmul.f32 %v3048_v9, %v670_v5  ;;  %v680_v59 = vmul.f32 %v3049_v62, %v672_v52  ;;  %v707_v29 = vmul.f32 %v3054_v54, %v697_v46  ;;  %v6686_v39 = vld [vmem:[#allocation28_spill] sm:$0xff]  ;;  %v6687_v11 = vld [vmem:[#allocation26_spill] sm:$0xff]  ;;  %v3059_v52 = vld [vmem:[%s6542_s1 + $0x238] sm:$0xff] }
 0x132   : > { %v4366_v21 = vpop.permute.xlu0 %847  ;;  %v698_v2 = vsel %vm695_vm15, %v6684_v8, %v6685_v16  ;;  %v723_v26 = vsel %vm721_vm0, %v6687_v11, %v6686_v39  ;;  %v659_v12 = vadd.f32 %v655_v43, %v4277_v49  ;;  %v660_v6 = vadd.f32 %v656_v3, %v4287_v23  ;;  %v3056_v23 = vld [vmem:[%s6542_s1 + $0x220] sm:$0xff]  ;;  %v6689_v3 = vld [vmem:[#allocation27_spill] sm:$0xff] }
 0x133   : > { %v708_v45 = vmul.f32 %v3055_v60, %v699_v24  ;;  %v705_v48 = vmul.f32 %v3052_v4, %v696_v58  ;;  %v657_v9 = vadd.f32 %v653_v55, %v4293_v32  ;;  %v658_v47 = vadd.f32 %v654_v30, %v4290_v63  ;;  %v6688_v32 = vld [vmem:[#allocation29_spill] sm:$0xff]  ;;  %v3062_v60 = vld [vmem:[%s6542_s1 + $0x250] sm:$0xff]  ;;  %v6690_v4 = vld [vmem:[#allocation34_spill] sm:$0xff] }
 0x134   : > { %v685_v20 = vadd.f32 %v681_v7, %v633_v51  ;;  %v686_v5 = vadd.f32 %v682_v27, %v634_v28  ;;  %v706_v62 = vmul.f32 %v3053_v1, %v698_v2  ;;  %v725_v49 = vsel %vm721_vm0, %v6686_v39, %v6687_v11  ;;  %v3063_v24 = vld [vmem:[%s6542_s1 + $0x258] sm:$0xff] }
 0x135   : > { %v4397_v40 = vpop.permute.xlu1 %871  ;;  %v733_v43 = vmul.f32 %v3058_v37, %v723_v26  ;;  %v722_v63 = vsel %vm721_vm0, %v6689_v3, %v6688_v32  ;;  %vm851_vm5 = vcmp.lt.s32.totalorder %v3844_v61, 96  ;;  %v683_v55 = vadd.f32 %v679_v38, %v631_v34  ;;  %v3060_v34 = vld [vmem:[%s6542_s1 + $0x240] sm:$0xff]  ;;  %v6691_v38 = vld [vmem:[#allocation35_spill] sm:$0xff]  ;;  %v3066_v37 = vld [vmem:[%s6542_s1 + $0x270] sm:$0xff] }
 0x136   : > { %v4413_v10 = vpop.permute.xlu0 %869  ;;  %v684_v30 = vadd.f32 %v680_v59, %v632_v44  ;;  %v711_v54 = vadd.f32 %v707_v29, %v659_v12  ;;  %v724_v42 = vsel %vm721_vm0, %v6688_v32, %v6689_v3  ;;  %vm825_vm6 = vcmp.lt.s32.totalorder %v3844_v61, 97  ;;  %v3061_v44 = vld [vmem:[%s6542_s1 + $0x248] sm:$0xff] }
 0x137   : > { %v712_v7 = vadd.f32 %v708_v45, %v660_v6  ;;  %v709_v27 = vadd.f32 %v705_v48, %v657_v9  ;;  %v749_v8 = vsel %vm747_vm2, %v6690_v4, %v3995_v53  ;;  %v751_v16 = vsel %vm747_vm2, %v3995_v53, %v6690_v4  ;;  %v3070_v45 = vld [vmem:[%s6542_s1 + $0x290] sm:$0xff] }
 0x138   : > { %vm903_vm8 = vcmp.lt.s32.totalorder %v3844_v61, 94  ;;  %v734_v58 = vmul.f32 %v3059_v52, %v725_v49  ;;  %v731_v28 = vmul.f32 %v3056_v23, %v722_v63  ;;  %v748_v59 = vsel %vm747_vm2, %v6691_v38, %v4004_v56  ;;  %v3068_v49 = vld [vmem:[%s6542_s1 + $0x280] sm:$0xff]  ;;  %v3069_v63 = vld [vmem:[%s6542_s1 + $0x288] sm:$0xff] }
 0x139   : > { %v4434_v51 = vpop.permute.xlu1 %875  ;;  %v750_v53 = vsel %vm747_vm2, %v4004_v56, %v6691_v38  ;;  %v710_v29 = vadd.f32 %v706_v62, %v658_v47  ;;  %v737_v1 = vadd.f32 %v733_v43, %v685_v20  ;;  %v732_v2 = vmul.f32 %v3057_v33, %v724_v42  ;;  %v3064_v56 = vld [vmem:[%s6542_s1 + $0x260] sm:$0xff]  ;;  %v3071_v62 = vld [vmem:[%s6542_s1 + $0x298] sm:$0xff] }
 0x13a   : > { %v4444_v46 = vpop.permute.xlu0 %873  ;;  %v775_v39 = vsel %vm773_vm3, %v4042_v41, %v4097_v31  ;;  %vm877_vm9 = vcmp.lt.s32.totalorder %v3844_v61, 95  ;;  %v759_v26 = vmul.f32 %v3062_v60, %v749_v8  ;;  %v760_v12 = vmul.f32 %v3063_v24, %v751_v16 }
 0x13b   : > { %v774_v6 = vsel %vm773_vm3, %v4066_v25, %v4099_v18  ;;  %v801_v48 = vsel %vm799_vm4, %v4120_v15, %v4174_v36  ;;  %v757_v47 = vmul.f32 %v3060_v34, %v748_v59  ;;  %v758_v20 = vmul.f32 %v3061_v44, %v750_v53  ;;  %v3076_v59 = vld [vmem:[%s6542_s1 + $0x2c0] sm:$0xff] }
 0x13c   : > { %v803_v52 = vsel %vm799_vm4, %v4174_v36, %v4120_v15  ;;  %v800_v43 = vsel %vm799_vm4, %v4143_v22, %v4197_v17  ;;  %v4515_v23 = vadd.f32 %v734_v58, %v686_v5  ;;  %v735_v32 = vadd.f32 %v731_v28, %v683_v55  ;;  %v3067_v36 = vld [vmem:[%s6542_s1 + $0x278] sm:$0xff]  ;;  %v3065_v55 = vld [vmem:[%s6542_s1 + $0x268] sm:$0xff] }
 0x13d   : > { %v4483_v11 = vpop.permute.xlu1 %897  ;;  %v785_v3 = vmul.f32 %v3066_v37, %v775_v39  ;;  %v802_v15 = vsel %vm799_vm4, %v4197_v17, %v4143_v22  ;;  %v777_v5 = vsel %vm773_vm3, %v4097_v31, %v4042_v41  ;;  %v776_v33 = vsel %vm773_vm3, %v4099_v18, %v4066_v25  ;;  %v3078_v25 = vld [vmem:[%s6542_s1 + $0x2d0] sm:$0xff] }
 0x13e   : > { %v4499_v9 = vpop.permute.xlu0 %895  ;;  %v783_v42 = vmul.f32 %v3064_v56, %v774_v6  ;;  %v811_v22 = vmul.f32 %v3070_v45, %v801_v48  ;;  %v4538_v17 = vadd.f32 %v732_v2, %v684_v30  ;;  %v763_v60 = vadd.f32 %v759_v26, %v711_v54  ;;  %v3075_v2 = vld [vmem:[%s6542_s1 + $0x2b8] sm:$0xff]  ;;  %v3086_v39 = vld [vmem:[%s6542_s1 + $0x310] sm:$0xff]  ;;  %v3072_v56 = vld [vmem:[%s6542_s1 + $0x2a0] sm:$0xff] }
 0x13f   : > { %v812_v24 = vmul.f32 %v3071_v62, %v803_v52  ;;  %v809_v4 = vmul.f32 %v3068_v49, %v800_v43  ;;  %v764_v8 = vadd.f32 %v760_v12, %v712_v7  ;;  %v761_v16 = vadd.f32 %v757_v47, %v709_v27  ;;  %v3074_v27 = vld [vmem:[%s6542_s1 + $0x2b0] sm:$0xff]  ;;  %v3079_v47 = vld [vmem:[%s6542_s1 + $0x2d8] sm:$0xff] }
 0x140   : > { %v762_v58 = vadd.f32 %v758_v20, %v710_v29  ;;  %v810_v41 = vmul.f32 %v3069_v63, %v802_v15  ;;  %v786_v28 = vmul.f32 %v3067_v36, %v777_v5  ;;  %v789_v34 = vadd.f32 %v785_v3, %v737_v1  ;;  %v3082_v52 = vld [vmem:[%s6542_s1 + $0x2f0] sm:$0xff] }
 0x141   : > { %v902_v31 = vpop.permute.xlu1 %901  ;;  %v4540_v44 = vmul.f32 %v3065_v55, %v776_v33  ;;  %v853_v18 = vsel %vm851_vm5, %v4295_v0, %v4356_v50  ;;  %v787_v54 = vadd.f32 %v783_v42, %v735_v32  ;;  %v815_v7 = vadd.f32 %v811_v22, %v763_v60  ;;  %v3077_v32 = vld [vmem:[%s6542_s1 + $0x2c8] sm:$0xff] }
 0x142   : > { %v900_v30 = vpop.permute.xlu0 %899  ;;  %v827_v38 = vsel %vm825_vm6, %v4228_v13, %v4262_v57  ;;  %v852_v53 = vsel %vm851_vm5, %v4311_v14, %v4366_v21  ;;  %v816_v29 = vadd.f32 %v812_v24, %v764_v8  ;;  %v813_v1 = vadd.f32 %v809_v4, %v761_v16  ;;  %v3073_v55 = vld [vmem:[%s6542_s1 + $0x2a8] sm:$0xff] }
 0x143   : > { %v829_v37 = vsel %vm825_vm6, %v4262_v57, %v4228_v13  ;;  %v905_v26 = vsel %vm903_vm8, %v4483_v11, %v902_v31  ;;  %v814_v12 = vadd.f32 %v810_v41, %v762_v58  ;;  %v826_v6 = vsel %vm825_vm6, %v4231_v35, %v4266_v19  ;;  %v3084_v13 = vld [vmem:[%s6542_s1 + $0x300] sm:$0xff]  ;;  %v3081_v58 = vld [vmem:[%s6542_s1 + $0x2e8] sm:$0xff] }
 0x144   : > { %v863_v45 = vmul.f32 %v3078_v25, %v853_v18  ;;  %v904_v57 = vsel %vm903_vm8, %v4499_v9, %v900_v30  ;;  %v837_v48 = vmul.f32 %v3074_v27, %v827_v38  ;;  %v855_v20 = vsel %vm851_vm5, %v4356_v50, %v4295_v0  ;;  %v3080_v50 = vld [vmem:[%s6542_s1 + $0x2e0] sm:$0xff] }
 0x145   : > { %v861_v62 = vmul.f32 %v3076_v59, %v852_v53  ;;  %v879_v49 = vsel %vm877_vm9, %v4397_v40, %v4434_v51  ;;  %v838_v43 = vmul.f32 %v3075_v2, %v829_v37  ;;  %v854_v0 = vsel %vm851_vm5, %v4366_v21, %v4311_v14  ;;  %v3087_v14 = vld [vmem:[%s6542_s1 + $0x318] sm:$0xff] }
 0x146   : > { %v878_v3 = vsel %vm877_vm9, %v4413_v10, %v4444_v46  ;;  %v915_v63 = vmul.f32 %v3086_v39, %v905_v26  ;;  %v828_v15 = vsel %vm825_vm6, %v4266_v19, %v4231_v35  ;;  %v835_v36 = vmul.f32 %v3072_v56, %v826_v6  ;;  %v3085_v35 = vld [vmem:[%s6542_s1 + $0x308] sm:$0xff] }
 0x147   : > { %v907_v21 = vsel %vm903_vm8, %v902_v31, %v4483_v11  ;;  %v913_v5 = vmul.f32 %v3084_v13, %v904_v57  ;;  %v864_v33 = vmul.f32 %v3079_v47, %v855_v20  ;;  %v867_v42 = vadd.f32 %v863_v45, %v815_v7  ;;  %v3083_v11 = vld [vmem:[%s6542_s1 + $0x2f8] sm:$0xff] }
 0x148   : > { %v889_v22 = vmul.f32 %v3082_v52, %v879_v49  ;;  %v906_v19 = vsel %vm903_vm8, %v900_v30, %v4499_v9  ;;  %v862_v60 = vmul.f32 %v3077_v32, %v854_v0  ;;  %v865_v24 = vadd.f32 %v861_v62, %v813_v1 }
 0x149   : > { %v881_v4 = vsel %vm877_vm9, %v4434_v51, %v4397_v40  ;;  %v887_v8 = vmul.f32 %v3080_v50, %v878_v3  ;;  %v841_v16 = vadd.f32 %v837_v48, %v789_v34  ;;  %v880_v9 = vsel %vm877_vm9, %v4444_v46, %v4413_v10 }
 0x14a   : > { %v916_v41 = vmul.f32 %v3087_v14, %v907_v21  ;;  %v919_v31 = vadd.f32 %v915_v63, %v867_v42  ;;  %v836_v25 = vmul.f32 %v3073_v55, %v828_v15  ;;  %v839_v18 = vadd.f32 %v835_v36, %v787_v54 }
 0x14b   : > { %v914_v30 = vmul.f32 %v3085_v35, %v906_v19  ;;  %v917_v7 = vadd.f32 %v913_v5, %v865_v24  ;;  %v790_v27 = vadd.f32 %v786_v28, %v4515_v23  ;;  %v868_v40 = vadd.f32 %v864_v33, %v816_v29 }
 0x14c   : > { %v890_v51 = vmul.f32 %v3083_v11, %v881_v4  ;;  %v893_v34 = vadd.f32 %v889_v22, %v841_v16  ;;  %v788_v38 = vadd.f32 %v4540_v44, %v4538_v17  ;;  %v866_v59 = vadd.f32 %v862_v60, %v814_v12 }
 0x14d   : > { %v888_v53 = vmul.f32 %v3081_v58, %v880_v9  ;;  %v891_v1 = vadd.f32 %v887_v8, %v839_v18  ;;  %v842_v2 = vadd.f32 %v838_v43, %v790_v27  ;;  %v920_v37 = vadd.f32 %v916_v41, %v868_v40 }
 0x14e   : > { %v923_v10 = vadd.f32 %v919_v31, %v893_v34  ;;  %v840_v46 = vadd.f32 %v836_v25, %v788_v38  ;;  %v918_v39 = vadd.f32 %v914_v30, %v866_v59  ;;  %vm949_vm10 = vcmp.lt.s32.totalorder %v3844_v61, 25 }
 0x14f   : > { %v921_v26 = vadd.f32 %v917_v7, %v891_v1  ;;  %v894_v56 = vadd.f32 %v890_v51, %v842_v2  ;;  %vm1000_vm11 = vcmp.lt.s32.totalorder %v3844_v61, 19  ;;  %vm974_vm12 = vcmp.lt.s32.totalorder %v3844_v61, 22 }
 0x150   : > { %v892_v28 = vadd.f32 %v888_v53, %v840_v46  ;;  %vm1051_vm13 = vcmp.lt.s32.totalorder %v3844_v61, 13  ;;  %vm1077_vm14 = vcmp.lt.s32.totalorder %v3844_v61, 10  ;;  %vm1103_vm15 = vcmp.lt.s32.totalorder %v3844_v61, 7 }
 0x151   : > { %v924_v45 = vadd.f32 %v920_v37, %v894_v56  ;;  %vm1129_vm2 = vcmp.lt.s32.totalorder %v3844_v61, 105  ;;  %vm1181_vm3 = vcmp.lt.s32.totalorder %v3844_v61, 99  ;;  %vm1232_vm4 = vcmp.lt.s32.totalorder %v3844_v61, 93 }
 0x152   : > { %v935_v54 = vpop.permute.xlu1 %934  ;;  %v930_v23 = vpop.permute.xlu0 %929  ;;  %v922_v17 = vadd.f32 %v918_v39, %v892_v28  ;;  %vm1258_vm6 = vcmp.lt.s32.totalorder %v3844_v61, 90  ;;  %vm1284_vm8 = vcmp.lt.s32.totalorder %v3844_v61, 87  ;;  %vm1310_vm9 = vcmp.lt.s32.totalorder %v3844_v61, 57 }
 0x153   : > { %v4653_v6 = vadd.f32 %v935_v54, %v923_v10  ;;  %v4655_v29 = vadd.f32 %v930_v23, %v921_v26  ;;  %v4659_v44 = vadd.f32 %v935_v54, %v924_v45 }
 0x154   : > { %v4661_v12 = vadd.f32 %v930_v23, %v922_v17 }
 0x155   : > { %943 = vrot.lane.b32.xlu0 %v4653_v6, %s3489_s29  ;;  %941 = vrot.lane.b32.xlu1 %v4655_v29, %s3489_s29 }
 0x159   : > { %947 = vrot.lane.b32.xlu0 %v4659_v44, %s3489_s29  ;;  %945 = vrot.lane.b32.xlu1 %v4661_v12, %s3489_s29  ;;  %s3507_s29 = smov 39  }
 0x15d   : > { %994 = vrot.lane.b32.xlu0 %v4653_v6, %s3490_s30  ;;  %992 = vrot.lane.b32.xlu1 %v4655_v29, %s3490_s30 }
 0x161   : > { %998 = vrot.lane.b32.xlu0 %v4659_v44, %s3490_s30  ;;  %996 = vrot.lane.b32.xlu1 %v4661_v12, %s3490_s30  ;;  %s3508_s30 = smov 9  }
 0x165   : > { %968 = vrot.lane.b32.xlu0 %v4653_v6, %s3491_s10  ;;  %966 = vrot.lane.b32.xlu1 %v4655_v29, %s3491_s10 }
 0x169   : > { %972 = vrot.lane.b32.xlu0 %v4659_v44, %s3491_s10  ;;  %970 = vrot.lane.b32.xlu1 %v4661_v12, %s3491_s10  ;;  %s3509_s10 = smov 6  }
 0x16d   : > { %1020 = vrot.lane.b32.xlu0 %v4653_v6, %s3471_s14  ;;  %1018 = vrot.lane.b32.xlu1 %v4655_v29, %s3471_s14 }
 0x171   : > { %1024 = vrot.lane.b32.xlu0 %v4659_v44, %s3471_s14  ;;  %1022 = vrot.lane.b32.xlu1 %v4661_v12, %s3471_s14  ;;  %s3495_s14 = smov 105  }
 0x175   : > { %1045 = vrot.lane.b32.xlu0 %v4653_v6, %s3492_s11  ;;  %1043 = vrot.lane.b32.xlu1 %v4655_v29, %s3492_s11 }
 0x179   : > { %1049 = vrot.lane.b32.xlu0 %v4659_v44, %s3492_s11  ;;  %1047 = vrot.lane.b32.xlu1 %v4661_v12, %s3492_s11  ;;  %s3510_s11 = smov 3  }
 0x17d   : > { %1071 = vrot.lane.b32.xlu0 %v4653_v6, %s3493_s12  ;;  %1069 = vrot.lane.b32.xlu1 %v4655_v29, %s3493_s12 }
 0x181   : > { %1075 = vrot.lane.b32.xlu0 %v4659_v44, %s3493_s12  ;;  %1073 = vrot.lane.b32.xlu1 %v4661_v12, %s3493_s12  ;;  %s3511_s12 = smov 125  }
 0x185   : > { %1097 = vrot.lane.b32.xlu0 %v4653_v6, %s3494_s13  ;;  %1095 = vrot.lane.b32.xlu1 %v4655_v29, %s3494_s13 }
 0x189   : > { %1101 = vrot.lane.b32.xlu0 %v4659_v44, %s3494_s13  ;;  %1099 = vrot.lane.b32.xlu1 %v4661_v12, %s3494_s13  ;;  %s3512_s13 = smov 122  }
 0x18d   : > { %1123 = vrot.lane.b32.xlu0 %v4653_v6, %s3495_s14  ;;  %1121 = vrot.lane.b32.xlu1 %v4655_v29, %s3495_s14 }
 0x191   : > { %1127 = vrot.lane.b32.xlu0 %v4659_v44, %s3495_s14  ;;  %1125 = vrot.lane.b32.xlu1 %v4661_v12, %s3495_s14  ;;  %s3513_s14 = smov 119  }
 0x195   : > { %1149 = vrot.lane.b32.xlu0 %v4653_v6, %s3496_s15  ;;  %1147 = vrot.lane.b32.xlu1 %v4655_v29, %s3496_s15 }
 0x199   : > { %1153 = vrot.lane.b32.xlu0 %v4659_v44, %s3496_s15  ;;  %1151 = vrot.lane.b32.xlu1 %v4661_v12, %s3496_s15  ;;  %s3514_s15 = smov 89  }
 0x19d   : > { %1175 = vrot.lane.b32.xlu0 %v4653_v6, %s3497_s16  ;;  %1173 = vrot.lane.b32.xlu1 %v4655_v29, %s3497_s16 }
 0x1a1   : > { %1179 = vrot.lane.b32.xlu0 %v4659_v44, %s3497_s16  ;;  %1177 = vrot.lane.b32.xlu1 %v4661_v12, %s3497_s16  ;;  %s3515_s16 = smov 86  }
 0x1a5   : > { %1201 = vrot.lane.b32.xlu0 %v4653_v6, %s3486_s8  ;;  %1199 = vrot.lane.b32.xlu1 %v4655_v29, %s3486_s8 }
 0x1a9   : > { %1205 = vrot.lane.b32.xlu0 %v4659_v44, %s3486_s8  ;;  %1203 = vrot.lane.b32.xlu1 %v4661_v12, %s3486_s8  ;;  %s3501_s8 = smov 57  }
 0x1ad   : > { %1226 = vrot.lane.b32.xlu0 %v4653_v6, %s3498_s17  ;;  %1224 = vrot.lane.b32.xlu1 %v4655_v29, %s3498_s17 }
 0x1b1   : > { %1230 = vrot.lane.b32.xlu0 %v4659_v44, %s3498_s17  ;;  %1228 = vrot.lane.b32.xlu1 %v4661_v12, %s3498_s17  ;;  %s3516_s17 = smov 83  }
 0x1b5   : > { %1252 = vrot.lane.b32.xlu0 %v4653_v6, %s3499_s18  ;;  %1250 = vrot.lane.b32.xlu1 %v4655_v29, %s3499_s18 }
 0x1b9   : > { %1256 = vrot.lane.b32.xlu0 %v4659_v44, %s3499_s18  ;;  %1254 = vrot.lane.b32.xlu1 %v4661_v12, %s3499_s18  ;;  %s3517_s18 = smov 80  }
 0x1bd   : > { %1278 = vrot.lane.b32.xlu0 %v4653_v6, %s3500_s19  ;;  %1276 = vrot.lane.b32.xlu1 %v4655_v29, %s3500_s19 }
 0x1c1   : > { %1282 = vrot.lane.b32.xlu0 %v4659_v44, %s3500_s19  ;;  %1280 = vrot.lane.b32.xlu1 %v4661_v12, %s3500_s19  ;;  %s3518_s19 = smov 77  }
 0x1c5   : > { %1304 = vrot.lane.b32.xlu0 %v4653_v6, %s3501_s8  ;;  %1302 = vrot.lane.b32.xlu1 %v4655_v29, %s3501_s8 }
 0x1c7   : > { %v4727_v13 = vpop.permute.xlu0 %943  ;;  %v4729_v57 = vpop.permute.xlu1 %941 }
 0x1c9   : > { %1308 = vrot.lane.b32.xlu0 %v4659_v44, %s3501_s8  ;;  %1306 = vrot.lane.b32.xlu1 %v4661_v12, %s3501_s8  ;;  %s3523_s8 = smov 35  }
 0x1cb   : > { %v4733_v48 = vpop.permute.xlu0 %947  ;;  %v4735_v47 = vpop.permute.xlu1 %945 }
 0x1cd   : > { %1330 = vrot.lane.b32.xlu0 %v4653_v6, %s3502_s20  ;;  %1328 = vrot.lane.b32.xlu1 %v4655_v29, %s3502_s20 }
 0x1cf   : > { %v4739_v20 = vpop.permute.xlu0 %994  ;;  %v4741_v62 = vpop.permute.xlu1 %992 }
 0x1d1   : > { %1334 = vrot.lane.b32.xlu0 %v4659_v44, %s3502_s20  ;;  %1332 = vrot.lane.b32.xlu1 %v4661_v12, %s3502_s20  ;;  %s3520_s20 = smov 71  }
 0x1d3   : > { %v4745_v52 = vpop.permute.xlu0 %998  ;;  %v4747_v49 = vpop.permute.xlu1 %996 }
 0x1d5   : > { %1356 = vrot.lane.b32.xlu0 %v4653_v6, %s3503_s21  ;;  %1354 = vrot.lane.b32.xlu1 %v4655_v29, %s3503_s21 }
 0x1d7   : > { %v4751_v43 = vpop.permute.xlu0 %968  ;;  %v4753_v32 = vpop.permute.xlu1 %966 }
 0x1d9   : > { %1360 = vrot.lane.b32.xlu0 %v4659_v44, %s3503_s21  ;;  %1358 = vrot.lane.b32.xlu1 %v4661_v12, %s3503_s21  ;;  %s3519_s21 = smov 74  }
 0x1db   : > { %v4757_v0 = vpop.permute.xlu0 %972  ;;  %v4759_v50 = vpop.permute.xlu1 %970 }
 0x1dd   : > { %1382 = vrot.lane.b32.xlu0 %v4653_v6, %s3504_s22  ;;  %1380 = vrot.lane.b32.xlu1 %v4655_v29, %s3504_s22 }
 0x1df   : > { %v4763_v3 = vpop.permute.xlu0 %1020  ;;  %v4765_v63 = vpop.permute.xlu1 %1018 }
 0x1e1   : > { %1386 = vrot.lane.b32.xlu0 %v4659_v44, %s3504_s22  ;;  %1384 = vrot.lane.b32.xlu1 %v4661_v12, %s3504_s22 }
 0x1e3   : > { %v4769_v15 = vpop.permute.xlu0 %1024  ;;  %v4771_v36 = vpop.permute.xlu1 %1022 }
 0x1e5   : > { %1408 = vrot.lane.b32.xlu0 %v4653_v6, %s3505_s27  ;;  %1406 = vrot.lane.b32.xlu1 %v4655_v29, %s3505_s27 }
 0x1e7   : > { %v4775_v14 = vpop.permute.xlu0 %1045  ;;  %v4777_v21 = vpop.permute.xlu1 %1043 }
 0x1e9   : > { %1412 = vrot.lane.b32.xlu0 %v4659_v44, %s3505_s27  ;;  %1410 = vrot.lane.b32.xlu1 %v4661_v12, %s3505_s27  ;;  %s3522_s27 = smov 38  }
 0x1eb   : > { %v4781_v5 = vpop.permute.xlu0 %1049  ;;  %v4783_v55 = vpop.permute.xlu1 %1047 }
 0x1ed   : > { %1434 = vrot.lane.b32.xlu0 %v4653_v6, %s3506_s28  ;;  %1432 = vrot.lane.b32.xlu1 %v4655_v29, %s3506_s28 }
 0x1ef   : > { %v4787_v33 = vpop.permute.xlu0 %1071  ;;  %v4789_v42 = vpop.permute.xlu1 %1069 }
 0x1f1   : > { %1438 = vrot.lane.b32.xlu0 %v4659_v44, %s3506_s28  ;;  %1436 = vrot.lane.b32.xlu1 %v4661_v12, %s3506_s28 }
 0x1f3   : > { %v4793_v22 = vpop.permute.xlu0 %1075  ;;  %v4795_v35 = vpop.permute.xlu1 %1073 }
 0x1f5   : > { %1460 = vrot.lane.b32.xlu0 %v4653_v6, %s3507_s29  ;;  %1458 = vrot.lane.b32.xlu1 %v4655_v29, %s3507_s29 }
 0x1f7   : > { %v4799_v19 = vpop.permute.xlu0 %1097  ;;  %v4801_v60 = vpop.permute.xlu1 %1095 }
 0x1f9   : > { %1464 = vrot.lane.b32.xlu0 %v4659_v44, %s3507_s29  ;;  %1462 = vrot.lane.b32.xlu1 %v4661_v12, %s3507_s29 }
 0x1fb   : > { %v4805_v24 = vpop.permute.xlu0 %1101  ;;  %v4807_v11 = vpop.permute.xlu1 %1099 }
 0x1fd   : > { %1486 = vrot.lane.b32.xlu0 %v4653_v6, %s3508_s30  ;;  %1484 = vrot.lane.b32.xlu1 %v4655_v29, %s3508_s30 }
 0x1ff   : > { %v4811_v4 = vpop.permute.xlu0 %1123  ;;  %v4813_v8 = vpop.permute.xlu1 %1121 }
 0x201   : > { %1490 = vrot.lane.b32.xlu0 %v4659_v44, %s3508_s30  ;;  %1488 = vrot.lane.b32.xlu1 %v4661_v12, %s3508_s30  ;;  %s3521_s30 = smov 41  }
 0x203   : > { %v4817_v16 = vpop.permute.xlu0 %1127  ;;  %v4819_v58 = vpop.permute.xlu1 %1125 }
 0x205   : > { %1512 = vrot.lane.b32.xlu0 %v4653_v6, %s3509_s10  ;;  %1510 = vrot.lane.b32.xlu1 %v4655_v29, %s3509_s10 }
 0x207   : > { %v4823_v9 = vpop.permute.xlu0 %1149  ;;  %v4825_v41 = vpop.permute.xlu1 %1147 }
 0x209   : > { %1516 = vrot.lane.b32.xlu0 %v4659_v44, %s3509_s10  ;;  %1514 = vrot.lane.b32.xlu1 %v4661_v12, %s3509_s10 }
 0x20b   : > { %v4829_v31 = vpop.permute.xlu0 %1153  ;;  %v4831_v25 = vpop.permute.xlu1 %1151 }
 0x20d   : > { %1538 = vrot.lane.b32.xlu0 %v4653_v6, %s3510_s11  ;;  %1536 = vrot.lane.b32.xlu1 %v4655_v29, %s3510_s11 }
 0x20f   : > { %v4835_v18 = vpop.permute.xlu0 %1175  ;;  %v4837_v30 = vpop.permute.xlu1 %1173 }
 0x210   : > { %6692 = vst [vmem:[#allocation2_spill] sm:$0xff] %v4835_v18  ;;  %6693 = vst [vmem:[#allocation4_spill] sm:$0xff] %v4837_v30 }
 0x211   : > { %1542 = vrot.lane.b32.xlu0 %v4659_v44, %s3510_s11  ;;  %1540 = vrot.lane.b32.xlu1 %v4661_v12, %s3510_s11  ;;  %s3526_s11 = smov 23  }
 0x213   : > { %v4841_v7 = vpop.permute.xlu0 %1179  ;;  %v4843_v27 = vpop.permute.xlu1 %1177 }
 0x214   : > { %6694 = vst [vmem:[#allocation3_spill] sm:$0xff] %v4843_v27 }
 0x215   : > { %1577 = vrot.lane.b32.xlu0 %v4653_v6, %s3511_s12  ;;  %1575 = vrot.lane.b32.xlu1 %v4655_v29, %s3511_s12 }
 0x217   : > { %v4847_v40 = vpop.permute.xlu0 %1201  ;;  %v4849_v51 = vpop.permute.xlu1 %1199 }
 0x218   : > { %6695 = vst [vmem:[#allocation5_spill] sm:$0xff] %v4847_v40  ;;  %6696 = vst [vmem:[#allocation6_spill] sm:$0xff] %v4849_v51  ;;  %v976_v51 = vsel %vm974_vm12, %v4751_v43, %v4757_v0 }
 0x219   : > { %1581 = vrot.lane.b32.xlu0 %v4659_v44, %s3511_s12  ;;  %1579 = vrot.lane.b32.xlu1 %v4661_v12, %s3511_s12 }
 0x21b   : > { %v4853_v34 = vpop.permute.xlu0 %1205  ;;  %v4855_v38 = vpop.permute.xlu1 %1203 }
 0x21c   : > { %6697 = vst [vmem:[#allocation8_spill] sm:$0xff] %v4853_v34  ;;  %6698 = vst [vmem:[#allocation7_spill] sm:$0xff] %v4855_v38 }
 0x21d   : > { %1603 = vrot.lane.b32.xlu0 %v4653_v6, %s3512_s13  ;;  %1601 = vrot.lane.b32.xlu1 %v4655_v29, %s3512_s13 }
 0x21f   : > { %v4859_v59 = vpop.permute.xlu0 %1226  ;;  %v4861_v53 = vpop.permute.xlu1 %1224 }
 0x220   : > { %6699 = vst [vmem:[#allocation9_spill] sm:$0xff] %v4859_v59  ;;  %6700 = vst [vmem:[#allocation12_spill] sm:$0xff] %v4861_v53  ;;  %v3095_v53 = vld [vmem:[%s6544_s3 + $0x58] sm:$0xff]  ;;  %v3090_v59 = vld [vmem:[%s6544_s3 + $0x30] sm:$0xff] }
 0x221   : > { %1607 = vrot.lane.b32.xlu0 %v4659_v44, %s3512_s13  ;;  %1605 = vrot.lane.b32.xlu1 %v4661_v12, %s3512_s13  ;;  %v986_v40 = vmul.f32 %v3090_v59, %v976_v51  ;;  %v1055_v51 = vsel %vm1051_vm13, %v4781_v5, %v4775_v14  ;;  %s3529_s13 = smov 115  }
 0x223   : > { %v4865_v1 = vpop.permute.xlu0 %1230  ;;  %v4867_v2 = vpop.permute.xlu1 %1228 }
 0x224   : > { %6701 = vst [vmem:[#allocation10_spill] sm:$0xff] %v4865_v1  ;;  %6702 = vst [vmem:[#allocation30_spill] sm:$0xff] %v4867_v2  ;;  %v1002_v2 = vsel %vm1000_vm11, %v4739_v20, %v4745_v52  ;;  %v3091_v1 = vld [vmem:[%s6544_s3 + $0x38] sm:$0xff] }
 0x225   : > { %1629 = vrot.lane.b32.xlu0 %v4653_v6, %s3513_s14  ;;  %1627 = vrot.lane.b32.xlu1 %v4655_v29, %s3513_s14 }
 0x227   : > { %v4871_v37 = vpop.permute.xlu0 %1252  ;;  %v4873_v10 = vpop.permute.xlu1 %1250 }
 0x228   : > { %6703 = vst [vmem:[#allocation31_spill] sm:$0xff] %v4871_v37  ;;  %6704 = vst [vmem:[#allocation32_spill] sm:$0xff] %v4873_v10  ;;  %v953_v10 = vsel %vm949_vm10, %v4733_v48, %v4727_v13 }
 0x229   : > { %1633 = vrot.lane.b32.xlu0 %v4659_v44, %s3513_s14  ;;  %1631 = vrot.lane.b32.xlu1 %v4661_v12, %s3513_s14 }
 0x22b   : > { %v4877_v46 = vpop.permute.xlu0 %1256  ;;  %v4879_v39 = vpop.permute.xlu1 %1254 }
 0x22c   : > { %6705 = vst [vmem:[#allocation33_spill] sm:$0xff] %v4877_v46  ;;  %6706 = vst [vmem:[#allocation13_spill] sm:$0xff] %v4879_v39  ;;  %v3094_v46 = vld [vmem:[%s6544_s3 + $0x50] sm:$0xff] }
 0x22d   : > { %1655 = vrot.lane.b32.xlu0 %v4653_v6, %s3514_s15  ;;  %1653 = vrot.lane.b32.xlu1 %v4655_v29, %s3514_s15 }
 0x22f   : > { %v4883_v26 = vpop.permute.xlu0 %1278  ;;  %v4885_v54 = vpop.permute.xlu1 %1276 }
 0x230   : > { %6707 = vst [vmem:[#allocation11_spill] sm:$0xff] %v4883_v26  ;;  %6708 = vst [vmem:[#allocation16_spill] sm:$0xff] %v4885_v54 }
 0x231   : > { %1659 = vrot.lane.b32.xlu0 %v4659_v44, %s3514_s15  ;;  %1657 = vrot.lane.b32.xlu1 %v4661_v12, %s3514_s15 }
 0x233   : > { %v4889_v56 = vpop.permute.xlu0 %1282  ;;  %v4891_v23 = vpop.permute.xlu1 %1280 }
 0x234   : > { %6709 = vst [vmem:[#allocation14_spill] sm:$0xff] %v4889_v56  ;;  %6710 = vst [vmem:[#allocation17_spill] sm:$0xff] %v4891_v23  ;;  %v951_v56 = vsel %vm949_vm10, %v4727_v13, %v4733_v48  ;;  %v1004_v13 = vsel %vm1000_vm11, %v4745_v52, %v4739_v20 }
 0x235   : > { %1681 = vrot.lane.b32.xlu0 %v4653_v6, %s3515_s16  ;;  %1679 = vrot.lane.b32.xlu1 %v4655_v29, %s3515_s16 }
 0x237   : > { %v4895_v28 = vpop.permute.xlu0 %1304  ;;  %v4897_v45 = vpop.permute.xlu1 %1302 }
 0x238   : > { %6711 = vst [vmem:[#allocation15_spill] sm:$0xff] %v4895_v28  ;;  %6712 = vst [vmem:[#allocation20_spill] sm:$0xff] %v4897_v45 }
 0x239   : > { %1685 = vrot.lane.b32.xlu0 %v4659_v44, %s3515_s16  ;;  %1683 = vrot.lane.b32.xlu1 %v4661_v12, %s3515_s16 }
 0x23b   : > { %v4901_v17 = vpop.permute.xlu0 %1308  ;;  %v4903_v54 = vpop.permute.xlu1 %1306 }
 0x23c   : > { %6713 = vst [vmem:[#allocation18_spill] sm:$0xff] %v4901_v17  ;;  %6714 = vst [vmem:[#allocation21_spill] sm:$0xff] %v4903_v54 }
 0x23d   : > { %1707 = vrot.lane.b32.xlu0 %v4653_v6, %s3516_s17  ;;  %1705 = vrot.lane.b32.xlu1 %v4655_v29, %s3516_s17 }
 0x23f   : > { %v4907_v23 = vpop.permute.xlu0 %1330  ;;  %v4909_v26 = vpop.permute.xlu1 %1328 }
 0x240   : > { %6715 = vst [vmem:[#allocation19_spill] sm:$0xff] %v4907_v23  ;;  %6716 = vst [vmem:[#allocation24_spill] sm:$0xff] %v4909_v26 }
 0x241   : > { %1711 = vrot.lane.b32.xlu0 %v4659_v44, %s3516_s17  ;;  %1709 = vrot.lane.b32.xlu1 %v4661_v12, %s3516_s17 }
 0x243   : > { %v4913_v45 = vpop.permute.xlu0 %1334  ;;  %v4915_v28 = vpop.permute.xlu1 %1332 }
 0x244   : > { %6717 = vst [vmem:[#allocation22_spill] sm:$0xff] %v4913_v45  ;;  %6718 = vst [vmem:[#allocation25_spill] sm:$0xff] %v4915_v28 }
 0x245   : > { %1733 = vrot.lane.b32.xlu0 %v4653_v6, %s3517_s18  ;;  %1731 = vrot.lane.b32.xlu1 %v4655_v29, %s3517_s18 }
 0x247   : > { %v4919_v54 = vpop.permute.xlu0 %1356  ;;  %v4921_v17 = vpop.permute.xlu1 %1354 }
 0x248   : > { %6719 = vst [vmem:[#allocation23_spill] sm:$0xff] %v4919_v54  ;;  %6720 = vst [vmem:[#allocation28_spill] sm:$0xff] %v4921_v17 }
 0x249   : > { %1737 = vrot.lane.b32.xlu0 %v4659_v44, %s3517_s18  ;;  %1735 = vrot.lane.b32.xlu1 %v4661_v12, %s3517_s18  ;;  %s3528_s18 = smov 118  }
 0x24b   : > { %v4925_v26 = vpop.permute.xlu0 %1360  ;;  %v4927_v23 = vpop.permute.xlu1 %1358 }
 0x24c   : > { %6721 = vst [vmem:[#allocation26_spill] sm:$0xff] %v4925_v26  ;;  %6722 = vst [vmem:[#allocation29_spill] sm:$0xff] %v4927_v23  ;;  %v3182_v23 = vld [vmem:[%s6544_s3 + $0x310] sm:$0xff]  ;;  %v957_v26 = vld [vmem:[%s6544_s3 + $0x18] sm:$0xff] }
 0x24d   : > { %1759 = vrot.lane.b32.xlu0 %v4653_v6, %s3518_s19  ;;  %1757 = vrot.lane.b32.xlu1 %v4655_v29, %s3518_s19  ;;  %v4974_v37 = vmul.f32 %v3182_v23, %v4653_v6  ;;  %v961_v52 = vmul.f32 %v957_v26, %v953_v10  ;;  %v1012_v10 = vmul.f32 %v3094_v46, %v1002_v2  ;;  %v3099_v2 = vld [vmem:[%s6544_s3 + $0x78] sm:$0xff] }
 0x24e   : > { %v1013_v26 = vmul.f32 %v3095_v53, %v1004_v13  ;;  %v1027_v46 = vsel %vm474_vm7, %v4763_v3, %v4769_v15  ;;  %v3097_v13 = vld [vmem:[%s6544_s3 + $0x68] sm:$0xff] }
 0x24f   : > { %v4931_v28 = vpop.permute.xlu0 %1382  ;;  %v4933_v45 = vpop.permute.xlu1 %1380  ;;  %6728 = vst [vmem:[#allocation38_spill] sm:$0xff] %v4974_v37 }
 0x250   : > { %6723 = vst [vmem:[#allocation27_spill] sm:$0xff] %v4931_v28  ;;  %6724 = vst [vmem:[#allocation34_spill] sm:$0xff] %v4933_v45  ;;  %v3183_v45 = vld [vmem:[%s6544_s3 + $0x318] sm:$0xff]  ;;  %v3181_v28 = vld [vmem:[%s6544_s3 + $0x308] sm:$0xff]  ;;  %v5104_v38 = vadd.f32 %v1013_v26, %v961_v52 }
 0x251   : > { %1763 = vrot.lane.b32.xlu0 %v4659_v44, %s3518_s19  ;;  %1761 = vrot.lane.b32.xlu1 %v4661_v12, %s3518_s19  ;;  %v4993_v23 = vmul.f32 %v3183_v45, %v4659_v44  ;;  %v4996_v37 = vmul.f32 %v3181_v28, %v4661_v12  ;;  %v954_v45 = vld [vmem:[%s6544_s3] sm:$0xff]  ;;  %v955_v28 = vld [vmem:[%s6544_s3 + $0x8] sm:$0xff] }
 0x253   : > { %v4937_v17 = vpop.permute.xlu0 %1386  ;;  %v4940_v54 = vpop.permute.xlu1 %1384  ;;  %6730 = vst [vmem:[#allocation40_spill] sm:$0xff] %v4993_v23  ;;  %6731 = vst [vmem:[#allocation41_spill] sm:$0xff] %v4996_v37  ;;  %v950_v37 = vsel %vm949_vm10, %v4729_v57, %v4735_v47  ;;  %v1026_v23 = vsel %vm474_vm7, %v4765_v63, %v4771_v36 }
 0x254   : > { %6725 = vst [vmem:[#allocation35_spill] sm:$0xff] %v4937_v17  ;;  %6726 = vst [vmem:[#allocation36_spill] sm:$0xff] %v4940_v54  ;;  %v3180_v54 = vld [vmem:[%s6544_s3 + $0x300] sm:$0xff]  ;;  %v956_v17 = vld [vmem:[%s6544_s3 + $0x10] sm:$0xff] }
 0x255   : > { %1785 = vrot.lane.b32.xlu0 %v4653_v6, %s3519_s21  ;;  %1783 = vrot.lane.b32.xlu1 %v4655_v29, %s3519_s21  ;;  %v960_v20 = vmul.f32 %v956_v17, %v951_v56  ;;  %v3092_v56 = vld [vmem:[%s6544_s3 + $0x40] sm:$0xff]  ;;  %v3093_v17 = vld [vmem:[%s6544_s3 + $0x48] sm:$0xff] }
 0x257   : > { %v4971_v39 = vpop.permute.xlu0 %1408  ;;  %v4990_v48 = vpop.permute.xlu1 %1406 }
 0x258   : > { %6727 = vst [vmem:[#allocation37_spill] sm:$0xff] %v4971_v39  ;;  %6729 = vst [vmem:[#allocation39_spill] sm:$0xff] %v4990_v48  ;;  %v5003_v39 = vmul.f32 %v3180_v54, %v4655_v29  ;;  %v952_v54 = vsel %vm949_vm10, %v4735_v47, %v4729_v57  ;;  %v1003_v57 = vsel %vm1000_vm11, %v4747_v49, %v4741_v62  ;;  %v3098_v47 = vld [vmem:[%s6544_s3 + $0x70] sm:$0xff]  ;;  %vm1362_vm10 = vcmp.lt.s32.totalorder %v3844_v61, 51 }
 0x259   : > { %1789 = vrot.lane.b32.xlu0 %v4659_v44, %s3519_s21  ;;  %1787 = vrot.lane.b32.xlu1 %v4661_v12, %s3519_s21  ;;  %v1028_v48 = vsel %vm474_vm7, %v4771_v36, %v4765_v63  ;;  %v978_v63 = vsel %vm974_vm12, %v4757_v0, %v4751_v43  ;;  %v977_v43 = vsel %vm974_vm12, %v4759_v50, %v4753_v32 }
 0x25a   : > { %6732 = vst [vmem:[#allocation42_spill] sm:$0xff] %v5003_v39  ;;  %v1001_v39 = vsel %vm1000_vm11, %v4741_v62, %v4747_v49  ;;  %v1029_v62 = vsel %vm474_vm7, %v4769_v15, %v4763_v3  ;;  %v3096_v49 = vld [vmem:[%s6544_s3 + $0x60] sm:$0xff]  ;;  %v958_v15 = vmul.f32 %v954_v45, %v950_v37  ;;  %v1011_v37 = vmul.f32 %v3093_v17, %v1003_v57 }
 0x25b   : > { %v5038_v53 = vpop.permute.xlu0 %1412  ;;  %v5066_v3 = vpop.permute.xlu1 %1410  ;;  %v1010_v36 = vmul.f32 %v3092_v56, %v1001_v39  ;;  %v3088_v45 = vld [vmem:[%s6544_s3 + $0x20] sm:$0xff]  ;;  %v1037_v0 = vmul.f32 %v3098_v47, %v1027_v46  ;;  %v1038_v39 = vmul.f32 %v3099_v2, %v1029_v62  ;;  %v1035_v56 = vmul.f32 %v3096_v49, %v1026_v23  ;;  %v3106_v62 = vld [vmem:[%s6544_s3 + $0xb0] sm:$0xff] }
 0x25c   : > { %6733 = vst [vmem:[#allocation43_spill] sm:$0xff] %v5038_v53  ;;  %6734 = vst [vmem:[#allocation44_spill] sm:$0xff] %v5066_v3  ;;  %v959_v53 = vmul.f32 %v955_v28, %v952_v54  ;;  %v3089_v28 = vld [vmem:[%s6544_s3 + $0x28] sm:$0xff]  ;;  %v975_v54 = vsel %vm974_vm12, %v4753_v32, %v4759_v50  ;;  %v1036_v17 = vmul.f32 %v3097_v13, %v1028_v48  ;;  %v3102_v32 = vld [vmem:[%s6544_s3 + $0x90] sm:$0xff]  ;;  %vm1155_vm7 = vcmp.lt.s32.totalorder %v3844_v61, 102 }
 0x25d   : > { %1811 = vrot.lane.b32.xlu0 %v4653_v6, %s3520_s20  ;;  %1809 = vrot.lane.b32.xlu1 %v4655_v29, %s3520_s20  ;;  %v5102_v3 = vadd.f32 %v1012_v10, %v960_v20  ;;  %v987_v34 = vmul.f32 %v3091_v1, %v978_v63  ;;  %v984_v27 = vmul.f32 %v3088_v45, %v975_v54  ;;  %v3103_v50 = vld [vmem:[%s6544_s3 + $0x98] sm:$0xff]  ;;  %v3100_v23 = vld [vmem:[%s6544_s3 + $0x80] sm:$0xff]  ;;  %vm1388_vm11 = vcmp.lt.s32.totalorder %v3844_v61, 48 }
 0x25e   : > { %v985_v18 = vmul.f32 %v3089_v28, %v977_v43  ;;  %v1053_v48 = vsel %vm1051_vm13, %v4775_v14, %v4781_v5  ;;  %v5124_v59 = vadd.f32 %v1010_v36, %v958_v15  ;;  %v5126_v1 = vadd.f32 %v1011_v37, %v959_v53  ;;  %v3101_v20 = vld [vmem:[%s6544_s3 + $0x88] sm:$0xff]  ;;  %v3104_v49 = vld [vmem:[%s6544_s3 + $0xa0] sm:$0xff]  ;;  %v3111_v63 = vld [vmem:[%s6544_s3 + $0xd8] sm:$0xff] }
 0x25f   : > { %v5100_v57 = vpop.permute.xlu0 %1434  ;;  %v5106_v30 = vpop.permute.xlu1 %1432  ;;  %v1052_v14 = vsel %vm1051_vm13, %v4777_v21, %v4783_v55  ;;  %v1054_v5 = vsel %vm1051_vm13, %v4783_v55, %v4777_v21  ;;  %v1041_v52 = vadd.f32 %v1037_v0, %v986_v40  ;;  %v1042_v10 = vadd.f32 %v1038_v39, %v987_v34  ;;  %v3107_v21 = vld [vmem:[%s6544_s3 + $0xb8] sm:$0xff]  ;;  %v3105_v13 = vld [vmem:[%s6544_s3 + $0xa8] sm:$0xff]  ;;  %v3114_v54 = vld [vmem:[%s6544_s3 + $0xf0] sm:$0xff] }
 0x260   : > { %v1039_v26 = vadd.f32 %v1035_v56, %v984_v27  ;;  %v1040_v47 = vadd.f32 %v1036_v17, %v985_v18  ;;  %v1063_v2 = vmul.f32 %v3102_v32, %v1053_v48  ;;  %v1064_v46 = vmul.f32 %v3103_v50, %v1055_v51  ;;  %v3109_v37 = vld [vmem:[%s6544_s3 + $0xc8] sm:$0xff]  ;;  %v3115_v43 = vld [vmem:[%s6544_s3 + $0xf8] sm:$0xff]  ;;  %v3112_v17 = vld [vmem:[%s6544_s3 + $0xe0] sm:$0xff] }
 0x261   : > { %1815 = vrot.lane.b32.xlu0 %v4659_v44, %s3520_s20  ;;  %1813 = vrot.lane.b32.xlu1 %v4661_v12, %s3520_s20  ;;  %v1079_v55 = vsel %vm1077_vm14, %v4787_v33, %v4793_v22  ;;  %v1081_v18 = vsel %vm1077_vm14, %v4793_v22, %v4787_v33  ;;  %v1061_v40 = vmul.f32 %v3100_v23, %v1052_v14  ;;  %v3110_v22 = vld [vmem:[%s6544_s3 + $0xd0] sm:$0xff]  ;;  %v3113_v32 = vld [vmem:[%s6544_s3 + $0xe8] sm:$0xff]  ;;  %vm1414_vm12 = vcmp.lt.s32.totalorder %v3844_v61, 45 }
 0x262   : > { %v1062_v34 = vmul.f32 %v3101_v20, %v1054_v5  ;;  %v1078_v15 = vsel %vm1077_vm14, %v4789_v42, %v4795_v35  ;;  %v1080_v33 = vsel %vm1077_vm14, %v4795_v35, %v4789_v42  ;;  %v1105_v36 = vsel %vm1103_vm15, %v4799_v19, %v4805_v24  ;;  %v3108_v35 = vld [vmem:[%s6544_s3 + $0xc0] sm:$0xff] }
 0x263   : > { %v5145_v53 = vpop.permute.xlu0 %1438  ;;  %v5161_v27 = vpop.permute.xlu1 %1436  ;;  %v1107_v42 = vsel %vm1103_vm15, %v4805_v24, %v4799_v19  ;;  %v1104_v45 = vsel %vm1103_vm15, %v4801_v60, %v4807_v11  ;;  %v1106_v28 = vsel %vm1103_vm15, %v4807_v11, %v4801_v60  ;;  %v1089_v19 = vmul.f32 %v3106_v62, %v1079_v55 }
 0x264   : > { %v1090_v24 = vmul.f32 %v3107_v21, %v1081_v18  ;;  %v1131_v0 = vsel %vm1129_vm2, %v4811_v4, %v4817_v16  ;;  %v1133_v60 = vsel %vm1129_vm2, %v4817_v16, %v4811_v4  ;;  %v1087_v39 = vmul.f32 %v3104_v49, %v1078_v15 }
 0x265   : > { %1837 = vrot.lane.b32.xlu0 %v4653_v6, %s3521_s30  ;;  %1835 = vrot.lane.b32.xlu1 %v4655_v29, %s3521_s30  ;;  %v1088_v56 = vmul.f32 %v3105_v13, %v1080_v33  ;;  %v1130_v50 = vsel %vm1129_vm2, %v4813_v8, %v4819_v58  ;;  %v1132_v4 = vsel %vm1129_vm2, %v4819_v58, %v4813_v8  ;;  %vm1440_vm13 = vcmp.lt.s32.totalorder %v3844_v61, 42 }
 0x266   : > { %v1115_v48 = vmul.f32 %v3110_v22, %v1105_v36  ;;  %v1116_v51 = vmul.f32 %v3111_v63, %v1107_v42  ;;  %v1113_v23 = vmul.f32 %v3108_v35, %v1104_v45  ;;  %v1114_v20 = vmul.f32 %v3109_v37, %v1106_v28  ;;  %v3116_v36 = vld [vmem:[%s6544_s3 + $0x100] sm:$0xff]  ;;  %v3117_v42 = vld [vmem:[%s6544_s3 + $0x108] sm:$0xff]  ;;  %v3122_v35 = vld [vmem:[%s6544_s3 + $0x130] sm:$0xff] }
 0x267   : > { %v5224_v11 = vpop.permute.xlu0 %1460  ;;  %v5240_v16 = vpop.permute.xlu1 %1458  ;;  %v1067_v14 = vadd.f32 %v1063_v2, %v5102_v3  ;;  %v1068_v5 = vadd.f32 %v1064_v46, %v5104_v38  ;;  %v1141_v62 = vmul.f32 %v3114_v54, %v1133_v60  ;;  %v1142_v21 = vmul.f32 %v3115_v43, %v1131_v0  ;;  %v3123_v45 = vld [vmem:[%s6544_s3 + $0x138] sm:$0xff]  ;;  %v6735_v28 = vld [vmem:[#allocation2_spill] sm:$0xff]  ;;  %v6736_v54 = vld [vmem:[#allocation3_spill] sm:$0xff] }
 0x268   : > { %v1065_v8 = vadd.f32 %v1061_v40, %v5124_v59  ;;  %v1066_v58 = vadd.f32 %v1062_v34, %v5126_v1  ;;  %v1139_v55 = vmul.f32 %v3112_v17, %v1132_v4  ;;  %v1140_v18 = vmul.f32 %v3113_v32, %v1130_v50  ;;  %v6737_v43 = vld [vmem:[#allocation4_spill] sm:$0xff]  ;;  %v3127_v32 = vld [vmem:[%s6544_s3 + $0x158] sm:$0xff] }
 0x269   : > { %1841 = vrot.lane.b32.xlu0 %v4659_v44, %s3521_s30  ;;  %1839 = vrot.lane.b32.xlu1 %v4661_v12, %s3521_s30  ;;  %v1093_v13 = vadd.f32 %v1089_v19, %v1041_v52  ;;  %v1094_v15 = vadd.f32 %v1090_v24, %v1042_v10  ;;  %v1091_v33 = vadd.f32 %v1087_v39, %v1039_v26  ;;  %v3118_v52 = vld [vmem:[%s6544_s3 + $0x110] sm:$0xff]  ;;  %v3119_v10 = vld [vmem:[%s6544_s3 + $0x118] sm:$0xff]  ;;  %vm1466_vm14 = vcmp.lt.s32.totalorder %v3844_v61, 39 }
 0x26a   : > { %v1092_v22 = vadd.f32 %v1088_v56, %v1040_v47  ;;  %v5255_v38 = vadd.f32 %v1115_v48, %v1067_v14  ;;  %v5257_v2 = vadd.f32 %v1116_v51, %v1068_v5  ;;  %v5259_v46 = vadd.f32 %v1113_v23, %v1065_v8  ;;  %v3121_v24 = vld [vmem:[%s6544_s3 + $0x128] sm:$0xff]  ;;  %v3126_v17 = vld [vmem:[%s6544_s3 + $0x150] sm:$0xff]  ;;  %v6740_v4 = vld [vmem:[#allocation5_spill] sm:$0xff] }
 0x26b   : > { %v5251_v49 = vpop.permute.xlu0 %1464  ;;  %v5253_v3 = vpop.permute.xlu1 %1462  ;;  %v5261_v63 = vadd.f32 %v1114_v20, %v1066_v58  ;;  %v5265_v59 = vadd.f32 %v1141_v62, %v1093_v13  ;;  %v5267_v1 = vadd.f32 %v1142_v21, %v1094_v15  ;;  %v1157_v26 = vsel %vm1155_vm7, %v4823_v9, %v4829_v31  ;;  %v6739_v50 = vld [vmem:[#allocation8_spill] sm:$0xff]  ;;  %v3124_v14 = vld [vmem:[%s6544_s3 + $0x140] sm:$0xff]  ;;  %v3125_v5 = vld [vmem:[%s6544_s3 + $0x148] sm:$0xff] }
 0x26c   : > { %v1159_v47 = vsel %vm1155_vm7, %v4829_v31, %v4823_v9  ;;  %v5285_v40 = vadd.f32 %v1139_v55, %v1091_v33  ;;  %v5287_v34 = vadd.f32 %v1140_v18, %v1092_v22  ;;  %v1156_v9 = vsel %vm1155_vm7, %v4825_v41, %v4831_v25  ;;  %v6741_v62 = vld [vmem:[#allocation7_spill] sm:$0xff]  ;;  %v6742_v21 = vld [vmem:[#allocation6_spill] sm:$0xff] }
 0x26d   : > { %1863 = vrot.lane.b32.xlu0 %v4653_v6, %s3522_s27  ;;  %1861 = vrot.lane.b32.xlu1 %v4655_v29, %s3522_s27  ;;  %v1158_v31 = vsel %vm1155_vm7, %v4831_v25, %v4825_v41  ;;  %v1183_v19 = vsel %vm1181_vm3, %v6735_v28, %v4841_v7  ;;  %v1185_v41 = vsel %vm1181_vm3, %v4841_v7, %v6735_v28  ;;  %v3120_v25 = vld [vmem:[%s6544_s3 + $0x120] sm:$0xff]  ;;  %vm1518_vm15 = vcmp.lt.s32.totalorder %v3844_v61, 6 }
 0x26e   : > { %v1182_v0 = vsel %vm1181_vm3, %v6737_v43, %v6736_v54  ;;  %v1184_v60 = vsel %vm1181_vm3, %v6736_v54, %v6737_v43  ;;  %v1167_v39 = vmul.f32 %v3118_v52, %v1159_v47  ;;  %v1168_v56 = vmul.f32 %v3119_v10, %v1157_v26  ;;  %v3130_v10 = vld [vmem:[%s6544_s3 + $0x170] sm:$0xff]  ;;  %v3131_v26 = vld [vmem:[%s6544_s3 + $0x178] sm:$0xff]  ;;  %v6743_v47 = vld [vmem:[#allocation10_spill] sm:$0xff] }
 0x26f   : > { %v5307_v37 = vpop.permute.xlu0 %1486  ;;  %v5335_v7 = vpop.permute.xlu1 %1484  ;;  %v1208_v48 = vsel %vm851_vm5, %v6740_v4, %v6739_v50  ;;  %v1210_v51 = vsel %vm851_vm5, %v6739_v50, %v6740_v4  ;;  %v1165_v23 = vmul.f32 %v3116_v36, %v1158_v31  ;;  %v1166_v20 = vmul.f32 %v3117_v42, %v1156_v9  ;;  %v6744_v36 = vld [vmem:[#allocation9_spill] sm:$0xff]  ;;  %v3128_v28 = vld [vmem:[%s6544_s3 + $0x160] sm:$0xff] }
 0x270   : > { %6738 = vst [vmem:[#allocation2_spill] sm:$0xff] %v5335_v7  ;;  %v1207_v8 = vsel %vm851_vm5, %v6742_v21, %v6741_v62  ;;  %v1209_v58 = vsel %vm851_vm5, %v6741_v62, %v6742_v21  ;;  %v1193_v55 = vmul.f32 %v3122_v35, %v1185_v41  ;;  %v1194_v18 = vmul.f32 %v3123_v45, %v1183_v19  ;;  %v3129_v19 = vld [vmem:[%s6544_s3 + $0x168] sm:$0xff]  ;;  %v6745_v41 = vld [vmem:[#allocation30_spill] sm:$0xff] }
 0x271   : > { %1867 = vrot.lane.b32.xlu0 %v4659_v44, %s3522_s27  ;;  %1865 = vrot.lane.b32.xlu1 %v4661_v12, %s3522_s27  ;;  %v1191_v13 = vmul.f32 %v3120_v25, %v1184_v60  ;;  %v1192_v15 = vmul.f32 %v3121_v24, %v1182_v0  ;;  %v1218_v22 = vmul.f32 %v3126_v17, %v1210_v51  ;;  %v6746_v25 = vld [vmem:[#allocation12_spill] sm:$0xff]  ;;  %vm1336_vm5 = vcmp.lt.s32.totalorder %v3844_v61, 54  ;;  %v3132_v21 = vld [vmem:[%s6544_s3 + $0x180] sm:$0xff] }
 0x272   : > { %v1219_v52 = vmul.f32 %v3127_v32, %v1208_v48  ;;  %v1234_v42 = vsel %vm1232_vm4, %v6744_v36, %v6743_v47  ;;  %v1236_v9 = vsel %vm1232_vm4, %v6743_v47, %v6744_v36  ;;  %v1216_v35 = vmul.f32 %v3124_v14, %v1209_v58  ;;  %v6749_v58 = vld [vmem:[#allocation13_spill] sm:$0xff]  ;;  %v6752_v47 = vld [vmem:[#allocation11_spill] sm:$0xff] }
 0x273   : > { %v5370_v33 = vpop.permute.xlu0 %1490  ;;  %v5386_v31 = vpop.permute.xlu1 %1488  ;;  %v1217_v45 = vmul.f32 %v3125_v5, %v1207_v8  ;;  %v1233_v24 = vsel %vm1232_vm4, %v6746_v25, %v6745_v41  ;;  %v1235_v54 = vsel %vm1232_vm4, %v6745_v41, %v6746_v25  ;;  %v1171_v43 = vadd.f32 %v1167_v39, %v5255_v38  ;;  %v3133_v8 = vld [vmem:[%s6544_s3 + $0x188] sm:$0xff]  ;;  %v6753_v41 = vld [vmem:[#allocation17_spill] sm:$0xff]  ;;  %v6754_v25 = vld [vmem:[#allocation16_spill] sm:$0xff] }
 0x274   : > { %v1172_v0 = vadd.f32 %v1168_v56, %v5257_v2  ;;  %v1169_v60 = vadd.f32 %v1165_v23, %v5259_v46  ;;  %v1170_v17 = vadd.f32 %v1166_v20, %v5261_v63  ;;  %v1197_v32 = vadd.f32 %v1193_v55, %v5265_v59  ;;  %v3134_v59 = vld [vmem:[%s6544_s3 + $0x190] sm:$0xff] }
 0x275   : > { %1889 = vrot.lane.b32.xlu0 %v4653_v6, %s3523_s8  ;;  %1887 = vrot.lane.b32.xlu1 %v4655_v29, %s3523_s8  ;;  %v1198_v50 = vadd.f32 %v1194_v18, %v5267_v1  ;;  %v1244_v4 = vmul.f32 %v3130_v10, %v1236_v9  ;;  %v1245_v48 = vmul.f32 %v3131_v26, %v1234_v42  ;;  %v3135_v1 = vld [vmem:[%s6544_s3 + $0x198] sm:$0xff]  ;;  %v6750_v55 = vld [vmem:[#allocation32_spill] sm:$0xff]  ;;  %v6751_v26 = vld [vmem:[#allocation14_spill] sm:$0xff]  ;;  %vm1609_vm2 = vcmp.lt.s32.totalorder %v3844_v61, 122 }
 0x276   : > { %v1195_v14 = vadd.f32 %v1191_v13, %v5285_v40  ;;  %v1196_v38 = vadd.f32 %v1192_v15, %v5287_v34  ;;  %v1242_v2 = vmul.f32 %v3128_v28, %v1235_v54  ;;  %v1243_v39 = vmul.f32 %v3129_v19, %v1233_v24  ;;  %v6747_v40 = vld [vmem:[#allocation33_spill] sm:$0xff]  ;;  %v6748_v34 = vld [vmem:[#allocation31_spill] sm:$0xff]  ;;  %v3136_v28 = vld [vmem:[%s6544_s3 + $0x1a0] sm:$0xff] }
 0x277   : > { %v5413_v51 = vpop.permute.xlu0 %1512  ;;  %v5417_v46 = vpop.permute.xlu1 %1510  ;;  %v1222_v63 = vadd.f32 %v1218_v22, %v1171_v43  ;;  %v1223_v56 = vadd.f32 %v1219_v52, %v1172_v0  ;;  %v5419_v23 = vadd.f32 %v1216_v35, %v1169_v60  ;;  %v5421_v20 = vadd.f32 %v1217_v45, %v1170_v17  ;;  %v3138_v52 = vld [vmem:[%s6544_s3 + $0x1b0] sm:$0xff]  ;;  %v3139_v10 = vld [vmem:[%s6544_s3 + $0x1b8] sm:$0xff]  ;;  %v3137_v19 = vld [vmem:[%s6544_s3 + $0x1a8] sm:$0xff] }
 0x278   : > { %v1260_v5 = vsel %vm1258_vm6, %v6748_v34, %v6747_v40  ;;  %v1262_v62 = vsel %vm1258_vm6, %v6747_v40, %v6748_v34  ;;  %v1259_v18 = vsel %vm1258_vm6, %v6750_v55, %v6749_v58  ;;  %v1261_v13 = vsel %vm1258_vm6, %v6749_v58, %v6750_v55  ;;  %v3140_v34 = vld [vmem:[%s6544_s3 + $0x1c0] sm:$0xff]  ;;  %v3146_v55 = vld [vmem:[%s6544_s3 + $0x1f0] sm:$0xff] }
 0x279   : > { %1893 = vrot.lane.b32.xlu0 %v4659_v44, %s3523_s8  ;;  %1891 = vrot.lane.b32.xlu1 %v4661_v12, %s3523_s8  ;;  %v1248_v15 = vadd.f32 %v1244_v4, %v1197_v32  ;;  %v1249_v22 = vadd.f32 %v1245_v48, %v1198_v50  ;;  %v1286_v36 = vsel %vm1284_vm8, %v6752_v47, %v6751_v26  ;;  %v3142_v48 = vld [vmem:[%s6544_s3 + $0x1d0] sm:$0xff]  ;;  %s3524_s8 = smov 29   ;;  %vm1492_vm7 = vcmp.lt.s32.totalorder %v3844_v61, 9 }
 0x27a   : > { %v1288_v42 = vsel %vm1284_vm8, %v6751_v26, %v6752_v47  ;;  %v1246_v35 = vadd.f32 %v1242_v2, %v1195_v14  ;;  %v1247_v45 = vadd.f32 %v1243_v39, %v1196_v38  ;;  %v1285_v24 = vsel %vm1284_vm8, %v6754_v25, %v6753_v41  ;;  %v3143_v14 = vld [vmem:[%s6544_s3 + $0x1d8] sm:$0xff]  ;;  %v6755_v38 = vld [vmem:[#allocation18_spill] sm:$0xff]  ;;  %v6756_v2 = vld [vmem:[#allocation15_spill] sm:$0xff] }
 0x27b   : > { %v5470_v9 = vpop.permute.xlu0 %1516  ;;  %v1287_v54 = vsel %vm1284_vm8, %v6753_v41, %v6754_v25  ;;  %v5486_v43 = vpop.permute.xlu1 %1514  ;;  %v1270_v0 = vmul.f32 %v3134_v59, %v1262_v62  ;;  %v1271_v60 = vmul.f32 %v3135_v1, %v1260_v5  ;;  %v1268_v17 = vmul.f32 %v3132_v21, %v1261_v13  ;;  %v3141_v5 = vld [vmem:[%s6544_s3 + $0x1c8] sm:$0xff]  ;;  %v6757_v62 = vld [vmem:[#allocation21_spill] sm:$0xff]  ;;  %v6758_v21 = vld [vmem:[#allocation20_spill] sm:$0xff] }
 0x27c   : > { %v1269_v32 = vmul.f32 %v3133_v8, %v1259_v18  ;;  %v1296_v50 = vmul.f32 %v3138_v52, %v1288_v42  ;;  %v1297_v4 = vmul.f32 %v3139_v10, %v1286_v36  ;;  %v1312_v39 = vsel %vm1310_vm9, %v6756_v2, %v6755_v38  ;;  %v3147_v13 = vld [vmem:[%s6544_s3 + $0x1f8] sm:$0xff]  ;;  %v6760_v52 = vld [vmem:[#allocation22_spill] sm:$0xff]  ;;  %v6761_v10 = vld [vmem:[#allocation19_spill] sm:$0xff] }
 0x27d   : > { %1915 = vrot.lane.b32.xlu0 %v4653_v6, %s3466_s9  ;;  %v1314_v59 = vsel %vm1310_vm9, %v6755_v38, %v6756_v2  ;;  %1913 = vrot.lane.b32.xlu1 %v4655_v29, %s3466_s9  ;;  %v1294_v1 = vmul.f32 %v3136_v28, %v1287_v54  ;;  %v1295_v40 = vmul.f32 %v3137_v19, %v1285_v24  ;;  %v3144_v36 = vld [vmem:[%s6544_s3 + $0x1e0] sm:$0xff]  ;;  %v3145_v42 = vld [vmem:[%s6544_s3 + $0x1e8] sm:$0xff]  ;;  %v6762_v28 = vld [vmem:[#allocation25_spill] sm:$0xff]  ;;  %vm1544_vm3 = vcmp.lt.s32.totalorder %v3844_v61, 3 }
 0x27e   : > { %v1311_v8 = vsel %vm1310_vm9, %v6758_v21, %v6757_v62  ;;  %v1313_v58 = vsel %vm1310_vm9, %v6757_v62, %v6758_v21  ;;  %v1338_v26 = vsel %vm1336_vm5, %v6761_v10, %v6760_v52  ;;  %v1340_v47 = vsel %vm1336_vm5, %v6760_v52, %v6761_v10  ;;  %v6763_v19 = vld [vmem:[#allocation24_spill] sm:$0xff] }
 0x27f   : > { %v5525_v18 = vpop.permute.xlu0 %1538  ;;  %v1337_v41 = vsel %vm1336_vm5, %v6763_v19, %v6762_v28  ;;  %v1339_v25 = vsel %vm1336_vm5, %v6762_v28, %v6763_v19  ;;  %v5553_v24 = vpop.permute.xlu1 %1536  ;;  %v1274_v54 = vadd.f32 %v1270_v0, %v1222_v63  ;;  %v1275_v38 = vadd.f32 %v1271_v60, %v1223_v56 }
 0x280   : > { %6759 = vst [vmem:[#allocation3_spill] sm:$0xff] %v5525_v18  ;;  %6764 = vst [vmem:[#allocation4_spill] sm:$0xff] %v5553_v24  ;;  %v1322_v2 = vmul.f32 %v3142_v48, %v1314_v59  ;;  %v1323_v62 = vmul.f32 %v3143_v14, %v1312_v39  ;;  %v1272_v21 = vadd.f32 %v1268_v17, %v5419_v23  ;;  %v6766_v39 = vld [vmem:[#allocation26_spill] sm:$0xff]  ;;  %v6767_v59 = vld [vmem:[#allocation23_spill] sm:$0xff]  ;;  %vm1635_vm4 = vcmp.lt.s32.totalorder %v3844_v61, 119 }
 0x281   : > { %1919 = vrot.lane.b32.xlu0 %v4659_v44, %s3466_s9  ;;  %v1273_v52 = vadd.f32 %v1269_v32, %v5421_v20  ;;  %v1320_v10 = vmul.f32 %v3140_v34, %v1313_v58  ;;  %v1321_v18 = vmul.f32 %v3141_v5, %v1311_v8  ;;  %1917 = vrot.lane.b32.xlu1 %v4661_v12, %s3466_s9  ;;  %v3150_v20 = vld [vmem:[%s6544_s3 + $0x210] sm:$0xff]  ;;  %v3151_v32 = vld [vmem:[%s6544_s3 + $0x218] sm:$0xff]  ;;  %vm1583_vm6 = vcmp.lt.s32.totalorder %v3844_v61, 125 }
 0x282   : > { %v1348_v28 = vmul.f32 %v3146_v55, %v1340_v47  ;;  %v1349_v19 = vmul.f32 %v3147_v13, %v1338_v26  ;;  %v1346_v7 = vmul.f32 %v3144_v36, %v1339_v25  ;;  %v1347_v24 = vmul.f32 %v3145_v42, %v1337_v41  ;;  %v3154_v36 = vld [vmem:[%s6544_s3 + $0x230] sm:$0xff]  ;;  %v3155_v42 = vld [vmem:[%s6544_s3 + $0x238] sm:$0xff]  ;;  %v6771_v41 = vld [vmem:[#allocation35_spill] sm:$0xff] }
 0x283   : > { %v5561_v63 = vpop.permute.xlu0 %1542  ;;  %v1300_v56 = vadd.f32 %v1296_v50, %v1248_v15  ;;  %v1301_v0 = vadd.f32 %v1297_v4, %v1249_v22  ;;  %v1298_v60 = vadd.f32 %v1294_v1, %v1246_v35  ;;  %v1299_v48 = vadd.f32 %v1295_v40, %v1247_v45  ;;  %v5563_v14 = vpop.permute.xlu1 %1540  ;;  %v3148_v50 = vld [vmem:[%s6544_s3 + $0x200] sm:$0xff]  ;;  %v3149_v4 = vld [vmem:[%s6544_s3 + $0x208] sm:$0xff]  ;;  %v6768_v1 = vld [vmem:[#allocation29_spill] sm:$0xff] }
 0x284   : > { %6765 = vst [vmem:[#allocation8_spill] sm:$0xff] %v5563_v14  ;;  %v1326_v23 = vadd.f32 %v1322_v2, %v1274_v54  ;;  %v1327_v17 = vadd.f32 %v1323_v62, %v1275_v38  ;;  %v1364_v15 = vsel %vm1362_vm10, %v6767_v59, %v6766_v39  ;;  %v1366_v22 = vsel %vm1362_vm10, %v6766_v39, %v6767_v59  ;;  %v6769_v40 = vld [vmem:[#allocation28_spill] sm:$0xff]  ;;  %v6772_v25 = vld [vmem:[#allocation27_spill] sm:$0xff]  ;;  %v3152_v62 = vld [vmem:[%s6544_s3 + $0x220] sm:$0xff] }
 0x285   : > { %1940 = vrot.lane.b32.xlu0 %v4653_v6, %s3524_s8  ;;  %v1324_v35 = vadd.f32 %v1320_v10, %v1272_v21  ;;  %v1325_v45 = vadd.f32 %v1321_v18, %v1273_v52  ;;  %v1363_v34 = vsel %vm1362_vm10, %v6769_v40, %v6768_v1  ;;  %v1365_v5 = vsel %vm1362_vm10, %v6768_v1, %v6769_v40  ;;  %v3153_v21 = vld [vmem:[%s6544_s3 + $0x228] sm:$0xff]  ;;  %v6774_v52 = vld [vmem:[#allocation36_spill] sm:$0xff]  ;;  %v6775_v10 = vld [vmem:[#allocation34_spill] sm:$0xff] }
 0x286   : > { %1938 = vrot.lane.b32.xlu1 %v4655_v29, %s3524_s8  ;;  %v1352_v8 = vadd.f32 %v1348_v28, %v1300_v56  ;;  %v1353_v58 = vadd.f32 %v1349_v19, %v1301_v0  ;;  %v1350_v55 = vadd.f32 %v1346_v7, %v1298_v60  ;;  %v1351_v18 = vadd.f32 %v1347_v24, %v1299_v48  ;;  %v3158_v56 = vld [vmem:[%s6544_s3 + $0x250] sm:$0xff]  ;;  %v3159_v0 = vld [vmem:[%s6544_s3 + $0x258] sm:$0xff]  ;;  %v6776_v60 = vld [vmem:[#allocation43_spill] sm:$0xff] }
 0x287   : > { %v5598_v13 = vpop.permute.xlu0 %1577  ;;  %v1374_v26 = vmul.f32 %v3150_v20, %v1366_v22  ;;  %v1375_v47 = vmul.f32 %v3151_v32, %v1364_v15  ;;  %v1390_v54 = vsel %vm1388_vm11, %v6772_v25, %v6771_v41  ;;  %v1392_v7 = vsel %vm1388_vm11, %v6771_v41, %v6772_v25  ;;  %v5614_v24 = vpop.permute.xlu1 %1575  ;;  %v6777_v48 = vld [vmem:[#allocation37_spill] sm:$0xff]  ;;  %v3156_v39 = vld [vmem:[%s6544_s3 + $0x240] sm:$0xff]  ;;  %v3157_v59 = vld [vmem:[%s6544_s3 + $0x248] sm:$0xff] }
 0x288   : > { %6770 = vst [vmem:[#allocation5_spill] sm:$0xff] %v5598_v13  ;;  %6773 = vst [vmem:[#allocation7_spill] sm:$0xff] %v5614_v24  ;;  %v1372_v38 = vmul.f32 %v3148_v50, %v1365_v5  ;;  %v1373_v2 = vmul.f32 %v3149_v4, %v1363_v34  ;;  %v1389_v28 = vsel %vm1388_vm11, %v6775_v10, %v6774_v52  ;;  %v6778_v15 = vld [vmem:[#allocation44_spill] sm:$0xff]  ;;  %v6779_v22 = vld [vmem:[#allocation39_spill] sm:$0xff]  ;;  %vm1661_vm8 = vcmp.lt.s32.totalorder %v3844_v61, 89 }
 0x289   : > { %v1391_v19 = vsel %vm1388_vm11, %v6774_v52, %v6775_v10  ;;  %1944 = vrot.lane.b32.xlu0 %v4659_v44, %s3524_s8  ;;  %v1416_v20 = vsel %vm1414_vm12, %v6777_v48, %v6776_v60  ;;  %v1418_v32 = vsel %vm1414_vm12, %v6776_v60, %v6777_v48  ;;  %v1415_v50 = vsel %vm1414_vm12, %v6779_v22, %v6778_v15  ;;  %v3162_v34 = vld [vmem:[%s6544_s3 + $0x270] sm:$0xff]  ;;  %v3163_v5 = vld [vmem:[%s6544_s3 + $0x278] sm:$0xff] }
 0x28a   : > { %v1417_v4 = vsel %vm1414_vm12, %v6778_v15, %v6779_v22  ;;  %1942 = vrot.lane.b32.xlu1 %v4661_v12, %s3524_s8  ;;  %v1400_v1 = vmul.f32 %v3154_v36, %v1392_v7  ;;  %v1401_v40 = vmul.f32 %v3155_v42, %v1390_v54  ;;  %v1442_v41 = vsel %vm1440_vm13, %v5100_v57, %v5145_v53  ;;  %s3525_s8 = smov 26  }
 0x28b   : > { %v1444_v25 = vsel %vm1440_vm13, %v5145_v53, %v5100_v57  ;;  %v5679_v36 = vpop.permute.xlu0 %1581  ;;  %v1378_v42 = vadd.f32 %v1374_v26, %v1326_v23  ;;  %v1379_v54 = vadd.f32 %v1375_v47, %v1327_v17  ;;  %v1398_v7 = vmul.f32 %v3152_v62, %v1391_v19  ;;  %v5681_v10 = vpop.permute.xlu1 %1579  ;;  %v3160_v17 = vld [vmem:[%s6544_s3 + $0x260] sm:$0xff]  ;;  %v3161_v26 = vld [vmem:[%s6544_s3 + $0x268] sm:$0xff] }
 0x28c   : > { %v1399_v52 = vmul.f32 %v3153_v21, %v1389_v28  ;;  %v1426_v60 = vmul.f32 %v3158_v56, %v1418_v32  ;;  %v1427_v48 = vmul.f32 %v3159_v0, %v1416_v20  ;;  %v1424_v15 = vmul.f32 %v3156_v39, %v1417_v4 }
 0x28d   : > { %v1425_v22 = vmul.f32 %v3157_v59, %v1415_v50  ;;  %1966 = vrot.lane.b32.xlu0 %v4653_v6, %s3525_s8  ;;  %v1376_v24 = vadd.f32 %v1372_v38, %v1324_v35  ;;  %v1377_v13 = vadd.f32 %v1373_v2, %v1325_v45  ;;  %v1452_v14 = vmul.f32 %v3162_v34, %v1444_v25  ;;  %v3166_v38 = vld [vmem:[%s6544_s3 + $0x290] sm:$0xff]  ;;  %v3167_v2 = vld [vmem:[%s6544_s3 + $0x298] sm:$0xff] }
 0x28e   : > { %v1453_v57 = vmul.f32 %v3163_v5, %v1442_v41  ;;  %1964 = vrot.lane.b32.xlu1 %v4655_v29, %s3525_s8  ;;  %v1404_v53 = vadd.f32 %v1400_v1, %v1352_v8  ;;  %v1405_v23 = vadd.f32 %v1401_v40, %v1353_v58  ;;  %v1441_v35 = vsel %vm1440_vm13, %v5106_v30, %v5161_v27  ;;  %v3174_v59 = vld [vmem:[%s6544_s3 + $0x2d0] sm:$0xff]  ;;  %v3175_v50 = vld [vmem:[%s6544_s3 + $0x2d8] sm:$0xff] }
 0x28f   : > { %v1443_v45 = vsel %vm1440_vm13, %v5161_v27, %v5106_v30  ;;  %v1604_v8 = vpop.permute.xlu0 %1603  ;;  %v1402_v58 = vadd.f32 %v1398_v7, %v1350_v55  ;;  %v1403_v47 = vadd.f32 %v1399_v52, %v1351_v18  ;;  %v1468_v62 = vsel %vm1466_vm14, %v5224_v11, %v5251_v49  ;;  %v1602_v27 = vpop.permute.xlu1 %1601  ;;  %v3170_v34 = vld [vmem:[%s6544_s3 + $0x2b0] sm:$0xff]  ;;  %v3171_v5 = vld [vmem:[%s6544_s3 + $0x2b8] sm:$0xff] }
 0x290   : > { %v1470_v30 = vsel %vm1466_vm14, %v5251_v49, %v5224_v11  ;;  %v1430_v55 = vadd.f32 %v1426_v60, %v1378_v42  ;;  %v1431_v18 = vadd.f32 %v1427_v48, %v1379_v54  ;;  %v1428_v21 = vadd.f32 %v1424_v15, %v1376_v24  ;;  %v3165_v24 = vld [vmem:[%s6544_s3 + $0x288] sm:$0xff]  ;;  %v3168_v60 = vld [vmem:[%s6544_s3 + $0x2a0] sm:$0xff] }
 0x291   : > { %v1429_v28 = vadd.f32 %v1425_v22, %v1377_v13  ;;  %1970 = vrot.lane.b32.xlu0 %v4659_v44, %s3525_s8  ;;  %v5719_v19 = vadd.f32 %v1452_v14, %v1404_v53  ;;  %v5721_v56 = vadd.f32 %v1453_v57, %v1405_v23  ;;  %v1450_v0 = vmul.f32 %v3160_v17, %v1443_v45  ;;  %v3164_v13 = vld [vmem:[%s6544_s3 + $0x280] sm:$0xff]  ;;  %v3169_v48 = vld [vmem:[%s6544_s3 + $0x2a8] sm:$0xff] }
 0x292   : > { %v1451_v20 = vmul.f32 %v3161_v26, %v1441_v35  ;;  %1968 = vrot.lane.b32.xlu1 %v4661_v12, %s3525_s8  ;;  %v1478_v11 = vmul.f32 %v3166_v38, %v1470_v30  ;;  %v1479_v49 = vmul.f32 %v3167_v2, %v1468_v62  ;;  %v1467_v14 = vsel %vm1466_vm14, %v5240_v16, %v5253_v3  ;;  %v6780_v15 = vld [vmem:[#allocation2_spill] sm:$0xff]  ;;  %s3527_s8 = smov 121  }
 0x293   : > { %v1469_v32 = vsel %vm1466_vm14, %v5253_v3, %v5240_v16  ;;  %v1608_v39 = vpop.permute.xlu0 %1607  ;;  %v1520_v4 = vsel %vm1518_vm15, %v5413_v51, %v5470_v9  ;;  %v1522_v1 = vsel %vm1518_vm15, %v5470_v9, %v5413_v51  ;;  %v1606_v40 = vpop.permute.xlu1 %1605  ;;  %v1494_v51 = vsel %vm1492_vm7, %v5307_v37, %v5370_v33 }
 0x294   : > { %v5755_v16 = vsel %vm1609_vm2, %v1604_v8, %v1608_v39  ;;  %v5759_v3 = vsel %vm1609_vm2, %v1608_v39, %v1604_v8  ;;  %v1496_v9 = vsel %vm1492_vm7, %v5370_v33, %v5307_v37  ;;  %v5778_v41 = vsel %vm1609_vm2, %v1602_v27, %v1606_v40  ;;  %v3172_v37 = vld [vmem:[%s6544_s3 + $0x2c0] sm:$0xff]  ;;  %v3173_v33 = vld [vmem:[%s6544_s3 + $0x2c8] sm:$0xff] }
 0x295   : > { %v5782_v25 = vsel %vm1609_vm2, %v1606_v40, %v1602_v27  ;;  %1992 = vrot.lane.b32.xlu0 %v4653_v6, %s3526_s11  ;;  %v1476_v42 = vmul.f32 %v3164_v13, %v1469_v32  ;;  %v1477_v54 = vmul.f32 %v3165_v24, %v1467_v14  ;;  %v1519_v7 = vsel %vm1518_vm15, %v5417_v46, %v5486_v43  ;;  %v3176_v40 = vld [vmem:[%s6544_s3 + $0x2e0] sm:$0xff] }
 0x296   : > { %v1521_v52 = vsel %vm1518_vm15, %v5486_v43, %v5417_v46  ;;  %1990 = vrot.lane.b32.xlu1 %v4655_v29, %s3526_s11  ;;  %v1493_v22 = vsel %vm1492_vm7, %v6780_v15, %v5386_v31  ;;  %v1495_v46 = vsel %vm1492_vm7, %v5386_v31, %v6780_v15  ;;  %v1530_v43 = vmul.f32 %v3174_v59, %v1522_v1  ;;  %v3189_v15 = vld [vmem:[%s6544_s3 + $0x348] sm:$0xff] }
 0x297   : > { %v1531_v57 = vmul.f32 %v3175_v50, %v1520_v4  ;;  %v1630_v53 = vpop.permute.xlu0 %1629  ;;  %v1454_v23 = vadd.f32 %v1450_v0, %v1402_v58  ;;  %v1455_v17 = vadd.f32 %v1451_v20, %v1403_v47  ;;  %v1504_v26 = vmul.f32 %v3170_v34, %v1496_v9  ;;  %v1628_v45 = vpop.permute.xlu1 %1627  ;;  %v6781_v0 = vld [vmem:[#allocation3_spill] sm:$0xff] }
 0x298   : > { %v1505_v35 = vmul.f32 %v3171_v5, %v1494_v51  ;;  %v1482_v8 = vadd.f32 %v1478_v11, %v1430_v55  ;;  %v1483_v38 = vadd.f32 %v1479_v49, %v1431_v18  ;;  %v1528_v2 = vmul.f32 %v3172_v37, %v1521_v52  ;;  %v3178_v55 = vld [vmem:[%s6544_s3 + $0x2f0] sm:$0xff]  ;;  %v3179_v18 = vld [vmem:[%s6544_s3 + $0x2f8] sm:$0xff]  ;;  %v3177_v34 = vld [vmem:[%s6544_s3 + $0x2e8] sm:$0xff] }
 0x299   : > { %v1529_v62 = vmul.f32 %v3173_v33, %v1519_v7  ;;  %1996 = vrot.lane.b32.xlu0 %v4659_v44, %s3526_s11  ;;  %v1480_v30 = vadd.f32 %v1476_v42, %v1428_v21  ;;  %v1481_v27 = vadd.f32 %v1477_v54, %v1429_v28  ;;  %v1502_v31 = vmul.f32 %v3168_v60, %v1495_v46  ;;  %v6782_v5 = vld [vmem:[#allocation8_spill] sm:$0xff]  ;;  %v6784_v33 = vld [vmem:[#allocation38_spill] sm:$0xff] }
 0x29a   : > { %v1503_v13 = vmul.f32 %v3169_v48, %v1493_v22  ;;  %1994 = vrot.lane.b32.xlu1 %v4661_v12, %s3526_s11  ;;  %v1534_v58 = vadd.f32 %v1530_v43, %v1482_v8  ;;  %v1535_v47 = vadd.f32 %v1531_v57, %v1483_v38  ;;  %v1546_v21 = vsel %vm1544_vm3, %v6781_v0, %v5561_v63  ;;  %v6783_v51 = vld [vmem:[#allocation4_spill] sm:$0xff]  ;;  %v3188_v48 = vld [vmem:[%s6544_s3 + $0x340] sm:$0xff]  ;;  %v3187_v43 = vld [vmem:[%s6544_s3 + $0x338] sm:$0xff]  ;;  %s278_s11 = scalar_lea.vmem %s6548_s7, %s3286_s26 }
 0x29b   : > { %v1548_v28 = vsel %vm1544_vm3, %v5561_v63, %v6781_v0  ;;  %v1634_v20 = vpop.permute.xlu0 %1633  ;;  %v1508_v11 = vadd.f32 %v1504_v26, %v5719_v19  ;;  %v1509_v49 = vadd.f32 %v1505_v35, %v5721_v56  ;;  %v1632_v32 = vpop.permute.xlu1 %1631  ;;  %v1532_v39 = vadd.f32 %v1528_v2, %v1480_v30  ;;  %v3190_v63 = vld [vmem:[%s6544_s3 + $0x350] sm:$0xff]  ;;  %v3191_v19 = vld [vmem:[%s6544_s3 + $0x358] sm:$0xff]  ;;  %v3196_v0 = vld [vmem:[%s6544_s3 + $0x380] sm:$0xff] }
 0x29c   : > { %v5839_v24 = vsel %vm1635_vm4, %v1630_v53, %v1634_v20  ;;  %v5843_v14 = vsel %vm1635_vm4, %v1634_v20, %v1630_v53  ;;  %v1533_v59 = vadd.f32 %v1529_v62, %v1481_v27  ;;  %v5853_v56 = vsel %vm1635_vm4, %v1628_v45, %v1632_v32  ;;  %v6785_v52 = vld [vmem:[#allocation40_spill] sm:$0xff]  ;;  %v6786_v57 = vld [vmem:[#allocation5_spill] sm:$0xff]  ;;  %v6788_v62 = vld [vmem:[#allocation42_spill] sm:$0xff] }
 0x29d   : > { %v5857_v50 = vsel %vm1635_vm4, %v1632_v32, %v1628_v45  ;;  %2018 = vrot.lane.b32.xlu0 %v4653_v6, %s3527_s8  ;;  %v1556_v4 = vmul.f32 %v3178_v55, %v1548_v28  ;;  %v1557_v1 = vmul.f32 %v3179_v18, %v1546_v21  ;;  %v1545_v9 = vsel %vm1544_vm3, %v6783_v51, %v6782_v5  ;;  %v3186_v46 = vld [vmem:[%s6544_s3 + $0x330] sm:$0xff]  ;;  %v6787_v38 = vld [vmem:[#allocation41_spill] sm:$0xff]  ;;  %v6789_v55 = vld [vmem:[#allocation7_spill] sm:$0xff] }
 0x29e   : > { %v1547_v42 = vsel %vm1544_vm3, %v6782_v5, %v6783_v51  ;;  %2016 = vrot.lane.b32.xlu1 %v4655_v29, %s3527_s8  ;;  %v5877_v54 = vadd.f32 %v1502_v31, %v1454_v23  ;;  %v5879_v37 = vadd.f32 %v1503_v13, %v1455_v17  ;;  %v1573_v7 = vadd.f32 %v6784_v33, %v1534_v58  ;;  %v3197_v21 = vld [vmem:[%s6544_s3 + $0x388] sm:$0xff]  ;;  %v3184_v28 = vld [vmem:[%s6544_s3 + $0x320] sm:$0xff] }
 0x29f   : > { %v1574_v60 = vadd.f32 %v6785_v52, %v1535_v47  ;;  %v1656_v22 = vpop.permute.xlu0 %1655  ;;  %v1585_v53 = vsel %vm1583_vm6, %v6786_v57, %v5679_v36  ;;  %v1587_v23 = vsel %vm1583_vm6, %v5679_v36, %v6786_v57  ;;  %v1621_v17 = vmul.f32 %v3190_v63, %v5755_v16  ;;  %v1654_v35 = vpop.permute.xlu1 %1653  ;;  %v3198_v16 = vld [vmem:[%s6544_s3 + $0x390] sm:$0xff]  ;;  %v3185_v20 = vld [vmem:[%s6544_s3 + $0x328] sm:$0xff]  ;;  %v3195_v63 = vld [vmem:[%s6544_s3 + $0x378] sm:$0xff] }
 0x2a0   : > { %v1622_v26 = vmul.f32 %v3191_v19, %v5759_v3  ;;  %v1554_v45 = vmul.f32 %v3176_v40, %v1547_v42  ;;  %v1555_v8 = vmul.f32 %v3177_v34, %v1545_v9  ;;  %v1572_v2 = vadd.f32 %v6787_v38, %v1533_v59  ;;  %v3199_v3 = vld [vmem:[%s6544_s3 + $0x398] sm:$0xff]  ;;  %v3194_v59 = vld [vmem:[%s6544_s3 + $0x370] sm:$0xff]  ;;  %v3193_v52 = vld [vmem:[%s6544_s3 + $0x368] sm:$0xff] }
 0x2a1   : > { %v1571_v30 = vadd.f32 %v6788_v62, %v1532_v39  ;;  %2022 = vrot.lane.b32.xlu0 %v4659_v44, %s3527_s8  ;;  %v1560_v27 = vadd.f32 %v1556_v4, %v1508_v11  ;;  %v1561_v31 = vadd.f32 %v1557_v1, %v1509_v49  ;;  %v1619_v13 = vmul.f32 %v3188_v48, %v5778_v41 }
 0x2a2   : > { %v1620_v36 = vmul.f32 %v3189_v15, %v5782_v25  ;;  %2020 = vrot.lane.b32.xlu1 %v4661_v12, %s3527_s8  ;;  %v1595_v58 = vmul.f32 %v3186_v46, %v1585_v53  ;;  %v1596_v47 = vmul.f32 %v3187_v43, %v1587_v23  ;;  %v1584_v41 = vsel %vm1583_vm6, %v6789_v55, %v5681_v10  ;;  %s3532_s8 = smov 103  }
 0x2a3   : > { %v1586_v25 = vsel %vm1583_vm6, %v5681_v10, %v6789_v55  ;;  %v1660_v18 = vpop.permute.xlu0 %1659  ;;  %v1625_v11 = vadd.f32 %v1621_v17, %v1573_v7  ;;  %v1626_v49 = vadd.f32 %v1622_v26, %v1574_v60  ;;  %v1658_v39 = vpop.permute.xlu1 %1657  ;;  %v1623_v34 = vadd.f32 %v1619_v13, %v1571_v30  ;;  %v3192_v7 = vld [vmem:[%s6544_s3 + $0x360] sm:$0xff] }
 0x2a4   : > { %v1663_v10 = vsel %vm1661_vm8, %v1656_v22, %v1660_v18  ;;  %v1665_v32 = vsel %vm1661_vm8, %v1660_v18, %v1656_v22  ;;  %v1662_v1 = vsel %vm1661_vm8, %v1654_v35, %v1658_v39  ;;  %v1664_v40 = vsel %vm1661_vm8, %v1658_v39, %v1654_v35  ;;  %v3205_v39 = vld [vmem:[%s6544_s3 + $0x3c8] sm:$0xff] }
 0x2a5   : > { %v1673_v19 = vmul.f32 %v3198_v16, %v1663_v10  ;;  %v1674_v4 = vmul.f32 %v3199_v3, %v1665_v32  ;;  %2044 = vrot.lane.b32.xlu0 %v4653_v6, %s3528_s18  ;;  %v1624_v5 = vadd.f32 %v1620_v36, %v1572_v2  ;;  %v1671_v51 = vmul.f32 %v3196_v0, %v1662_v1  ;;  %v3200_v2 = vld [vmem:[%s6544_s3 + $0x3a0] sm:$0xff] }
 0x2a6   : > { %v1672_v9 = vmul.f32 %v3197_v21, %v1664_v40  ;;  %2042 = vrot.lane.b32.xlu1 %v4655_v29, %s3528_s18  ;;  %v1593_v42 = vmul.f32 %v3184_v28, %v1584_v41  ;;  %v1594_v33 = vmul.f32 %v3185_v20, %v1586_v25  ;;  %v1647_v22 = vmul.f32 %v3194_v59, %v5839_v24  ;;  %v3204_v32 = vld [vmem:[%s6544_s3 + $0x3c0] sm:$0xff] }
 0x2a7   : > { %v5961_v60 = vadd.f32 %v1673_v19, %v1625_v11  ;;  %v5963_v48 = vadd.f32 %v1674_v4, %v1626_v49  ;;  %v1682_v15 = vpop.permute.xlu0 %1681  ;;  %v1648_v46 = vmul.f32 %v3195_v63, %v5843_v14  ;;  %v5967_v43 = vadd.f32 %v1671_v51, %v1623_v34  ;;  %v1680_v53 = vpop.permute.xlu1 %1679  ;;  %v3202_v14 = vld [vmem:[%s6544_s3 + $0x3b0] sm:$0xff]  ;;  %v3207_v49 = vld [vmem:[%s6544_s3 + $0x3d8] sm:$0xff] }
 0x2a8   : > { %v5969_v57 = vadd.f32 %v1672_v9, %v1624_v5  ;;  %v1558_v23 = vadd.f32 %v1554_v45, %v5877_v54  ;;  %v1559_v17 = vadd.f32 %v1555_v8, %v5879_v37  ;;  %vm1687_vm9 = vcmp.lt.s32.totalorder %v3844_v61, 86  ;;  %v3203_v54 = vld [vmem:[%s6544_s3 + $0x3b8] sm:$0xff]  ;;  %v3206_v11 = vld [vmem:[%s6544_s3 + $0x3d0] sm:$0xff] }
 0x2a9   : > { %2048 = vrot.lane.b32.xlu0 %v4659_v44, %s3528_s18  ;;  %v1599_v26 = vadd.f32 %v1595_v58, %v1560_v27  ;;  %v1600_v35 = vadd.f32 %v1596_v47, %v1561_v31  ;;  %v1645_v38 = vmul.f32 %v3192_v7, %v5853_v56  ;;  %v1646_v24 = vmul.f32 %v3193_v52, %v5857_v50  ;;  %v3201_v56 = vld [vmem:[%s6544_s3 + $0x3a8] sm:$0xff] }
 0x2aa   : > { %2046 = vrot.lane.b32.xlu1 %v4661_v12, %s3528_s18  ;;  %v1597_v37 = vadd.f32 %v1593_v42, %v1558_v23  ;;  %v1598_v45 = vadd.f32 %v1594_v33, %v1559_v17  ;;  %vm1713_vm5 = vcmp.lt.s32.totalorder %v3844_v61, 83  ;;  %vm1739_vm10 = vcmp.lt.s32.totalorder %v3844_v61, 80  ;;  %s3531_s18 = smov 106  }
 0x2ab   : > { %v1686_v8 = vpop.permute.xlu0 %1685  ;;  %v1651_v50 = vadd.f32 %v1647_v22, %v1599_v26  ;;  %v1652_v62 = vadd.f32 %v1648_v46, %v1600_v35  ;;  %v1684_v31 = vpop.permute.xlu1 %1683  ;;  %v3208_v46 = vld [vmem:[%s6544_s3 + $0x3e0] sm:$0xff]  ;;  %vm1765_vm11 = vcmp.lt.s32.totalorder %v3844_v61, 77  ;;  %vm1791_vm12 = vcmp.lt.s32.totalorder %v3844_v61, 74 }
 0x2ac   : > { %v1689_v30 = vsel %vm1687_vm9, %v1682_v15, %v1686_v8  ;;  %v1691_v27 = vsel %vm1687_vm9, %v1686_v8, %v1682_v15  ;;  %v1688_v16 = vsel %vm1687_vm9, %v1680_v53, %v1684_v31  ;;  %v1690_v3 = vsel %vm1687_vm9, %v1684_v31, %v1680_v53  ;;  %v3213_v31 = vld [vmem:[%s6544_s3 + $0x408] sm:$0xff] }
 0x2ad   : > { %v1699_v13 = vmul.f32 %v3202_v14, %v1689_v30  ;;  %v1700_v36 = vmul.f32 %v3203_v54, %v1691_v27  ;;  %2070 = vrot.lane.b32.xlu0 %v4653_v6, %s3529_s13  ;;  %v1649_v58 = vadd.f32 %v1645_v38, %v1597_v37  ;;  %v1650_v47 = vadd.f32 %v1646_v24, %v1598_v45  ;;  %v3212_v27 = vld [vmem:[%s6544_s3 + $0x400] sm:$0xff] }
 0x2ae   : > { %v1697_v55 = vmul.f32 %v3200_v2, %v1688_v16  ;;  %v1698_v41 = vmul.f32 %v3201_v56, %v1690_v3  ;;  %2068 = vrot.lane.b32.xlu1 %v4655_v29, %s3529_s13  ;;  %vm1817_vm13 = vcmp.lt.s32.totalorder %v3844_v61, 71  ;;  %vm1843_vm14 = vcmp.lt.s32.totalorder %v3844_v61, 41 }
 0x2af   : > { %v1703_v25 = vadd.f32 %v1699_v13, %v1651_v50  ;;  %v1704_v18 = vadd.f32 %v1700_v36, %v1652_v62  ;;  %v1708_v0 = vpop.permute.xlu0 %1707  ;;  %v1706_v20 = vpop.permute.xlu1 %1705  ;;  %v3214_v50 = vld [vmem:[%s6544_s3 + $0x410] sm:$0xff]  ;;  %v3215_v62 = vld [vmem:[%s6544_s3 + $0x418] sm:$0xff]  ;;  %vm1869_vm15 = vcmp.lt.s32.totalorder %v3844_v61, 38  ;;  %vm1895_vm2 = vcmp.lt.s32.totalorder %v3844_v61, 35 }
 0x2b0   : > { %v1701_v21 = vadd.f32 %v1697_v55, %v1649_v58  ;;  %v1702_v28 = vadd.f32 %v1698_v41, %v1650_v47  ;;  %vm1946_vm7 = vcmp.lt.s32.totalorder %v3844_v61, 29  ;;  %vm1998_vm3 = vcmp.lt.s32.totalorder %v3844_v61, 23 }
 0x2b1   : > { %2074 = vrot.lane.b32.xlu0 %v4659_v44, %s3529_s13  ;;  %vm2024_vm4 = vcmp.lt.s32.totalorder %v3844_v61, 121  ;;  %vm2050_vm6 = vcmp.lt.s32.totalorder %v3844_v61, 118  ;;  %vm2076_vm8 = vcmp.lt.s32.totalorder %v3844_v61, 115  ;;  %vm2245_vm9 = vcmask 130048  }
 0x2b2   : > { %2072 = vrot.lane.b32.xlu1 %v4661_v12, %s3529_s13 }
 0x2b3   : > { %v1712_v10 = vpop.permute.xlu0 %1711  ;;  %v1710_v19 = vpop.permute.xlu1 %1709 }
 0x2b4   : > { %v1715_v59 = vsel %vm1713_vm5, %v1708_v0, %v1712_v10  ;;  %v1717_v63 = vsel %vm1713_vm5, %v1712_v10, %v1708_v0  ;;  %v1714_v40 = vsel %vm1713_vm5, %v1706_v20, %v1710_v19  ;;  %v1716_v34 = vsel %vm1713_vm5, %v1710_v19, %v1706_v20  ;;  %v3219_v10 = vld [vmem:[%s6544_s3 + $0x438] sm:$0xff] }
 0x2b5   : > { %v1725_v4 = vmul.f32 %v3206_v11, %v1715_v59  ;;  %v1726_v1 = vmul.f32 %v3207_v49, %v1717_v63  ;;  %2096 = vrot.lane.b32.xlu0 %v4653_v6, %s3481_s23  ;;  %v1723_v5 = vmul.f32 %v3204_v32, %v1714_v40  ;;  %v1724_v51 = vmul.f32 %v3205_v39, %v1716_v34  ;;  %v3218_v49 = vld [vmem:[%s6544_s3 + $0x430] sm:$0xff]  ;;  %v3216_v39 = vld [vmem:[%s6544_s3 + $0x420] sm:$0xff]  ;;  %v3217_v59 = vld [vmem:[%s6544_s3 + $0x428] sm:$0xff] }
 0x2b6   : > { %2094 = vrot.lane.b32.xlu1 %v4655_v29, %s3481_s23  ;;  %vm2127_vm5 = vcmp.lt.s32.totalorder %v3844_v61, 109 }
 0x2b7   : > { %v1729_v9 = vadd.f32 %v1725_v4, %v5961_v60  ;;  %v1730_v42 = vadd.f32 %v1726_v1, %v5963_v48  ;;  %v1734_v33 = vpop.permute.xlu0 %1733  ;;  %v1727_v7 = vadd.f32 %v1723_v5, %v5967_v43  ;;  %v1728_v52 = vadd.f32 %v1724_v51, %v5969_v57  ;;  %v1732_v15 = vpop.permute.xlu1 %1731  ;;  %v3210_v60 = vld [vmem:[%s6544_s3 + $0x3f0] sm:$0xff]  ;;  %v3211_v48 = vld [vmem:[%s6544_s3 + $0x3f8] sm:$0xff]  ;;  %v3209_v43 = vld [vmem:[%s6544_s3 + $0x3e8] sm:$0xff] }
 0x2b9   : > { %2100 = vrot.lane.b32.xlu0 %v4659_v44, %s3481_s23 }
 0x2ba   : > { %2098 = vrot.lane.b32.xlu1 %v4661_v12, %s3481_s23  ;;  %s3530_s23 = smov 109  }
 0x2bb   : > { %v1738_v22 = vpop.permute.xlu0 %1737  ;;  %v1736_v23 = vpop.permute.xlu1 %1735 }
 0x2bc   : > { %v1741_v57 = vsel %vm1739_vm10, %v1734_v33, %v1738_v22  ;;  %v1743_v53 = vsel %vm1739_vm10, %v1738_v22, %v1734_v33  ;;  %v1740_v35 = vsel %vm1739_vm10, %v1732_v15, %v1736_v23  ;;  %v1742_v38 = vsel %vm1739_vm10, %v1736_v23, %v1732_v15 }
 0x2bd   : > { %v1751_v17 = vmul.f32 %v3210_v60, %v1741_v57  ;;  %v1752_v26 = vmul.f32 %v3211_v48, %v1743_v53  ;;  %2121 = vrot.lane.b32.xlu0 %v4653_v6, %s3530_s23  ;;  %v1749_v24 = vmul.f32 %v3208_v46, %v1740_v35  ;;  %v1750_v14 = vmul.f32 %v3209_v43, %v1742_v38  ;;  %v2202_v48 = vld [vmem:[%s6545_s4 + $0x8] sm:$0xff]  ;;  %v2201_v46 = vld [vmem:[%s6545_s4] sm:$0xff] }
 0x2be   : > { %2119 = vrot.lane.b32.xlu1 %v4655_v29, %s3530_s23  ;;  %vm2153_vm10 = vcmp.lt.s32.totalorder %v3844_v61, 106 }
 0x2bf   : > { %v1755_v54 = vadd.f32 %v1751_v17, %v1703_v25  ;;  %v1756_v37 = vadd.f32 %v1752_v26, %v1704_v18  ;;  %v1760_v45 = vpop.permute.xlu0 %1759  ;;  %v1753_v8 = vadd.f32 %v1749_v24, %v1701_v21  ;;  %v1754_v2 = vadd.f32 %v1750_v14, %v1702_v28  ;;  %v1758_v56 = vpop.permute.xlu1 %1757  ;;  %v2224_v14 = vld [vmem:[%s6547_s6 + $0x18] sm:$0xff] }
 0x2c1   : > { %2125 = vrot.lane.b32.xlu0 %v4659_v44, %s3530_s23 }
 0x2c2   : > { %2123 = vrot.lane.b32.xlu1 %v4661_v12, %s3530_s23 }
 0x2c3   : > { %v1764_v30 = vpop.permute.xlu0 %1763  ;;  %v1762_v16 = vpop.permute.xlu1 %1761 }
 0x2c4   : > { %v1767_v13 = vsel %vm1765_vm11, %v1760_v45, %v1764_v30  ;;  %v1769_v36 = vsel %vm1765_vm11, %v1764_v30, %v1760_v45  ;;  %v1766_v47 = vsel %vm1765_vm11, %v1758_v56, %v1762_v16  ;;  %v1768_v55 = vsel %vm1765_vm11, %v1762_v16, %v1758_v56  ;;  %v3227_v30 = vld [vmem:[%s6544_s3 + $0x478] sm:$0xff]  ;;  %v2221_v16 = vld [vmem:[%s6547_s6] sm:$0xff] }
 0x2c5   : > { %v1777_v3 = vmul.f32 %v3214_v50, %v1767_v13  ;;  %v1778_v58 = vmul.f32 %v3215_v62, %v1769_v36  ;;  %2147 = vrot.lane.b32.xlu0 %v4653_v6, %s3531_s18  ;;  %v1775_v41 = vmul.f32 %v3212_v27, %v1766_v47  ;;  %v1776_v25 = vmul.f32 %v3213_v31, %v1768_v55  ;;  %v3226_v62 = vld [vmem:[%s6544_s3 + $0x470] sm:$0xff]  ;;  %v2222_v27 = vld [vmem:[%s6547_s6 + $0x8] sm:$0xff]  ;;  %v3224_v13 = vld [vmem:[%s6544_s3 + $0x460] sm:$0xff] }
 0x2c6   : > { %2145 = vrot.lane.b32.xlu1 %v4655_v29, %s3531_s18  ;;  %v3225_v36 = vld [vmem:[%s6544_s3 + $0x468] sm:$0xff]  ;;  %vm2179_vm11 = vcmp.lt.s32.totalorder %v3844_v61, 103 }
 0x2c7   : > { %v1781_v18 = vadd.f32 %v1777_v3, %v1729_v9  ;;  %v1782_v0 = vadd.f32 %v1778_v58, %v1730_v42  ;;  %v1786_v21 = vpop.permute.xlu0 %1785  ;;  %v1779_v28 = vadd.f32 %v1775_v41, %v1727_v7  ;;  %v1780_v20 = vadd.f32 %v1776_v25, %v1728_v52  ;;  %v1784_v11 = vpop.permute.xlu1 %1783 }
 0x2c9   : > { %2151 = vrot.lane.b32.xlu0 %v4659_v44, %s3531_s18 }
 0x2ca   : > { %2149 = vrot.lane.b32.xlu1 %v4661_v12, %s3531_s18 }
 0x2cb   : > { %v1790_v32 = vpop.permute.xlu0 %1789  ;;  %v1788_v4 = vpop.permute.xlu1 %1787 }
 0x2cc   : > { %v1793_v63 = vsel %vm1791_vm12, %v1786_v21, %v1790_v32  ;;  %v1795_v19 = vsel %vm1791_vm12, %v1790_v32, %v1786_v21  ;;  %v1792_v34 = vsel %vm1791_vm12, %v1784_v11, %v1788_v4  ;;  %v1794_v5 = vsel %vm1791_vm12, %v1788_v4, %v1784_v11  ;;  %v3228_v4 = vld [vmem:[%s6544_s3 + $0x480] sm:$0xff] }
 0x2cd   : > { %v1803_v1 = vmul.f32 %v3218_v49, %v1793_v63  ;;  %v1804_v40 = vmul.f32 %v3219_v10, %v1795_v19  ;;  %2173 = vrot.lane.b32.xlu0 %v4653_v6, %s3532_s8  ;;  %v1801_v51 = vmul.f32 %v3216_v39, %v1792_v34  ;;  %v1802_v9 = vmul.f32 %v3217_v59, %v1794_v5  ;;  %v3222_v6 = vld [vmem:[%s6544_s3 + $0x450] sm:$0xff]  ;;  %v3231_v63 = vld [vmem:[%s6544_s3 + $0x498] sm:$0xff] }
 0x2ce   : > { %2171 = vrot.lane.b32.xlu1 %v4655_v29, %s3532_s8  ;;  %v3223_v29 = vld [vmem:[%s6544_s3 + $0x458] sm:$0xff]  ;;  %v3533_v49 = vmov 0.0   ;;  %v3230_v59 = vld [vmem:[%s6544_s3 + $0x490] sm:$0xff] }
 0x2cf   : > { %v1807_v42 = vadd.f32 %v1803_v1, %v1755_v54  ;;  %v1808_v33 = vadd.f32 %v1804_v40, %v1756_v37  ;;  %v1812_v7 = vpop.permute.xlu0 %1811  ;;  %v1805_v52 = vadd.f32 %v1801_v51, %v1753_v8  ;;  %v1806_v15 = vadd.f32 %v1802_v9, %v1754_v2  ;;  %v1810_v60 = vpop.permute.xlu1 %1809  ;;  %v2223_v8 = vld [vmem:[%s6547_s6 + $0x10] sm:$0xff]  ;;  %2326 = vmatprep.mubr.f32.mxu1 %v3533_v49  ;;  %v3229_v1 = vld [vmem:[%s6544_s3 + $0x488] sm:$0xff] }
 0x2d0   : > { %2657 = vmatprep.mubr.f32.mxu0 %v3533_v49 }
 0x2d1   : > { %2177 = vrot.lane.b32.xlu0 %v4659_v44, %s3532_s8  ;;  %v3220_v44 = vld [vmem:[%s6544_s3 + $0x440] sm:$0xff] }
 0x2d2   : > { %2175 = vrot.lane.b32.xlu1 %v4661_v12, %s3532_s8  ;;  %v3221_v12 = vld [vmem:[%s6544_s3 + $0x448] sm:$0xff] }
 0x2d3   : > { %v1816_v22 = vpop.permute.xlu0 %1815  ;;  %v1814_v53 = vpop.permute.xlu1 %1813 }
 0x2d4   : > { %v1819_v43 = vsel %vm1817_vm13, %v1812_v7, %v1816_v22  ;;  %v1821_v57 = vsel %vm1817_vm13, %v1816_v22, %v1812_v7  ;;  %v1818_v26 = vsel %vm1817_vm13, %v1810_v60, %v1814_v53  ;;  %v1820_v35 = vsel %vm1817_vm13, %v1814_v53, %v1810_v60 }
 0x2d5   : > { %v1829_v23 = vmul.f32 %v3222_v6, %v1819_v43  ;;  %v1830_v17 = vmul.f32 %v3223_v29, %v1821_v57  ;;  %2210 = vperm.xlu0 %3438, %v2202_v48   ;;  %v1827_v38 = vmul.f32 %v3220_v44, %v1818_v26  ;;  %v1828_v24 = vmul.f32 %v3221_v12, %v1820_v35  ;;  %v3234_v44 = vld [vmem:[%s6544_s3 + $0x4b0] sm:$0xff]  ;;  %v3235_v12 = vld [vmem:[%s6544_s3 + $0x4b8] sm:$0xff]  ;;  %v3232_v43 = vld [vmem:[%s6544_s3 + $0x4a0] sm:$0xff] }
 0x2d6   : > { %2205 = vperm.xlu1 %3439, %v2201_v46   ;;  %v3233_v57 = vld [vmem:[%s6544_s3 + $0x4a8] sm:$0xff] }
 0x2d7   : > { %v1833_v54 = vadd.f32 %v1829_v23, %v1781_v18  ;;  %v1834_v37 = vadd.f32 %v1830_v17, %v1782_v0  ;;  %v1838_v45 = vpop.permute.xlu0 %1837  ;;  %v1831_v2 = vadd.f32 %v1827_v38, %v1779_v28  ;;  %v1832_v56 = vadd.f32 %v1828_v24, %v1780_v20  ;;  %v1836_v50 = vpop.permute.xlu1 %1835 }
 0x2d9   : > { %2242 = vperm.xlu0 %3438, %v2224_v14  }
 0x2da   : > { %2237 = vperm.xlu1 %3439, %v2223_v8  }
 0x2db   : > { %v1842_v31 = vpop.permute.xlu0 %1841  ;;  %v1840_v47 = vpop.permute.xlu1 %1839 }
 0x2dc   : > { %v1845_v3 = vsel %vm1843_vm14, %v1838_v45, %v1842_v31  ;;  %v1847_v58 = vsel %vm1843_vm14, %v1842_v31, %v1838_v45  ;;  %v1844_v25 = vsel %vm1843_vm14, %v1836_v50, %v1840_v47  ;;  %v1846_v18 = vsel %vm1843_vm14, %v1840_v47, %v1836_v50  ;;  %v3236_v31 = vld [vmem:[%s6544_s3 + $0x4c0] sm:$0xff] }
 0x2dd   : > { %v1855_v55 = vmul.f32 %v3226_v62, %v1845_v3  ;;  %v1856_v41 = vmul.f32 %v3227_v30, %v1847_v58  ;;  %2232 = vperm.xlu0 %3438, %v2222_v27   ;;  %v1853_v0 = vmul.f32 %v3224_v13, %v1844_v25  ;;  %v1854_v21 = vmul.f32 %v3225_v36, %v1846_v18  ;;  %v3238_v62 = vld [vmem:[%s6544_s3 + $0x4d0] sm:$0xff]  ;;  %v3239_v30 = vld [vmem:[%s6544_s3 + $0x4d8] sm:$0xff]  ;;  %v3237_v13 = vld [vmem:[%s6544_s3 + $0x4c8] sm:$0xff] }
 0x2de   : > { %2227 = vperm.xlu1 %3439, %v2221_v16  }
 0x2df   : > { %v1859_v28 = vadd.f32 %v1855_v55, %v1807_v42  ;;  %v1860_v20 = vadd.f32 %v1856_v41, %v1808_v33  ;;  %v1864_v11 = vpop.permute.xlu0 %1863  ;;  %v1857_v10 = vadd.f32 %v1853_v0, %v1805_v52  ;;  %v1858_v32 = vadd.f32 %v1854_v21, %v1806_v15  ;;  %v1862_v39 = vpop.permute.xlu1 %1861 }
 0x2e3   : > { %v1868_v19 = vpop.permute.xlu0 %1867  ;;  %v1866_v5 = vpop.permute.xlu1 %1865 }
 0x2e4   : > { %v1871_v40 = vsel %vm1869_vm15, %v1864_v11, %v1868_v19  ;;  %v1873_v34 = vsel %vm1869_vm15, %v1868_v19, %v1864_v11  ;;  %v1870_v42 = vsel %vm1869_vm15, %v1862_v39, %v1866_v5  ;;  %v1872_v33 = vsel %vm1869_vm15, %v1866_v5, %v1862_v39  ;;  %v3243_v39 = vld [vmem:[%s6544_s3 + $0x4f8] sm:$0xff]  ;;  %v3241_v19 = vld [vmem:[%s6544_s3 + $0x4e8] sm:$0xff] }
 0x2e5   : > { %v1881_v51 = vmul.f32 %v3230_v59, %v1871_v40  ;;  %v1882_v9 = vmul.f32 %v3231_v63, %v1873_v34  ;;  %v1879_v7 = vmul.f32 %v3228_v4, %v1870_v42  ;;  %v1880_v52 = vmul.f32 %v3229_v1, %v1872_v33  ;;  %v3240_v63 = vld [vmem:[%s6544_s3 + $0x4e0] sm:$0xff] }
 0x2e7   : > { %v1885_v15 = vadd.f32 %v1881_v51, %v1833_v54  ;;  %v1886_v60 = vadd.f32 %v1882_v9, %v1834_v37  ;;  %v1890_v6 = vpop.permute.xlu0 %1889  ;;  %v1883_v29 = vadd.f32 %v1879_v7, %v1831_v2  ;;  %v1884_v48 = vadd.f32 %v1880_v52, %v1832_v56  ;;  %v1888_v22 = vpop.permute.xlu1 %1887 }
 0x2eb   : > { %v1894_v46 = vpop.permute.xlu0 %1893  ;;  %v1892_v17 = vpop.permute.xlu1 %1891 }
 0x2ec   : > { %v1897_v53 = vsel %vm1895_vm2, %v1890_v6, %v1894_v46  ;;  %v1899_v23 = vsel %vm1895_vm2, %v1894_v46, %v1890_v6  ;;  %v1896_v38 = vsel %vm1895_vm2, %v1888_v22, %v1892_v17  ;;  %v1898_v24 = vsel %vm1895_vm2, %v1892_v17, %v1888_v22 }
 0x2ed   : > { %v1907_v26 = vmul.f32 %v3234_v44, %v1897_v53  ;;  %v1908_v35 = vmul.f32 %v3235_v12, %v1899_v23  ;;  %v1905_v14 = vmul.f32 %v3232_v43, %v1896_v38  ;;  %v1906_v54 = vmul.f32 %v3233_v57, %v1898_v24 }
 0x2ef   : > { %v1911_v37 = vadd.f32 %v1907_v26, %v1859_v28  ;;  %v1912_v45 = vadd.f32 %v1908_v35, %v1860_v20  ;;  %v1916_v8 = vpop.permute.xlu0 %1915  ;;  %v1909_v2 = vadd.f32 %v1905_v14, %v1857_v10  ;;  %v1910_v56 = vadd.f32 %v1906_v54, %v1858_v32  ;;  %v1914_v50 = vpop.permute.xlu1 %1913  ;;  %v3242_v32 = vld [vmem:[%s6544_s3 + $0x4f0] sm:$0xff] }
 0x2f3   : > { %v1920_v27 = vpop.permute.xlu0 %1919  ;;  %v1918_v3 = vpop.permute.xlu1 %1917 }
 0x2f4   : > { %v1922_v36 = vsel %vm344_vm1, %v1916_v8, %v1920_v27  ;;  %v1924_v16 = vsel %vm344_vm1, %v1920_v27, %v1916_v8  ;;  %v1921_v55 = vsel %vm344_vm1, %v1914_v50, %v1918_v3  ;;  %v1923_v41 = vsel %vm344_vm1, %v1918_v3, %v1914_v50  ;;  %v3246_v50 = vld [vmem:[%s6544_s3 + $0x510] sm:$0xff] }
 0x2f5   : > { %v1932_v58 = vmul.f32 %v3238_v62, %v1922_v36  ;;  %v1933_v47 = vmul.f32 %v3239_v30, %v1924_v16  ;;  %v1930_v25 = vmul.f32 %v3236_v31, %v1921_v55  ;;  %v1931_v18 = vmul.f32 %v3237_v13, %v1923_v41  ;;  %v3247_v62 = vld [vmem:[%s6544_s3 + $0x518] sm:$0xff]  ;;  %v3244_v13 = vld [vmem:[%s6544_s3 + $0x500] sm:$0xff]  ;;  %v3245_v36 = vld [vmem:[%s6544_s3 + $0x508] sm:$0xff] }
 0x2f6   : > { %vm1972_vm1 = vcmp.lt.s32.totalorder %v3844_v61, 26 }
 0x2f7   : > { %v6170_v0 = vadd.f32 %v1932_v58, %v1885_v15  ;;  %v6172_v21 = vadd.f32 %v1933_v47, %v1886_v60  ;;  %v1941_v28 = vpop.permute.xlu0 %1940  ;;  %v6174_v20 = vadd.f32 %v1930_v25, %v1883_v29  ;;  %v6176_v11 = vadd.f32 %v1931_v18, %v1884_v48  ;;  %v3250_v58 = vld [vmem:[%s6544_s3 + $0x530] sm:$0xff]  ;;  %v3251_v47 = vld [vmem:[%s6544_s3 + $0x538] sm:$0xff] }
 0x2f8   : > { %v1939_v10 = vpop.permute.xlu1 %1938 }
 0x2fb   : > { %v1945_v59 = vpop.permute.xlu0 %1944 }
 0x2fc   : > { %v1948_v4 = vsel %vm1946_vm7, %v1941_v28, %v1945_v59  ;;  %v1950_v1 = vsel %vm1946_vm7, %v1945_v59, %v1941_v28  ;;  %v1943_v40 = vpop.permute.xlu1 %1942  ;;  %v3248_v28 = vld [vmem:[%s6544_s3 + $0x520] sm:$0xff] }
 0x2fd   : > { %v1958_v34 = vmul.f32 %v3242_v32, %v1948_v4  ;;  %v1959_v5 = vmul.f32 %v3243_v39, %v1950_v1  ;;  %v1947_v51 = vsel %vm1946_vm7, %v1939_v10, %v1943_v40  ;;  %v1949_v9 = vsel %vm1946_vm7, %v1943_v40, %v1939_v10  ;;  %v3249_v10 = vld [vmem:[%s6544_s3 + $0x528] sm:$0xff]  ;;  %v3254_v1 = vld [vmem:[%s6544_s3 + $0x550] sm:$0xff]  ;;  %v3255_v40 = vld [vmem:[%s6544_s3 + $0x558] sm:$0xff] }
 0x2fe   : > { %v1956_v42 = vmul.f32 %v3240_v63, %v1947_v51  ;;  %v1957_v33 = vmul.f32 %v3241_v19, %v1949_v9  ;;  %v2217_v63 = vld [vmem:[%s6546_s5] sm:$0xff] }
 0x2ff   : > { %v6191_v7 = vadd.f32 %v1958_v34, %v1911_v37  ;;  %v6193_v52 = vadd.f32 %v1959_v5, %v1912_v45  ;;  %v1967_v15 = vpop.permute.xlu0 %1966 }
 0x300   : > { %v6195_v60 = vadd.f32 %v1956_v42, %v1909_v2  ;;  %v6197_v6 = vadd.f32 %v1957_v33, %v1910_v56  ;;  %v1965_v29 = vpop.permute.xlu1 %1964  ;;  %v3252_v33 = vld [vmem:[%s6544_s3 + $0x540] sm:$0xff] }
 0x303   : > { %v1971_v48 = vpop.permute.xlu0 %1970 }
 0x304   : > { %v1969_v22 = vpop.permute.xlu1 %1968  ;;  %v1974_v30 = vsel %vm1972_vm1, %v1967_v15, %v1971_v48  ;;  %v1976_v27 = vsel %vm1972_vm1, %v1971_v48, %v1967_v15  ;;  %v3253_v15 = vld [vmem:[%s6544_s3 + $0x548] sm:$0xff] }
 0x305   : > { %v1973_v16 = vsel %vm1972_vm1, %v1965_v29, %v1969_v22  ;;  %v1975_v3 = vsel %vm1972_vm1, %v1969_v22, %v1965_v29  ;;  %v1984_v25 = vmul.f32 %v3246_v50, %v1974_v30  ;;  %v1985_v18 = vmul.f32 %v3247_v62, %v1976_v27 }
 0x306   : > { %v1982_v19 = vmul.f32 %v3244_v13, %v1973_v16  ;;  %v1983_v4 = vmul.f32 %v3245_v36, %v1975_v3 }
 0x307   : > { %v1993_v44 = vpop.permute.xlu0 %1992 }
 0x308   : > { %v1991_v12 = vpop.permute.xlu1 %1990  ;;  %v1986_v13 = vadd.f32 %v1982_v19, %v6174_v20  ;;  %v1987_v36 = vadd.f32 %v1983_v4, %v6176_v11  ;;  %v3257_v20 = vld [vmem:[%s6544_s3 + $0x568] sm:$0xff] }
 0x309   : > { %v3261_v19 = vld [vmem:[%s6544_s3 + $0x588] sm:$0xff] }
 0x30b   : > { %v1997_v46 = vpop.permute.xlu0 %1996 }
 0x30c   : > { %v1995_v43 = vpop.permute.xlu1 %1994  ;;  %v2000_v55 = vsel %vm1998_vm3, %v1993_v44, %v1997_v46  ;;  %v2002_v41 = vsel %vm1998_vm3, %v1997_v46, %v1993_v44  ;;  %v1988_v46 = vadd.f32 %v1984_v25, %v6170_v0 }
 0x30d   : > { %v1999_v32 = vsel %vm1998_vm3, %v1991_v12, %v1995_v43  ;;  %v2001_v39 = vsel %vm1998_vm3, %v1995_v43, %v1991_v12  ;;  %v2010_v9 = vmul.f32 %v3250_v58, %v2000_v55  ;;  %v2011_v42 = vmul.f32 %v3251_v47, %v2002_v41 }
 0x30e   : > { %v2008_v22 = vmul.f32 %v3248_v28, %v1999_v32  ;;  %v2009_v44 = vmul.f32 %v3249_v10, %v2001_v39  ;;  %v6289_v12 = vsel %vm2245_vm9, %v2217_v63, 0  ;;  %v1989_v43 = vadd.f32 %v1985_v18, %v6172_v21  ;;  %v3260_v63 = vld [vmem:[%s6544_s3 + $0x580] sm:$0xff] }
 0x30f   : > { %v2019_v57 = vpop.permute.xlu0 %2018  ;;  %v2014_v16 = vadd.f32 %v2010_v9, %v6191_v7  ;;  %v2015_v3 = vadd.f32 %v2011_v42, %v6193_v52  ;;  %v3264_v42 = vld [vmem:[%s6544_s3 + $0x5a0] sm:$0xff]  ;;  %v6457_v61 = vand.u32 4294901760, %v6289_v12 }
 0x310   : > { %v2017_v53 = vpop.permute.xlu1 %2016  ;;  %v2012_v58 = vadd.f32 %v2008_v22, %v6195_v60  ;;  %v2013_v47 = vadd.f32 %v2009_v44, %v6197_v6  ;;  %v3262_v6 = vld [vmem:[%s6544_s3 + $0x590] sm:$0xff]  ;;  %v3271_v44 = vld [vmem:[%s6544_s3 + $0x5d8] sm:$0xff] }
 0x311   : > { %v3270_v22 = vld [vmem:[%s6544_s3 + $0x5d0] sm:$0xff] }
 0x313   : > { %v2023_v23 = vpop.permute.xlu0 %2022 }
 0x314   : > { %v2021_v17 = vpop.permute.xlu1 %2020  ;;  %v2026_v34 = vsel %vm2024_vm4, %v2019_v57, %v2023_v23  ;;  %v2028_v5 = vsel %vm2024_vm4, %v2023_v23, %v2019_v57 }
 0x315   : > { %v2025_v29 = vsel %vm2024_vm4, %v2017_v53, %v2021_v17  ;;  %v2027_v48 = vsel %vm2024_vm4, %v2021_v17, %v2017_v53  ;;  %v2036_v57 = vmul.f32 %v3254_v1, %v2028_v5  ;;  %v2037_v23 = vmul.f32 %v3255_v40, %v2026_v34  ;;  %v3258_v53 = vld [vmem:[%s6544_s3 + $0x570] sm:$0xff]  ;;  %v3259_v17 = vld [vmem:[%s6544_s3 + $0x578] sm:$0xff] }
 0x316   : > { %v2034_v62 = vmul.f32 %v3252_v33, %v2027_v48  ;;  %v2035_v30 = vmul.f32 %v3253_v15, %v2025_v29  ;;  %v3266_v40 = vld [vmem:[%s6544_s3 + $0x5b0] sm:$0xff]  ;;  %v3267_v34 = vld [vmem:[%s6544_s3 + $0x5b8] sm:$0xff]  ;;  %v3265_v33 = vld [vmem:[%s6544_s3 + $0x5a8] sm:$0xff] }
 0x317   : > { %v6199_v26 = vpop.permute.xlu0 %2044  ;;  %v2040_v41 = vadd.f32 %v2036_v57, %v1988_v46  ;;  %v2041_v25 = vadd.f32 %v2037_v23, %v1989_v43 }
 0x318   : > { %v6201_v35 = vpop.permute.xlu1 %2042  ;;  %v2038_v18 = vadd.f32 %v2034_v62, %v1986_v13  ;;  %v2039_v28 = vadd.f32 %v2035_v30, %v1987_v36  ;;  %v3268_v36 = vld [vmem:[%s6544_s3 + $0x5c0] sm:$0xff] }
 0x31b   : > { %v6203_v38 = vpop.permute.xlu0 %2048 }
 0x31c   : > { %v6205_v24 = vpop.permute.xlu1 %2046  ;;  %v2052_v0 = vsel %vm2050_vm6, %v6199_v26, %v6203_v38  ;;  %v2054_v21 = vsel %vm2050_vm6, %v6203_v38, %v6199_v26  ;;  %v3256_v26 = vld [vmem:[%s6544_s3 + $0x560] sm:$0xff]  ;;  %v3263_v38 = vld [vmem:[%s6544_s3 + $0x598] sm:$0xff] }
 0x31d   : > { %v2051_v11 = vsel %vm2050_vm6, %v6201_v35, %v6205_v24  ;;  %v2053_v7 = vsel %vm2050_vm6, %v6205_v24, %v6201_v35  ;;  %v2062_v52 = vmul.f32 %v3258_v53, %v2054_v21  ;;  %v2063_v60 = vmul.f32 %v3259_v17, %v2052_v0 }
 0x31e   : > { %v2060_v32 = vmul.f32 %v3256_v26, %v2053_v7  ;;  %v2061_v39 = vmul.f32 %v3257_v20, %v2051_v11  ;;  %v3274_v26 = vld [vmem:[%s6544_s3 + $0x5f0] sm:$0xff]  ;;  %v3275_v20 = vld [vmem:[%s6544_s3 + $0x5f8] sm:$0xff] }
 0x31f   : > { %v6207_v14 = vpop.permute.xlu0 %2070  ;;  %v2067_v9 = vadd.f32 %v2063_v60, %v2015_v3 }
 0x320   : > { %v6209_v54 = vpop.permute.xlu1 %2068  ;;  %v2065_v57 = vadd.f32 %v2061_v39, %v2013_v47 }
 0x323   : > { %v6211_v37 = vpop.permute.xlu0 %2074 }
 0x324   : > { %v6213_v45 = vpop.permute.xlu1 %2072  ;;  %v2078_v55 = vsel %vm2076_vm8, %v6207_v14, %v6211_v37  ;;  %v2080_v35 = vsel %vm2076_vm8, %v6211_v37, %v6207_v14 }
 0x325   : > { %v2077_v14 = vsel %vm2076_vm8, %v6209_v54, %v6213_v45  ;;  %v2079_v37 = vsel %vm2076_vm8, %v6213_v45, %v6209_v54  ;;  %v2088_v4 = vmul.f32 %v3262_v6, %v2080_v35  ;;  %v2089_v1 = vmul.f32 %v3263_v38, %v2078_v55  ;;  %v3273_v6 = vld [vmem:[%s6544_s3 + $0x5e8] sm:$0xff] }
 0x326   : > { %v2066_v45 = vadd.f32 %v2062_v52, %v2014_v16  ;;  %v2086_v29 = vmul.f32 %v3260_v63, %v2079_v37  ;;  %v2087_v48 = vmul.f32 %v3261_v19, %v2077_v14  ;;  %v3269_v16 = vld [vmem:[%s6544_s3 + $0x5c8] sm:$0xff] }
 0x327   : > { %v6215_v8 = vpop.permute.xlu0 %2096  ;;  %v2092_v30 = vadd.f32 %v2088_v4, %v2040_v41  ;;  %v2093_v53 = vadd.f32 %v2089_v1, %v2041_v25  ;;  %v3277_v37 = vld [vmem:[%s6544_s3 + $0x608] sm:$0xff] }
 0x328   : > { %v6217_v2 = vpop.permute.xlu1 %2094  ;;  %v2091_v47 = vadd.f32 %v2087_v48, %v2039_v28  ;;  %v3279_v28 = vld [vmem:[%s6544_s3 + $0x618] sm:$0xff] }
 0x32b   : > { %v6221_v56 = vpop.permute.xlu0 %2100 }
 0x32c   : > { %v6229_v31 = vpop.permute.xlu1 %2098  ;;  %v2103_v5 = vsel %vm721_vm0, %v6215_v8, %v6221_v56  ;;  %v2105_v54 = vsel %vm721_vm0, %v6221_v56, %v6215_v8 }
 0x32d   : > { %v2102_v15 = vsel %vm721_vm0, %v6217_v2, %v6229_v31  ;;  %v2104_v8 = vsel %vm721_vm0, %v6229_v31, %v6217_v2  ;;  %v2064_v31 = vadd.f32 %v2060_v32, %v2012_v58  ;;  %v2113_v23 = vmul.f32 %v3266_v40, %v2105_v54 }
 0x32e   : > { %v2114_v62 = vmul.f32 %v3267_v34, %v2103_v5  ;;  %v2111_v17 = vmul.f32 %v3264_v42, %v2104_v8  ;;  %v2112_v0 = vmul.f32 %v3265_v33, %v2102_v15  ;;  %v2090_v58 = vadd.f32 %v2086_v29, %v2038_v18  ;;  %v3278_v18 = vld [vmem:[%s6544_s3 + $0x610] sm:$0xff] }
 0x32f   : > { %v6260_v59 = vpop.permute.xlu0 %2121  ;;  %v2117_v60 = vadd.f32 %v2113_v23, %v2066_v45 }
 0x330   : > { %v6275_v51 = vpop.permute.xlu1 %2119  ;;  %v2115_v35 = vadd.f32 %v2111_v17, %v2064_v31  ;;  %v2116_v41 = vadd.f32 %v2112_v0, %v2065_v57  ;;  %v6462_v0 = vsub.f32 %v6289_v12, %v6457_v61 }
 0x333   : > { %v2126_v50 = vpop.permute.xlu0 %2125 }
 0x334   : > { %v6307_v27 = vpop.permute.xlu1 %2123  ;;  %v2129_v46 = vsel %vm2127_vm5, %v6260_v59, %v2126_v50  ;;  %v2131_v43 = vsel %vm2127_vm5, %v2126_v50, %v6260_v59 }
 0x335   : > { %v2139_v21 = vmul.f32 %v3270_v22, %v2131_v43  ;;  %v2140_v13 = vmul.f32 %v3271_v44, %v2129_v46  ;;  %v2128_v59 = vsel %vm2127_vm5, %v6275_v51, %v6307_v27  ;;  %v2130_v50 = vsel %vm2127_vm5, %v6307_v27, %v6275_v51  ;;  %v3272_v27 = vld [vmem:[%s6544_s3 + $0x5e0] sm:$0xff]  ;;  %v2218_v46 = vld [vmem:[%s6546_s5 + $0x8] sm:$0xff] }
 0x336   : > { %v2118_v51 = vadd.f32 %v2114_v62, %v2067_v9  ;;  %v2138_v25 = vmul.f32 %v3269_v16, %v2128_v59  ;;  %v2250_v17 = vsel %vm2245_vm9, %v2218_v46, 0  ;;  %v2329_v16 = vand.u32 4294901760, %v6462_v0 }
 0x337   : > { %v2148_v24 = vpop.permute.xlu0 %2147  ;;  %v2143_v32 = vadd.f32 %v2139_v21, %v2092_v30  ;;  %v2144_v39 = vadd.f32 %v2140_v13, %v2093_v53  ;;  %v6464_v21 = vand.u32 4294901760, %v2250_v17  ;;  %v2219_v13 = vld [vmem:[%s6546_s5 + $0x10] sm:$0xff] }
 0x338   : > { %v2146_v10 = vpop.permute.xlu1 %2145  ;;  %v2142_v15 = vadd.f32 %v2138_v25, %v2091_v47 }
 0x339   : > { %v6472_v59 = vsub.f32 %v2250_v17, %v6464_v21 }
 0x33b   : > { %v2152_v56 = vpop.permute.xlu0 %2151 }
 0x33c   : > { %v2150_v2 = vpop.permute.xlu1 %2149  ;;  %v2155_v11 = vsel %vm2153_vm10, %v2148_v24, %v2152_v56  ;;  %v2157_v7 = vsel %vm2153_vm10, %v2152_v56, %v2148_v24  ;;  %v2137_v24 = vmul.f32 %v3268_v36, %v2130_v50  ;;  %v2253_v36 = vsel %vm2245_vm9, %v2219_v13, 0  ;;  %v2220_v50 = vld [vmem:[%s6546_s5 + $0x18] sm:$0xff] }
 0x33d   : > { %v2154_v38 = vsel %vm2153_vm10, %v2146_v10, %v2150_v2  ;;  %v2156_v55 = vsel %vm2153_vm10, %v2150_v2, %v2146_v10  ;;  %v2165_v63 = vmul.f32 %v3274_v26, %v2157_v7  ;;  %v2166_v19 = vmul.f32 %v3275_v20, %v2155_v11  ;;  %v3276_v10 = vld [vmem:[%s6544_s3 + $0x600] sm:$0xff] }
 0x33e   : > { %v2163_v4 = vmul.f32 %v3272_v27, %v2156_v55  ;;  %v2164_v1 = vmul.f32 %v3273_v6, %v2154_v38  ;;  %v2141_v33 = vadd.f32 %v2137_v24, %v2090_v58  ;;  %v2256_v58 = vsel %vm2245_vm9, %v2220_v50, 0 }
 0x33f   : > { %v2174_v3 = vpop.permute.xlu0 %2173  ;;  %v2169_v29 = vadd.f32 %v2165_v63, %v2117_v60  ;;  %v2170_v48 = vadd.f32 %v2166_v19, %v2118_v51  ;;  %v2330_v11 = vsub.f32 %v6462_v0, %v2329_v16  ;;  %v2340_v7 = vand.u32 4294901760, %v6472_v59 }
 0x340   : > { %v2172_v52 = vpop.permute.xlu1 %2171  ;;  %v2167_v43 = vadd.f32 %v2163_v4, %v2115_v35  ;;  %v2168_v2 = vadd.f32 %v2164_v1, %v2116_v41  ;;  %v6485_v38 = vand.u32 4294901760, %v2256_v58 }
 0x341   : > { %v2331_v25 = vand.u32 4294901760, %v2330_v11 }
 0x343   : > { %v2178_v14 = vpop.permute.xlu0 %2177 }
 0x344   : > { %v2181_v40 = vsel %vm2179_vm11, %v2174_v3, %v2178_v14  ;;  %v2183_v34 = vsel %vm2179_vm11, %v2178_v14, %v2174_v3  ;;  %v2176_v5 = vpop.permute.xlu1 %2175  ;;  %v6477_v3 = vand.u32 4294901760, %v2253_v36 }
 0x345   : > { %v2191_v54 = vmul.f32 %v3278_v18, %v2183_v34  ;;  %v2192_v45 = vmul.f32 %v3279_v28, %v2181_v40  ;;  %v2180_v9 = vsel %vm2179_vm11, %v2172_v52, %v2176_v5  ;;  %v2182_v42 = vsel %vm2179_vm11, %v2176_v5, %v2172_v52 }
 0x346   : > { %v2189_v8 = vmul.f32 %v3276_v10, %v2182_v42  ;;  %v2190_v56 = vmul.f32 %v3277_v37, %v2180_v9  ;;  %v6483_v6 = vsub.f32 %v2253_v36, %v6477_v3  ;;  %v2341_v18 = vsub.f32 %v6472_v59, %v2340_v7 }
 0x347   : > { %v2195_v22 = vadd.f32 %v2191_v54, %v2143_v32  ;;  %v2196_v44 = vadd.f32 %v2192_v45, %v2144_v39  ;;  %v6490_v37 = vsub.f32 %v2256_v58, %v6485_v38 }
 0x348   : > { %v2193_v31 = vadd.f32 %v2189_v8, %v2141_v33  ;;  %v2194_v57 = vadd.f32 %v2190_v56, %v2142_v15  ;;  %v2351_v10 = vand.u32 4294901760, %v6483_v6  ;;  %v2342_v8 = vand.u32 4294901760, %v2341_v18 }
 0x349   : > { %v2199_v23 = vadd.f32 %v2195_v22, %v2169_v29  ;;  %v2200_v62 = vadd.f32 %v2196_v44, %v2170_v48  ;;  %v2362_v44 = vand.u32 4294901760, %v6490_v37 }
 0x34a   : > { %v2198_v30 = vadd.f32 %v2194_v57, %v2168_v2  ;;  %v2197_v53 = vadd.f32 %v2193_v31, %v2167_v43  ;;  %v2352_v22 = vsub.f32 %v6483_v6, %v2351_v10 }
 0x34b   : > { %v2363_v31 = vsub.f32 %v6490_v37, %v2362_v44 }
 0x34c   : > { %v2353_v2 = vand.u32 4294901760, %v2352_v22 }
 0x34d   : > { %v2364_v57 = vand.u32 4294901760, %v2363_v31 }
 0x354   : > { %v2211_v12 = vpop.permute.xlu0 %2210 }
 0x355   : > { %v2215_v47 = vadd.f32 %v2211_v12, %v2199_v23  ;;  %v2216_v26 = vadd.f32 %v2211_v12, %v2200_v62  ;;  %v2206_v20 = vpop.permute.xlu1 %2205 }
 0x356   : > { %v2213_v52 = vadd.f32 %v2206_v20, %v2197_v53  ;;  %v2214_v60 = vadd.f32 %v2206_v20, %v2198_v30 }
 0x357   : > { %v2262_v51 = vand.u32 4294901760, %v2216_v26  ;;  %v2264_v27 = vand.u32 4294901760, %v2215_v47 }
 0x358   : > { %v2258_v55 = vand.u32 4294901760, %v2214_v60  ;;  %v2260_v35 = vand.u32 4294901760, %v2213_v52  ;;  %v2243_v62 = vpop.permute.xlu0 %2242 }
 0x359   : > { %v2384_v41 = vsub.f32 %v2216_v26, %v2262_v51  ;;  %v2390_v24 = vsub.f32 %v2215_v47, %v2264_v27  ;;  %v2238_v23 = vpop.permute.xlu1 %2237 }
 0x35a   : > { %v2372_v28 = vsub.f32 %v2214_v60, %v2258_v55  ;;  %v2378_v32 = vsub.f32 %v2213_v52, %v2260_v35  ;;  %v3288_v39 = vpack.c.bf16 %v2262_v51, %v2258_v55  ;;  %v3290_v63 = vpack.c.bf16 %v2264_v27, %v2260_v35 }
 0x35b   : > { %v2391_v19 = vand.u32 4294901760, %v2390_v24  ;;  %v2385_v14 = vand.u32 4294901760, %v2384_v41 }
 0x35c   : > { %v2379_v4 = vand.u32 4294901760, %v2378_v32  ;;  %3289 = vmatprep.subr.bf16.mxu1 %v3288_v39  ;;  %3301 = vmatprep.subr.bf16.mxu0 %v3288_v39  ;;  %v2373_v1 = vand.u32 4294901760, %v2372_v28  ;;  %v3296_v40 = vpack.c.bf16 %v2384_v41, %v2372_v28  ;;  %v3298_v34 = vpack.c.bf16 %v2390_v24, %v2378_v32 }
 0x35d   : > { %v2392_v5 = vsub.f32 %v2390_v24, %v2391_v19  ;;  %3291 = vmatpush1.bf16.msra.mxu1 %v3290_v63  ;;  %3303 = vmatpush1.bf16.msra.mxu0 %v3290_v63  ;;  %v2386_v54 = vsub.f32 %v2384_v41, %v2385_v14 }
 0x35e   : > { %v2380_v45 = vsub.f32 %v2378_v32, %v2379_v4  ;;  %v3304_v9 = vpack.c.bf16 %v2385_v14, %v2373_v1  ;;  %v3306_v42 = vpack.c.bf16 %v2391_v19, %v2379_v4  ;;  %v2374_v33 = vsub.f32 %v2372_v28, %v2373_v1 }
 0x35f   : > { %v2393_v15 = vand.u32 4294901760, %v2392_v5  ;;  %v2387_v56 = vand.u32 4294901760, %v2386_v54 }
 0x360   : > { %v2381_v29 = vand.u32 4294901760, %v2380_v45  ;;  %2332 = vmatmul.mubr.f32.vlgmr.msra.gmra.mrb[0].mxu1 %v2331_v25  ;;  %2661 = vmatmul.mubr.f32.vlgmr.msra.gmra.mrb[0].mxu0 %v2329_v16  ;;  %v2375_v48 = vand.u32 4294901760, %v2374_v33  ;;  %v2233_v16 = vpop.permute.xlu0 %2232 }
 0x361   : > { %3305 = vmatprep.subr.bf16.mxu0 %v3304_v9  ;;  %2337 = vmatprep.mubr.f32.mxu1 %v3533_v49 }
 0x362   : > { %3307 = vmatpush1.bf16.msra.mxu0 %v3306_v42  ;;  %2666 = vmatprep.mubr.f32.mxu0 %v3533_v49  ;;  %v3292_v46 = vpack.c.bf16 %v2387_v56, %v2375_v48  ;;  %v3294_v43 = vpack.c.bf16 %v2393_v15, %v2381_v29 }
 0x363   : > { %3309 = vmatprep.subr.bf16.mxu0 %v3288_v39 }
 0x364   : > { %2343 = vmatmul.mubr.f32.gmra.mrb[2].mxu1 %v2342_v8  ;;  %3293 = vmatprep.subr.bf16.mxu1 %v3292_v46 }
 0x365   : > { %2670 = vmatmul.mubr.f32.gmra.mrb[2].mxu0 %v2340_v7  ;;  %3295 = vmatpush1.bf16.msra.mxu1 %v3294_v43 }
 0x366   : > { %3297 = vmatprep.subr.bf16.mxu1 %v3296_v40  ;;  %2348 = vmatprep.mubr.f32.mxu1 %v3533_v49 }
 0x367   : > { %2675 = vmatprep.mubr.f32.mxu0 %v3533_v49 }
 0x368   : > { %2354 = vmatmul.mubr.f32.gmra.mrb[4].mxu1 %v2353_v2 }
 0x369   : > { %2679 = vmatmul.mubr.f32.gmra.mrb[4].mxu0 %v2351_v10  ;;  %2359 = vmatprep.mubr.f32.mxu1 %v3533_v49 }
 0x36a   : > { %2684 = vmatprep.mubr.f32.mxu0 %v3533_v49 }
 0x36c   : > { %2365 = vmatmul.mubr.f32.gmra.mrb[6].mxu1 %v2364_v57 }
 0x36d   : > { %2688 = vmatmul.mubr.f32.gmra.mrb[6].mxu0 %v2362_v44  ;;  %2455 = vmatprep.mubr.f32.mxu1 %v3533_v49 }
 0x36e   : > { %2770 = vmatprep.mubr.f32.mxu0 %v3533_v49 }
 0x370   : > { %2457 = vmatmul.mubr.f32.vlgmr.msra.gmra.mrb[0].mxu1 %v6457_v61 }
 0x371   : > { %3299 = vmatpush1.bf16.msra.mxu1 %v3298_v34  ;;  %2772 = vmatmul.mubr.f32.vlgmr.msra.gmra.mrb[0].mxu0 %v6457_v61 }
 0x372   : > { %3311 = vmatpush1.bf16.msra.mxu0 %v3290_v63  ;;  %2462 = vmatprep.mubr.f32.mxu1 %v3533_v49 }
 0x373   : > { %2777 = vmatprep.mubr.f32.mxu0 %v3533_v49 }
 0x374   : > { %2464 = vmatmul.mubr.f32.gmra.mrb[2].mxu1 %v6464_v21 }
 0x375   : > { %2779 = vmatmul.mubr.f32.gmra.mrb[2].mxu0 %v6464_v21  ;;  %2469 = vmatprep.mubr.f32.mxu1 %v3533_v49 }
 0x376   : > { %2784 = vmatprep.mubr.f32.mxu0 %v3533_v49 }
 0x378   : > { %2471 = vmatmul.mubr.f32.gmra.mrb[4].mxu1 %v6477_v3 }
 0x379   : > { %2786 = vmatmul.mubr.f32.gmra.mrb[4].mxu0 %v6477_v3  ;;  %2476 = vmatprep.mubr.f32.mxu1 %v3533_v49 }
 0x37a   : > { %2791 = vmatprep.mubr.f32.mxu0 %v3533_v49 }
 0x37c   : > { %2478 = vmatmul.mubr.f32.gmra.mrb[6].mxu1 %v6485_v38 }
 0x37d   : > { %2793 = vmatmul.mubr.f32.gmra.mrb[6].mxu0 %v6485_v38  ;;  %2556 = vmatprep.mubr.f32.mxu1 %v3533_v49 }
 0x37e   : > { %2867 = vmatprep.mubr.f32.mxu0 %v3533_v49 }
 0x380   : > { %2559 = vmatmul.mubr.f32.vlgmr.msra.gmra.mrb[0].mxu1 %v6462_v0 }
 0x381   : > { %2869 = vmatmul.mubr.f32.vlgmr.msra.gmra.mrb[0].mxu0 %v6457_v61  ;;  %2564 = vmatprep.mubr.f32.mxu1 %v3533_v49  ;;  %v2228_v61 = vpop.permute.xlu1 %2227 }
 0x382   : > { %2874 = vmatprep.mubr.f32.mxu0 %v3533_v49 }
 0x384   : > { %2567 = vmatmul.mubr.f32.gmra.mrb[2].mxu1 %v6472_v59 }
 0x385   : > { %2876 = vmatmul.mubr.f32.gmra.mrb[2].mxu0 %v6464_v21  ;;  %2572 = vmatprep.mubr.f32.mxu1 %v3533_v49 }
 0x386   : > { %2881 = vmatprep.mubr.f32.mxu0 %v3533_v49 }
 0x388   : > { %2575 = vmatmul.mubr.f32.gmra.mrb[4].mxu1 %v6483_v6 }
 0x389   : > { %2883 = vmatmul.mubr.f32.gmra.mrb[4].mxu0 %v6477_v3  ;;  %2580 = vmatprep.mubr.f32.mxu1 %v3533_v49 }
 0x38a   : > { %2888 = vmatprep.mubr.f32.mxu0 %v3533_v49 }
 0x38c   : > { %2583 = vmatmul.mubr.f32.gmra.mrb[6].mxu1 %v6490_v37 }
 0x38d   : > { %2890 = vmatmul.mubr.f32.gmra.mrb[6].mxu0 %v6485_v38 }
 0x453   : > { %v2560_v30 = vpop.f32.mrb[0].mxu1 }
 0x454   : > { %v3312_v53 = vadd.f32 %v2560_v30, %v2228_v61  ;;  %v2870_v17 = vpop.f32.mrb[0].mxu0  ;;  %v2562_v0 = vpop.f32.mrb[1].mxu1 }
 0x455   : > { %v3314_v21 = vadd.f32 %v2562_v0, %v2228_v61  ;;  %v2872_v13 = vpop.f32.mrb[1].mxu0 }
 0x456   : > { %v3313_v36 = vadd.f32 %v3312_v53, %v2870_v17 }
 0x457   : > { %v3315_v59 = vadd.f32 %v3314_v21, %v2872_v13  ;;  %v2568_v50 = vpop.f32.mrb[2].mxu1 }
 0x458   : > { %v3316_v3 = vadd.f32 %v2568_v50, %v2233_v16  ;;  %v2877_v12 = vpop.f32.mrb[2].mxu0  ;;  %v2570_v49 = vpop.f32.mrb[3].mxu1 }
 0x459   : > { %v3318_v58 = vadd.f32 %v2570_v49, %v2233_v16  ;;  %v2879_v47 = vpop.f32.mrb[3].mxu0 }
 0x45a   : > { %v3317_v26 = vadd.f32 %v3316_v3, %v2877_v12 }
 0x45b   : > { %v3319_v20 = vadd.f32 %v3318_v58, %v2879_v47  ;;  %v2576_v11 = vpop.f32.mrb[4].mxu1 }
 0x45c   : > { %v3320_v7 = vadd.f32 %v2576_v11, %v2238_v23  ;;  %v2884_v52 = vpop.f32.mrb[4].mxu0  ;;  %v2578_v60 = vpop.f32.mrb[5].mxu1 }
 0x45d   : > { %v3322_v51 = vadd.f32 %v2578_v60, %v2238_v23  ;;  %v2886_v27 = vpop.f32.mrb[5].mxu0 }
 0x45e   : > { %v3321_v6 = vadd.f32 %v3320_v7, %v2884_v52 }
 0x45f   : > { %v3323_v38 = vadd.f32 %v3322_v51, %v2886_v27  ;;  %v2584_v55 = vpop.f32.mrb[6].mxu1 }
 0x460   : > { %v3280_v35 = vmul.f32 -1.442695, %v3321_v6  ;;  %v3324_v41 = vadd.f32 %v2584_v55, %v2243_v62  ;;  %v2891_v24 = vpop.f32.mrb[6].mxu0  ;;  %v2586_v25 = vpop.f32.mrb[7].mxu1 }
 0x461   : > { %v3281_v18 = vmul.f32 -1.442695, %v3323_v38  ;;  %v3326_v28 = vadd.f32 %v2586_v25, %v2243_v62  ;;  %v2893_v32 = vpop.f32.mrb[7].mxu0 }
 0x462   : > { %3440 = vpow2.f32 %v3280_v35  ;;  %v3325_v39 = vadd.f32 %v3324_v41, %v2891_v24 }
 0x463   : > { %3442 = vpow2.f32 %v3281_v18  ;;  %v3327_v63 = vadd.f32 %v3326_v28, %v2893_v32 }
 0x464   : > { %v3282_v19 = vmul.f32 -1.442695, %v3325_v39 }
 0x465   : > { %v3283_v14 = vmul.f32 -1.442695, %v3327_v63 }
 0x466   : > { %3444 = vpow2.f32 %v3282_v19 }
 0x467   : > { %3446 = vpow2.f32 %v3283_v14 }
 0x46c   : > { %v3441_v10 = vpop.eup %3440 }
 0x46d   : > { %v3443_v37 = vpop.eup %3442  ;;  %v2908_v4 = vadd.f32 1.0, %v3441_v10 }
 0x46e   : > { %v2909_v1 = vadd.f32 1.0, %v3443_v37 }
 0x46f   : > { %3448 = vrcp.f32 %v2908_v4 }
 0x470   : > { %v3445_v40 = vpop.eup %3444  ;;  %3450 = vrcp.f32 %v2909_v1 }
 0x471   : > { %v3447_v34 = vpop.eup %3446  ;;  %v2910_v5 = vadd.f32 1.0, %v3445_v40 }
 0x472   : > { %v2911_v54 = vadd.f32 1.0, %v3447_v34 }
 0x473   : > { %3452 = vrcp.f32 %v2910_v5 }
 0x474   : > { %3454 = vrcp.f32 %v2911_v54 }
 0x479   : > { %v3449_v45 = vpop.eup %3448 }
 0x47a   : > { %v3451_v9 = vpop.eup %3450  ;;  %v2920_v42 = vmul.f32 %v3449_v45, %v3313_v36 }
 0x47b   : > { %v2921_v33 = vmul.f32 %v3451_v9, %v3315_v59 }
 0x47c   : > { %2924 = vst [vmem:[%s278_s11] sm:$0xff] %v2920_v42 }
 0x47d   : > { %v3453_v15 = vpop.eup %3452  ;;  %2925 = vst [vmem:[%s278_s11 + $0x8] sm:$0xff] %v2921_v33 }
 0x47e   : > { %v3455_v8 = vpop.eup %3454  ;;  %v2922_v56 = vmul.f32 %v3453_v15, %v3317_v26 }
 0x47f   : > { %v2923_v29 = vmul.f32 %v3455_v8, %v3319_v20 }
 0x480   : > { %2926 = vst [vmem:[%s278_s11 + $0x10] sm:$0xff] %v2922_v56 }
 0x481   : > { %2927 = vst [vmem:[%s278_s11 + $0x18] sm:$0xff] %v2923_v29 }
 0x482 PF: > { %s17_s24 = sadd.s32 1, %s3462_s24  }
 0x483   : > { %p14_p4 = scmp.ge.s32.totalorder %s17_s24, 4  }
 0x485   :  { %16 = sbr.rel (!%p14_p4) target bundleno = 1 (0x1), region = 150 }

</bundles_post_ra>
